<compile_context>
chip_gen: v7x
topology: tpu7x:2x2x1
jax: 0.10.0
libtpu: 0.0.40
codegen_flags: <defaults>
</compile_context>

<pallas_src>
import math
import functools

import jax
import jax.numpy as jnp
from jax import lax
from jax.experimental import pallas as pl
from jax.experimental.pallas import tpu as pltpu

F32 = jnp.float32
BF16 = jnp.bfloat16
LN_EPS = 1e-5
VMEM_LIMIT = 40 * 1024 * 1024  # explicit scoped-VMEM cap; safe on v5e/v6e/v7x


def _layer_norm(x, gamma, beta):
    """f32 LayerNorm over the last axis (PyTorch semantics, eps=1e-5)."""
    mu = jnp.mean(x, axis=-1, keepdims=True)
    xc = x - mu
    var = jnp.mean(xc * xc, axis=-1, keepdims=True)
    return xc * lax.rsqrt(var + LN_EPS) * gamma + beta


# --------------------------------------------------------------------------------------
# fused forward kernel: embed -> [LN1 -> MHA -> +res -> LN2 -> MLP -> +res] x L -> heads
# --------------------------------------------------------------------------------------
def fused_forward_kernel(lat_ref, win_ref, bin_ref, pos_ref,
                         ln1g_ref, ln1b_ref, wqkv_ref, bqkv_ref, wp_ref, bp_ref,
                         ln2g_ref, ln2b_ref, w1_ref, b1_ref, w2_ref, b2_ref,
                         wh_ref, bh_ref, out_ref,
                         *, num_heads, action_size):
    B, S, Lt = lat_ref.shape
    H = num_heads
    hd = wp_ref.shape[2]
    D = H * hd
    M = B * S
    NL = ln1g_ref.shape[0]
    A = action_size

    # ---- embed: input_proj + positional embedding; residual stream kept f32 in VMEM ----
    lat = lat_ref[...].reshape(M, Lt).astype(BF16)                 # fold batch into M
    x = jnp.dot(lat, win_ref[...], preferred_element_type=F32)     # (M, D)
    pos = pos_ref[0:S, :]                                          # (S, D) static slice
    x = x + bin_ref[...] + jnp.concatenate([pos] * B, axis=0)      # (M, D) f32

    def split_heads(t):
        # t: (M, D) f32 with head h occupying lanes [h*hd, (h+1)*hd)  ->  (H*B, S, hd) bf16
        parts = [t[:, h * hd:(h + 1) * hd].reshape(B, S, hd) for h in range(H)]
        heads = jnp.stack(parts, axis=0)                           # (H, B, S, hd)
        return heads.reshape(H * B, S, hd).astype(BF16)

    for l in range(NL):
        # ---- pre-norm multi-head attention --------------------------------------------
        xn = _layer_norm(x, ln1g_ref[l], ln1b_ref[l]).astype(BF16)  # (M, D)
        # one lane-dense QKV matmul; 1/sqrt(hd) already folded into the q columns / bias
        qkv = (jnp.dot(xn, wqkv_ref[l], preferred_element_type=F32)
               + bqkv_ref[l])                                       # (M, 3D) f32
        qh = split_heads(qkv[:, 0:D])                               # (H*B, S, hd)
        kh = split_heads(qkv[:, D:2 * D])
        vh = split_heads(qkv[:, 2 * D:3 * D])

        # all-head logits with a single batched dot_general (batch = H*B, contract hd)
        logits = lax.dot_general(qh, kh, (((2,), (2,)), ((0,), (0,))),
                                 preferred_element_type=F32)        # (H*B, S, S) f32
        # one softmax for all heads/batches; denominator reciprocal on the EUP
        logits = logits - jnp.max(logits, axis=-1, keepdims=True)
        p = jnp.exp(logits)
        p = p * pl.reciprocal(jnp.sum(p, axis=-1, keepdims=True), approx=True)
        o = lax.dot_general(p.astype(BF16), vh, (((2,), (1,)), ((0,), (0,))),
                            preferred_element_type=F32)             # (H*B, S, hd)

        # output projection: one H-batched (H, M, hd) x (H, hd, D) dot_general + head-sum
        o_hm = o.reshape(H, B, S, hd).reshape(H, M, hd).astype(BF16)
        attn = lax.dot_general(o_hm, wp_ref[l], (((2,), (1,)), ((0,), (0,))),
                               preferred_element_type=F32)          # (H, M, D) f32
        x = x + jnp.sum(attn, axis=0) + bp_ref[l]

        # ---- pre-norm MLP ---------------------------------------------------------------
        xn2 = _layer_norm(x, ln2g_ref[l], ln2b_ref[l]).astype(BF16)
        h1 = jnp.dot(xn2, w1_ref[l], preferred_element_type=F32) + b1_ref[l]
        h1 = jax.nn.gelu(h1, approximate=True)
        h2 = jnp.dot(h1.astype(BF16), w2_ref[l], preferred_element_type=F32) + b2_ref[l]
        x = x + h2

    # ---- actor/critic heads on last-token features; single lane-dense (B, 128) output ----
    feats = jnp.concatenate(
        [x[b * S + S - 1: b * S + S, :] for b in range(B)], axis=0).astype(BF16)  # (B, D)
    raw = jnp.dot(feats, wh_ref[...], preferred_element_type=F32) + bh_ref[...]   # (B, P)
    col = lax.broadcasted_iota(jnp.int32, raw.shape, 1)
    is_log_std = jnp.logical_and(col >= A, col < 2 * A)
    # clamp(-20, 2) + exp applied only to the log_std columns (others pass through)
    out_ref[...] = jnp.where(is_log_std, jnp.exp(jnp.clip(raw, -20.0, 2.0)), raw)


# --------------------------------------------------------------------------------------
# wrapper: single pallas_call for the whole forward
# --------------------------------------------------------------------------------------
def _full_spec(shape):
    nd = len(shape)

    def idx(i):
        return (0,) * nd

    return pl.BlockSpec(shape, idx)


def actor_critic_forward(latent, kp, *, num_heads, action_size):
    B, S, _ = latent.shape
    P = kp['w_heads'].shape[1]
    A = action_size

    kernel = functools.partial(fused_forward_kernel,
                               num_heads=num_heads, action_size=A)

    args = (latent, kp['w_in_t'], kp['b_in'], kp['pos'],
            kp['ln1_g'], kp['ln1_b'], kp['w_qkv'], kp['b_qkv'], kp['w_p'], kp['b_p'],
            kp['ln2_g'], kp['ln2_b'], kp['w1'], kp['b1'], kp['w2'], kp['b2'],
            kp['w_heads'], kp['b_heads'])

    out = pl.pallas_call(
        kernel,
        out_shape=jax.ShapeDtypeStruct((B, P), F32),
        grid_spec=pltpu.PrefetchScalarGridSpec(
            num_scalar_prefetch=0,
            grid=(1,),
            in_specs=[_full_spec(a.shape) for a in args],
            out_specs=_full_spec((B, P)),
        ),
        compiler_params=pltpu.CompilerParams(
            dimension_semantics=("arbitrary",), vmem_limit_bytes=VMEM_LIMIT),
    )(*args)

    mean = out[:, 0:A]
    std = out[:, A:2 * A]
    value = out[:, 2 * A:2 * A + 1]
    return mean, std, value


# --------------------------------------------------------------------------------------
# parameter init (PyTorch layout) + wrapper-side re-layout for the fused kernel
# --------------------------------------------------------------------------------------
def init_torch_params(key, *, latent_size, hidden_size, num_layers, num_heads, action_size):
    D = hidden_size

    def linear(k, out_f, in_f):
        k1, k2 = jax.random.split(k)
        bound = 1.0 / math.sqrt(in_f)
        w = jax.random.uniform(k1, (out_f, in_f), F32, -bound, bound)
        b = jax.random.uniform(k2, (out_f,), F32, -bound, bound)
        return w, b

    k_pos, k_in, k_layers, k_heads = jax.random.split(key, 4)
    layer_keys = jax.random.split(k_layers, num_layers)
    head_keys = jax.random.split(k_heads, 3)

    p = {'pos': jax.random.normal(k_pos, (1, 32, D), F32)}
    p['w_in'], p['b_in'] = linear(k_in, D, latent_size)

    layers = []
    for l in range(num_layers):
        lk = jax.random.split(layer_keys[l], 4)
        w_qkv, b_qkv = linear(lk[0], 3 * D, D)
        w_proj, b_proj = linear(lk[1], D, D)
        w1, b1 = linear(lk[2], 4 * D, D)
        w2, b2 = linear(lk[3], D, 4 * D)
        layers.append(dict(
            ln1_g=jnp.ones((D,), F32), ln1_b=jnp.zeros((D,), F32),
            w_qkv=w_qkv, b_qkv=b_qkv, w_proj=w_proj, b_proj=b_proj,
            ln2_g=jnp.ones((D,), F32), ln2_b=jnp.zeros((D,), F32),
            w_mlp1=w1, b_mlp1=b1, w_mlp2=w2, b_mlp2=b2))
    p['layers'] = layers

    p['w_am'], p['b_am'] = linear(head_keys[0], action_size, D)
    p['w_as'], p['b_as'] = linear(head_keys[1], action_size, D)
    p['w_c'], p['b_c'] = linear(head_keys[2], 1, D)
    return p


def prep_kernel_params(tp, *, num_heads):
    """One-time re-layout: transpose, stack per-layer, fold 1/sqrt(hd), bf16 weights,
    and merge the three head linears into one zero-padded lane-dense (D, 128) weight."""
    D = tp['w_in'].shape[0]
    hd = D // num_heads
    inv_scale = 1.0 / math.sqrt(hd)

    def row(v):
        return v.reshape(1, -1).astype(F32)

    qkv_scale = jnp.concatenate(
        [jnp.full((D,), inv_scale, F32), jnp.ones((2 * D,), F32)])      # scale q cols only

    ln1_g, ln1_b, wqkv, bqkv, wp, bp = [], [], [], [], [], []
    ln2_g, ln2_b, w1, b1, w2, b2 = [], [], [], [], [], []
    for lp in tp['layers']:
        ln1_g.append(row(lp['ln1_g'])); ln1_b.append(row(lp['ln1_b']))
        wqkv.append((lp['w_qkv'].T * qkv_scale[None, :]).astype(BF16))  # (D, 3D)
        bqkv.append((lp['b_qkv'] * qkv_scale).reshape(1, 3 * D).astype(F32))
        wp.append(lp['w_proj'].T.reshape(num_heads, hd, D).astype(BF16))  # (H, hd, D)
        bp.append(row(lp['b_proj']))
        ln2_g.append(row(lp['ln2_g'])); ln2_b.append(row(lp['ln2_b']))
        w1.append(lp['w_mlp1'].T.astype(BF16)); b1.append(row(lp['b_mlp1']))
        w2.append(lp['w_mlp2'].T.astype(BF16)); b2.append(row(lp['b_mlp2']))

    A = tp['w_am'].shape[0]
    P = max(128, ((2 * A + 1 + 127) // 128) * 128)                      # lane-dense head output
    w_cat = jnp.concatenate([tp['w_am'].T, tp['w_as'].T, tp['w_c'].T], axis=1)   # (D, 2A+1)
    b_cat = jnp.concatenate([tp['b_am'], tp['b_as'], tp['b_c']])                  # (2A+1,)
    w_heads = jnp.zeros((D, P), F32).at[:, :2 * A + 1].set(w_cat).astype(BF16)
    b_heads = jnp.zeros((1, P), F32).at[0, :2 * A + 1].set(b_cat)

    return {
        'w_in_t': tp['w_in'].T.astype(BF16),
        'b_in': row(tp['b_in']),
        'pos': tp['pos'][0].astype(F32),                                # (32, D)
        'ln1_g': jnp.stack(ln1_g), 'ln1_b': jnp.stack(ln1_b),
        'w_qkv': jnp.stack(wqkv), 'b_qkv': jnp.stack(bqkv),
        'w_p': jnp.stack(wp), 'b_p': jnp.stack(bp),
        'ln2_g': jnp.stack(ln2_g), 'ln2_b': jnp.stack(ln2_b),
        'w1': jnp.stack(w1), 'b1': jnp.stack(b1),
        'w2': jnp.stack(w2), 'b2': jnp.stack(b2),
        'w_heads': w_heads, 'b_heads': b_heads,
    }


# --------------------------------------------------------------------------------------
# pure-JAX reference (PyTorch algorithm; bf16 matmul operands, f32 accumulate/residual)
# --------------------------------------------------------------------------------------
def reference_forward(latent, tp, *, num_heads):
    B, S, Lt = latent.shape
    D = tp['w_in'].shape[0]
    hd = D // num_heads

    x = jnp.dot(latent.reshape(B * S, Lt).astype(BF16), tp['w_in'].T.astype(BF16),
                preferred_element_type=F32).reshape(B, S, D)
    x = x + tp['b_in'] + tp['pos'][:, :S, :]

    for lp in tp['layers']:
        xn = _layer_norm(x, lp['ln1_g'], lp['ln1_b']).astype(BF16)
        qkv = jnp.einsum('bsd,ed->bse', xn, lp['w_qkv'].astype(BF16),
                         preferred_element_type=F32) + lp['b_qkv']
        qkv = qkv.reshape(B, S, 3, num_heads, hd).transpose(2, 0, 3, 1, 4)
        q, k, v = qkv[0] * (1.0 / math.sqrt(hd)), qkv[1], qkv[2]
        s = jnp.einsum('bhqd,bhkd->bhqk', q.astype(BF16), k.astype(BF16),
                       preferred_element_type=F32)
        p = jax.nn.softmax(s, axis=-1)
        o = jnp.einsum('bhqk,bhkd->bhqd', p.astype(BF16), v.astype(BF16),
                       preferred_element_type=F32)
        o = o.transpose(0, 2, 1, 3).reshape(B, S, D)
        attn = jnp.einsum('bsd,ed->bse', o.astype(BF16), lp['w_proj'].astype(BF16),
                          preferred_element_type=F32) + lp['b_proj']
        x = x + attn

        xn2 = _layer_norm(x, lp['ln2_g'], lp['ln2_b']).astype(BF16)
        h1 = jnp.einsum('bsd,ed->bse', xn2, lp['w_mlp1'].astype(BF16),
                        preferred_element_type=F32) + lp['b_mlp1']
        h1 = jax.nn.gelu(h1, approximate=True)
        h2 = jnp.einsum('bse,de->bsd', h1.astype(BF16), lp['w_mlp2'].astype(BF16),
                        preferred_element_type=F32) + lp['b_mlp2']
        x = x + h2

    feats = x[:, -1, :].astype(BF16)
    mean = jnp.dot(feats, tp['w_am'].T.astype(BF16), preferred_element_type=F32) + tp['b_am']
    log_std = jnp.dot(feats, tp['w_as'].T.astype(BF16), preferred_element_type=F32) + tp['b_as']
    std = jnp.exp(jnp.clip(log_std, -20.0, 2.0))
    value = jnp.dot(feats, tp['w_c'].T.astype(BF16), preferred_element_type=F32) + tp['b_c']
    return mean, std, value


if __name__ == "__main__":
    # Small shapes consistent with the module (hidden chosen lane-dense = 128).
    B, S = 2, 16
    LATENT, HIDDEN, HEADS, LAYERS, ACTION = 32, 128, 4, 2, 1

    key = jax.random.PRNGKey(0)
    k_in, k_par = jax.random.split(key)
    latent_seq = jax.random.normal(k_in, (B, S, LATENT), F32)

    torch_params = init_torch_params(k_par, latent_size=LATENT, hidden_size=HIDDEN,
                                     num_layers=LAYERS, num_heads=HEADS,
                                     action_size=ACTION)
    kernel_params = prep_kernel_params(torch_params, num_heads=HEADS)

    mean, std, value = actor_critic_forward(latent_seq, kernel_params,
                                            num_heads=HEADS, action_size=ACTION)
    mean, std, value = jax.block_until_ready((mean, std, value))

    r_mean, r_std, r_value = reference_forward(latent_seq, torch_params, num_heads=HEADS)

    assert mean.shape == (B, ACTION) and std.shape == (B, ACTION) and value.shape == (B, 1)
    for got, ref, name in ((mean, r_mean, "mean"), (std, r_std, "std"), (value, r_value, "value")):
        assert jnp.allclose(got, ref, atol=2e-2, rtol=2e-2), f"{name} mismatch vs reference"

    print("KERNEL_OK")
</pallas_src>

<mosaic_0001>
module attributes {stable_mosaic.version = 11 : i64} {
  func.func @fused_forward_kernel(%arg0: i32, %arg1: memref<2x16x32xf32, #tpu.memory_space<vmem>>, %arg2: memref<32x128xbf16, #tpu.memory_space<vmem>>, %arg3: memref<1x128xf32, #tpu.memory_space<vmem>>, %arg4: memref<32x128xf32, #tpu.memory_space<vmem>>, %arg5: memref<2x1x128xf32, #tpu.memory_space<vmem>>, %arg6: memref<2x1x128xf32, #tpu.memory_space<vmem>>, %arg7: memref<2x128x384xbf16, #tpu.memory_space<vmem>>, %arg8: memref<2x1x384xf32, #tpu.memory_space<vmem>>, %arg9: memref<2x4x32x128xbf16, #tpu.memory_space<vmem>>, %arg10: memref<2x1x128xf32, #tpu.memory_space<vmem>>, %arg11: memref<2x1x128xf32, #tpu.memory_space<vmem>>, %arg12: memref<2x1x128xf32, #tpu.memory_space<vmem>>, %arg13: memref<2x128x512xbf16, #tpu.memory_space<vmem>>, %arg14: memref<2x1x512xf32, #tpu.memory_space<vmem>>, %arg15: memref<2x512x128xbf16, #tpu.memory_space<vmem>>, %arg16: memref<2x1x128xf32, #tpu.memory_space<vmem>>, %arg17: memref<128x128xbf16, #tpu.memory_space<vmem>>, %arg18: memref<1x128xf32, #tpu.memory_space<vmem>>, %arg19: memref<2x128xf32, #tpu.memory_space<vmem>>) attributes {dimension_semantics = [#tpu.dimension_semantics<arbitrary>], iteration_bounds = array<i64: 1>, scalar_prefetch = 0 : i64, scratch_operands = 0 : i64, tpu.core_type = #tpu.core_type<tc>, window_params = [{pipeline_mode = #tpu.pipeline_mode<synchronous>, transform_indices = @transform_0, window_bounds = array<i64: 2, 16, 32>}, {pipeline_mode = #tpu.pipeline_mode<synchronous>, transform_indices = @transform_1, window_bounds = array<i64: 32, 128>}, {pipeline_mode = #tpu.pipeline_mode<synchronous>, transform_indices = @transform_2, window_bounds = array<i64: 1, 128>}, {pipeline_mode = #tpu.pipeline_mode<synchronous>, transform_indices = @transform_3, window_bounds = array<i64: 32, 128>}, {pipeline_mode = #tpu.pipeline_mode<synchronous>, transform_indices = @transform_4, window_bounds = array<i64: 2, 1, 128>}, {pipeline_mode = #tpu.pipeline_mode<synchronous>, transform_indices = @transform_5, window_bounds = array<i64: 2, 1, 128>}, {pipeline_mode = #tpu.pipeline_mode<synchronous>, transform_indices = @transform_6, window_bounds = array<i64: 2, 128, 384>}, {pipeline_mode = #tpu.pipeline_mode<synchronous>, transform_indices = @transform_7, window_bounds = array<i64: 2, 1, 384>}, {pipeline_mode = #tpu.pipeline_mode<synchronous>, transform_indices = @transform_8, window_bounds = array<i64: 2, 4, 32, 128>}, {pipeline_mode = #tpu.pipeline_mode<synchronous>, transform_indices = @transform_9, window_bounds = array<i64: 2, 1, 128>}, {pipeline_mode = #tpu.pipeline_mode<synchronous>, transform_indices = @transform_10, window_bounds = array<i64: 2, 1, 128>}, {pipeline_mode = #tpu.pipeline_mode<synchronous>, transform_indices = @transform_11, window_bounds = array<i64: 2, 1, 128>}, {pipeline_mode = #tpu.pipeline_mode<synchronous>, transform_indices = @transform_12, window_bounds = array<i64: 2, 128, 512>}, {pipeline_mode = #tpu.pipeline_mode<synchronous>, transform_indices = @transform_13, window_bounds = array<i64: 2, 1, 512>}, {pipeline_mode = #tpu.pipeline_mode<synchronous>, transform_indices = @transform_14, window_bounds = array<i64: 2, 512, 128>}, {pipeline_mode = #tpu.pipeline_mode<synchronous>, transform_indices = @transform_15, window_bounds = array<i64: 2, 1, 128>}, {pipeline_mode = #tpu.pipeline_mode<synchronous>, transform_indices = @transform_16, window_bounds = array<i64: 128, 128>}, {pipeline_mode = #tpu.pipeline_mode<synchronous>, transform_indices = @transform_17, window_bounds = array<i64: 1, 128>}, {pipeline_mode = #tpu.pipeline_mode<synchronous>, transform_indices = @transform_18, window_bounds = array<i64: 2, 128>}]} {
    %c0 = arith.constant 0 : index
    %c0_0 = arith.constant 0 : index
    %c0_1 = arith.constant 0 : index
    %0 = vector.load %arg1[%c0, %c0_0, %c0_1] : memref<2x16x32xf32, #tpu.memory_space<vmem>>, vector<2x16x32xf32>
    %1 = vector.shape_cast %0 : vector<2x16x32xf32> to vector<32x32xf32>
    %2 = arith.truncf %1 : vector<32x32xf32> to vector<32x32xbf16>
    %c0_2 = arith.constant 0 : index
    %c0_3 = arith.constant 0 : index
    %3 = vector.load %arg2[%c0_2, %c0_3] : memref<32x128xbf16, #tpu.memory_space<vmem>>, vector<32x128xbf16>
    %cst = arith.constant dense<0.000000e+00> : vector<32x128xf32>
    %4 = tpu.matmul %2, %3, %cst {dimension_numbers = #tpu.dot_dimension_numbers<[1], [0], [0], [1], [0, 0, 1, 1], [], []>} : vector<32x32xbf16>, vector<32x128xbf16>, vector<32x128xf32> -> vector<32x128xf32>
    %c0_4 = arith.constant 0 : index
    %c0_5 = arith.constant 0 : index
    %5 = vector.load %arg4[%c0_4, %c0_5] : memref<32x128xf32, #tpu.memory_space<vmem>>, vector<16x128xf32>
    %c0_6 = arith.constant 0 : index
    %c0_7 = arith.constant 0 : index
    %6 = vector.load %arg3[%c0_6, %c0_7] : memref<1x128xf32, #tpu.memory_space<vmem>>, vector<1x128xf32>
    %7 = vector.broadcast %6 : vector<1x128xf32> to vector<32x128xf32>
    %8 = arith.addf %4, %7 : vector<32x128xf32>
    %9 = tpu.concatenate %5, %5 in 0 : vector<16x128xf32>, vector<16x128xf32> -> vector<32x128xf32>
    %10 = arith.addf %8, %9 : vector<32x128xf32>
    %c0_8 = arith.constant 0 : index
    %c0_9 = arith.constant 0 : index
    %c0_10 = arith.constant 0 : index
    %11 = vector.load %arg5[%c0_8, %c0_9, %c0_10] : memref<2x1x128xf32, #tpu.memory_space<vmem>>, vector<1x1x128xf32>
    %12 = vector.shape_cast %11 : vector<1x1x128xf32> to vector<1x128xf32>
    %c0_11 = arith.constant 0 : index
    %c0_12 = arith.constant 0 : index
    %c0_13 = arith.constant 0 : index
    %13 = vector.load %arg6[%c0_11, %c0_12, %c0_13] : memref<2x1x128xf32, #tpu.memory_space<vmem>>, vector<1x1x128xf32>
    %14 = vector.shape_cast %13 : vector<1x1x128xf32> to vector<1x128xf32>
    %cst_14 = arith.constant dense<0.000000e+00> : vector<32xf32>
    %15 = vector.multi_reduction <add>, %10, %cst_14 [1] : vector<32x128xf32> to vector<32xf32>
    %16 = vector.shape_cast %15 : vector<32xf32> to vector<32x1xf32>
    %cst_15 = arith.constant 1.280000e+02 : f32
    %17 = vector.broadcast %cst_15 : f32 to vector<32x1xf32>
    %18 = arith.divf %16, %17 : vector<32x1xf32>
    %19 = vector.broadcast %18 : vector<32x1xf32> to vector<32x128xf32>
    %20 = arith.subf %10, %19 : vector<32x128xf32>
    %21 = arith.mulf %20, %20 : vector<32x128xf32>
    %cst_16 = arith.constant dense<0.000000e+00> : vector<32xf32>
    %22 = vector.multi_reduction <add>, %21, %cst_16 [1] : vector<32x128xf32> to vector<32xf32>
    %23 = vector.shape_cast %22 : vector<32xf32> to vector<32x1xf32>
    %cst_17 = arith.constant 1.280000e+02 : f32
    %24 = vector.broadcast %cst_17 : f32 to vector<32x1xf32>
    %25 = arith.divf %23, %24 : vector<32x1xf32>
    %cst_18 = arith.constant 9.99999974E-6 : f32
    %26 = vector.broadcast %cst_18 : f32 to vector<32x1xf32>
    %27 = arith.addf %25, %26 : vector<32x1xf32>
    %28 = math.rsqrt %27 : vector<32x1xf32>
    %29 = vector.broadcast %28 : vector<32x1xf32> to vector<32x128xf32>
    %30 = arith.mulf %20, %29 : vector<32x128xf32>
    %31 = vector.broadcast %12 : vector<1x128xf32> to vector<32x128xf32>
    %32 = arith.mulf %30, %31 : vector<32x128xf32>
    %33 = vector.broadcast %14 : vector<1x128xf32> to vector<32x128xf32>
    %34 = arith.addf %32, %33 : vector<32x128xf32>
    %35 = arith.truncf %34 : vector<32x128xf32> to vector<32x128xbf16>
    %c0_19 = arith.constant 0 : index
    %c0_20 = arith.constant 0 : index
    %c0_21 = arith.constant 0 : index
    %36 = vector.load %arg7[%c0_19, %c0_20, %c0_21] : memref<2x128x384xbf16, #tpu.memory_space<vmem>>, vector<1x128x384xbf16>
    %37 = vector.shape_cast %36 : vector<1x128x384xbf16> to vector<128x384xbf16>
    %cst_22 = arith.constant dense<0.000000e+00> : vector<32x384xf32>
    %38 = tpu.matmul %35, %37, %cst_22 {dimension_numbers = #tpu.dot_dimension_numbers<[1], [0], [0], [1], [0, 0, 1, 1], [], []>} : vector<32x128xbf16>, vector<128x384xbf16>, vector<32x384xf32> -> vector<32x384xf32>
    %c0_23 = arith.constant 0 : index
    %c0_24 = arith.constant 0 : index
    %c0_25 = arith.constant 0 : index
    %39 = vector.load %arg8[%c0_23, %c0_24, %c0_25] : memref<2x1x384xf32, #tpu.memory_space<vmem>>, vector<1x1x384xf32>
    %40 = vector.shape_cast %39 : vector<1x1x384xf32> to vector<1x384xf32>
    %41 = vector.broadcast %40 : vector<1x384xf32> to vector<32x384xf32>
    %42 = arith.addf %38, %41 : vector<32x384xf32>
    %43 = vector.extract_strided_slice %42 {offsets = [0, 0], sizes = [32, 128], strides = [1, 1]} : vector<32x384xf32> to vector<32x128xf32>
    %44 = vector.extract_strided_slice %43 {offsets = [0, 0], sizes = [32, 32], strides = [1, 1]} : vector<32x128xf32> to vector<32x32xf32>
    %45 = vector.shape_cast %44 : vector<32x32xf32> to vector<2x16x32xf32>
    %46 = vector.extract_strided_slice %43 {offsets = [0, 32], sizes = [32, 32], strides = [1, 1]} : vector<32x128xf32> to vector<32x32xf32>
    %47 = vector.shape_cast %46 : vector<32x32xf32> to vector<2x16x32xf32>
    %48 = vector.extract_strided_slice %43 {offsets = [0, 64], sizes = [32, 32], strides = [1, 1]} : vector<32x128xf32> to vector<32x32xf32>
    %49 = vector.shape_cast %48 : vector<32x32xf32> to vector<2x16x32xf32>
    %50 = vector.extract_strided_slice %43 {offsets = [0, 96], sizes = [32, 32], strides = [1, 1]} : vector<32x128xf32> to vector<32x32xf32>
    %51 = vector.shape_cast %50 : vector<32x32xf32> to vector<2x16x32xf32>
    %52 = vector.shape_cast %45 : vector<2x16x32xf32> to vector<1x2x16x32xf32>
    %53 = vector.shape_cast %47 : vector<2x16x32xf32> to vector<1x2x16x32xf32>
    %54 = vector.shape_cast %49 : vector<2x16x32xf32> to vector<1x2x16x32xf32>
    %55 = vector.shape_cast %51 : vector<2x16x32xf32> to vector<1x2x16x32xf32>
    %56 = tpu.concatenate %52, %53, %54, %55 in 0 : vector<1x2x16x32xf32>, vector<1x2x16x32xf32>, vector<1x2x16x32xf32>, vector<1x2x16x32xf32> -> vector<4x2x16x32xf32>
    %57 = vector.shape_cast %56 : vector<4x2x16x32xf32> to vector<8x16x32xf32>
    %58 = arith.truncf %57 : vector<8x16x32xf32> to vector<8x16x32xbf16>
    %59 = vector.extract_strided_slice %42 {offsets = [0, 128], sizes = [32, 128], strides = [1, 1]} : vector<32x384xf32> to vector<32x128xf32>
    %60 = vector.extract_strided_slice %59 {offsets = [0, 0], sizes = [32, 32], strides = [1, 1]} : vector<32x128xf32> to vector<32x32xf32>
    %61 = vector.shape_cast %60 : vector<32x32xf32> to vector<2x16x32xf32>
    %62 = vector.extract_strided_slice %59 {offsets = [0, 32], sizes = [32, 32], strides = [1, 1]} : vector<32x128xf32> to vector<32x32xf32>
    %63 = vector.shape_cast %62 : vector<32x32xf32> to vector<2x16x32xf32>
    %64 = vector.extract_strided_slice %59 {offsets = [0, 64], sizes = [32, 32], strides = [1, 1]} : vector<32x128xf32> to vector<32x32xf32>
    %65 = vector.shape_cast %64 : vector<32x32xf32> to vector<2x16x32xf32>
    %66 = vector.extract_strided_slice %59 {offsets = [0, 96], sizes = [32, 32], strides = [1, 1]} : vector<32x128xf32> to vector<32x32xf32>
    %67 = vector.shape_cast %66 : vector<32x32xf32> to vector<2x16x32xf32>
    %68 = vector.shape_cast %61 : vector<2x16x32xf32> to vector<1x2x16x32xf32>
    %69 = vector.shape_cast %63 : vector<2x16x32xf32> to vector<1x2x16x32xf32>
    %70 = vector.shape_cast %65 : vector<2x16x32xf32> to vector<1x2x16x32xf32>
    %71 = vector.shape_cast %67 : vector<2x16x32xf32> to vector<1x2x16x32xf32>
    %72 = tpu.concatenate %68, %69, %70, %71 in 0 : vector<1x2x16x32xf32>, vector<1x2x16x32xf32>, vector<1x2x16x32xf32>, vector<1x2x16x32xf32> -> vector<4x2x16x32xf32>
    %73 = vector.shape_cast %72 : vector<4x2x16x32xf32> to vector<8x16x32xf32>
    %74 = arith.truncf %73 : vector<8x16x32xf32> to vector<8x16x32xbf16>
    %75 = vector.extract_strided_slice %42 {offsets = [0, 256], sizes = [32, 128], strides = [1, 1]} : vector<32x384xf32> to vector<32x128xf32>
    %76 = vector.extract_strided_slice %75 {offsets = [0, 0], sizes = [32, 32], strides = [1, 1]} : vector<32x128xf32> to vector<32x32xf32>
    %77 = vector.shape_cast %76 : vector<32x32xf32> to vector<2x16x32xf32>
    %78 = vector.extract_strided_slice %75 {offsets = [0, 32], sizes = [32, 32], strides = [1, 1]} : vector<32x128xf32> to vector<32x32xf32>
    %79 = vector.shape_cast %78 : vector<32x32xf32> to vector<2x16x32xf32>
    %80 = vector.extract_strided_slice %75 {offsets = [0, 64], sizes = [32, 32], strides = [1, 1]} : vector<32x128xf32> to vector<32x32xf32>
    %81 = vector.shape_cast %80 : vector<32x32xf32> to vector<2x16x32xf32>
    %82 = vector.extract_strided_slice %75 {offsets = [0, 96], sizes = [32, 32], strides = [1, 1]} : vector<32x128xf32> to vector<32x32xf32>
    %83 = vector.shape_cast %82 : vector<32x32xf32> to vector<2x16x32xf32>
    %84 = vector.shape_cast %77 : vector<2x16x32xf32> to vector<1x2x16x32xf32>
    %85 = vector.shape_cast %79 : vector<2x16x32xf32> to vector<1x2x16x32xf32>
    %86 = vector.shape_cast %81 : vector<2x16x32xf32> to vector<1x2x16x32xf32>
    %87 = vector.shape_cast %83 : vector<2x16x32xf32> to vector<1x2x16x32xf32>
    %88 = tpu.concatenate %84, %85, %86, %87 in 0 : vector<1x2x16x32xf32>, vector<1x2x16x32xf32>, vector<1x2x16x32xf32>, vector<1x2x16x32xf32> -> vector<4x2x16x32xf32>
    %89 = vector.shape_cast %88 : vector<4x2x16x32xf32> to vector<8x16x32xf32>
    %90 = arith.truncf %89 : vector<8x16x32xf32> to vector<8x16x32xbf16>
    %cst_26 = arith.constant dense<0.000000e+00> : vector<8x16x16xf32>
    %91 = tpu.matmul %58, %74, %cst_26 {dimension_numbers = #tpu.dot_dimension_numbers<[2], [2], [1], [1], [0, 0, 0, 1, 1, 1], [0], [0]>} : vector<8x16x32xbf16>, vector<8x16x32xbf16>, vector<8x16x16xf32> -> vector<8x16x16xf32>
    %cst_27 = arith.constant dense<0xFF800000> : vector<8x16xf32>
    %92 = vector.multi_reduction <maximumf>, %91, %cst_27 [2] : vector<8x16x16xf32> to vector<8x16xf32>
    %93 = vector.shape_cast %92 : vector<8x16xf32> to vector<8x16x1xf32>
    %94 = vector.broadcast %93 : vector<8x16x1xf32> to vector<8x16x16xf32>
    %95 = arith.subf %91, %94 : vector<8x16x16xf32>
    %96 = math.exp %95 : vector<8x16x16xf32>
    %cst_28 = arith.constant dense<0.000000e+00> : vector<8x16xf32>
    %97 = vector.multi_reduction <add>, %96, %cst_28 [2] : vector<8x16x16xf32> to vector<8x16xf32>
    %98 = vector.shape_cast %97 : vector<8x16xf32> to vector<8x16x1xf32>
    %99 = tpu.reciprocal %98 {approx = true} : vector<8x16x1xf32> -> vector<8x16x1xf32>
    %100 = vector.broadcast %99 : vector<8x16x1xf32> to vector<8x16x16xf32>
    %101 = arith.mulf %96, %100 : vector<8x16x16xf32>
    %102 = arith.truncf %101 : vector<8x16x16xf32> to vector<8x16x16xbf16>
    %cst_29 = arith.constant dense<0.000000e+00> : vector<8x16x32xf32>
    %103 = tpu.matmul %102, %90, %cst_29 {dimension_numbers = #tpu.dot_dimension_numbers<[2], [1], [1], [2], [0, 0, 0, 1, 1, 2], [0], [0]>} : vector<8x16x16xbf16>, vector<8x16x32xbf16>, vector<8x16x32xf32> -> vector<8x16x32xf32>
    %104 = vector.shape_cast %103 : vector<8x16x32xf32> to vector<4x2x16x32xf32>
    %105 = vector.shape_cast %104 : vector<4x2x16x32xf32> to vector<4x32x32xf32>
    %106 = arith.truncf %105 : vector<4x32x32xf32> to vector<4x32x32xbf16>
    %c0_30 = arith.constant 0 : index
    %c0_31 = arith.constant 0 : index
    %c0_32 = arith.constant 0 : index
    %c0_33 = arith.constant 0 : index
    %107 = vector.load %arg9[%c0_30, %c0_31, %c0_32, %c0_33] : memref<2x4x32x128xbf16, #tpu.memory_space<vmem>>, vector<1x4x32x128xbf16>
    %108 = vector.shape_cast %107 : vector<1x4x32x128xbf16> to vector<4x32x128xbf16>
    %cst_34 = arith.constant dense<0.000000e+00> : vector<4x32x128xf32>
    %109 = tpu.matmul %106, %108, %cst_34 {dimension_numbers = #tpu.dot_dimension_numbers<[2], [1], [1], [2], [0, 0, 0, 1, 1, 2], [0], [0]>} : vector<4x32x32xbf16>, vector<4x32x128xbf16>, vector<4x32x128xf32> -> vector<4x32x128xf32>
    %cst_35 = arith.constant dense<0.000000e+00> : vector<32x128xf32>
    %110 = vector.multi_reduction <add>, %109, %cst_35 [0] : vector<4x32x128xf32> to vector<32x128xf32>
    %111 = arith.addf %10, %110 : vector<32x128xf32>
    %c0_36 = arith.constant 0 : index
    %c0_37 = arith.constant 0 : index
    %c0_38 = arith.constant 0 : index
    %112 = vector.load %arg10[%c0_36, %c0_37, %c0_38] : memref<2x1x128xf32, #tpu.memory_space<vmem>>, vector<1x1x128xf32>
    %113 = vector.shape_cast %112 : vector<1x1x128xf32> to vector<1x128xf32>
    %114 = vector.broadcast %113 : vector<1x128xf32> to vector<32x128xf32>
    %115 = arith.addf %111, %114 : vector<32x128xf32>
    %c0_39 = arith.constant 0 : index
    %c0_40 = arith.constant 0 : index
    %c0_41 = arith.constant 0 : index
    %116 = vector.load %arg11[%c0_39, %c0_40, %c0_41] : memref<2x1x128xf32, #tpu.memory_space<vmem>>, vector<1x1x128xf32>
    %117 = vector.shape_cast %116 : vector<1x1x128xf32> to vector<1x128xf32>
    %c0_42 = arith.constant 0 : index
    %c0_43 = arith.constant 0 : index
    %c0_44 = arith.constant 0 : index
    %118 = vector.load %arg12[%c0_42, %c0_43, %c0_44] : memref<2x1x128xf32, #tpu.memory_space<vmem>>, vector<1x1x128xf32>
    %119 = vector.shape_cast %118 : vector<1x1x128xf32> to vector<1x128xf32>
    %cst_45 = arith.constant dense<0.000000e+00> : vector<32xf32>
    %120 = vector.multi_reduction <add>, %115, %cst_45 [1] : vector<32x128xf32> to vector<32xf32>
    %121 = vector.shape_cast %120 : vector<32xf32> to vector<32x1xf32>
    %cst_46 = arith.constant 1.280000e+02 : f32
    %122 = vector.broadcast %cst_46 : f32 to vector<32x1xf32>
    %123 = arith.divf %121, %122 : vector<32x1xf32>
    %124 = vector.broadcast %123 : vector<32x1xf32> to vector<32x128xf32>
    %125 = arith.subf %115, %124 : vector<32x128xf32>
    %126 = arith.mulf %125, %125 : vector<32x128xf32>
    %cst_47 = arith.constant dense<0.000000e+00> : vector<32xf32>
    %127 = vector.multi_reduction <add>, %126, %cst_47 [1] : vector<32x128xf32> to vector<32xf32>
    %128 = vector.shape_cast %127 : vector<32xf32> to vector<32x1xf32>
    %cst_48 = arith.constant 1.280000e+02 : f32
    %129 = vector.broadcast %cst_48 : f32 to vector<32x1xf32>
    %130 = arith.divf %128, %129 : vector<32x1xf32>
    %cst_49 = arith.constant 9.99999974E-6 : f32
    %131 = vector.broadcast %cst_49 : f32 to vector<32x1xf32>
    %132 = arith.addf %130, %131 : vector<32x1xf32>
    %133 = math.rsqrt %132 : vector<32x1xf32>
    %134 = vector.broadcast %133 : vector<32x1xf32> to vector<32x128xf32>
    %135 = arith.mulf %125, %134 : vector<32x128xf32>
    %136 = vector.broadcast %117 : vector<1x128xf32> to vector<32x128xf32>
    %137 = arith.mulf %135, %136 : vector<32x128xf32>
    %138 = vector.broadcast %119 : vector<1x128xf32> to vector<32x128xf32>
    %139 = arith.addf %137, %138 : vector<32x128xf32>
    %140 = arith.truncf %139 : vector<32x128xf32> to vector<32x128xbf16>
    %c0_50 = arith.constant 0 : index
    %c0_51 = arith.constant 0 : index
    %c0_52 = arith.constant 0 : index
    %141 = vector.load %arg13[%c0_50, %c0_51, %c0_52] : memref<2x128x512xbf16, #tpu.memory_space<vmem>>, vector<1x128x512xbf16>
    %142 = vector.shape_cast %141 : vector<1x128x512xbf16> to vector<128x512xbf16>
    %cst_53 = arith.constant dense<0.000000e+00> : vector<32x512xf32>
    %143 = tpu.matmul %140, %142, %cst_53 {dimension_numbers = #tpu.dot_dimension_numbers<[1], [0], [0], [1], [0, 0, 1, 1], [], []>} : vector<32x128xbf16>, vector<128x512xbf16>, vector<32x512xf32> -> vector<32x512xf32>
    %c0_54 = arith.constant 0 : index
    %c0_55 = arith.constant 0 : index
    %c0_56 = arith.constant 0 : index
    %144 = vector.load %arg14[%c0_54, %c0_55, %c0_56] : memref<2x1x512xf32, #tpu.memory_space<vmem>>, vector<1x1x512xf32>
    %145 = vector.shape_cast %144 : vector<1x1x512xf32> to vector<1x512xf32>
    %146 = vector.broadcast %145 : vector<1x512xf32> to vector<32x512xf32>
    %147 = arith.addf %143, %146 : vector<32x512xf32>
    %148 = arith.mulf %147, %147 : vector<32x512xf32>
    %149 = arith.mulf %147, %148 : vector<32x512xf32>
    %cst_57 = arith.constant 4.471500e-02 : f32
    %150 = vector.broadcast %cst_57 : f32 to vector<32x512xf32>
    %151 = arith.mulf %150, %149 : vector<32x512xf32>
    %152 = arith.addf %147, %151 : vector<32x512xf32>
    %cst_58 = arith.constant 0.797884583 : f32
    %153 = vector.broadcast %cst_58 : f32 to vector<32x512xf32>
    %154 = arith.mulf %153, %152 : vector<32x512xf32>
    %155 = math.tanh %154 : vector<32x512xf32>
    %cst_59 = arith.constant 1.000000e+00 : f32
    %156 = vector.broadcast %cst_59 : f32 to vector<32x512xf32>
    %157 = arith.addf %156, %155 : vector<32x512xf32>
    %cst_60 = arith.constant 5.000000e-01 : f32
    %158 = vector.broadcast %cst_60 : f32 to vector<32x512xf32>
    %159 = arith.mulf %158, %157 : vector<32x512xf32>
    %160 = arith.mulf %147, %159 : vector<32x512xf32>
    %161 = arith.truncf %160 : vector<32x512xf32> to vector<32x512xbf16>
    %c0_61 = arith.constant 0 : index
    %c0_62 = arith.constant 0 : index
    %c0_63 = arith.constant 0 : index
    %162 = vector.load %arg15[%c0_61, %c0_62, %c0_63] : memref<2x512x128xbf16, #tpu.memory_space<vmem>>, vector<1x512x128xbf16>
    %163 = vector.shape_cast %162 : vector<1x512x128xbf16> to vector<512x128xbf16>
    %cst_64 = arith.constant dense<0.000000e+00> : vector<32x128xf32>
    %164 = tpu.matmul %161, %163, %cst_64 {dimension_numbers = #tpu.dot_dimension_numbers<[1], [0], [0], [1], [0, 0, 1, 1], [], []>} : vector<32x512xbf16>, vector<512x128xbf16>, vector<32x128xf32> -> vector<32x128xf32>
    %c0_65 = arith.constant 0 : index
    %c0_66 = arith.constant 0 : index
    %c0_67 = arith.constant 0 : index
    %165 = vector.load %arg16[%c0_65, %c0_66, %c0_67] : memref<2x1x128xf32, #tpu.memory_space<vmem>>, vector<1x1x128xf32>
    %166 = vector.shape_cast %165 : vector<1x1x128xf32> to vector<1x128xf32>
    %167 = vector.broadcast %166 : vector<1x128xf32> to vector<32x128xf32>
    %168 = arith.addf %164, %167 : vector<32x128xf32>
    %169 = arith.addf %115, %168 : vector<32x128xf32>
    %c1 = arith.constant 1 : index
    %c0_68 = arith.constant 0 : index
    %c0_69 = arith.constant 0 : index
    %170 = vector.load %arg5[%c1, %c0_68, %c0_69] : memref<2x1x128xf32, #tpu.memory_space<vmem>>, vector<1x1x128xf32>
    %171 = vector.shape_cast %170 : vector<1x1x128xf32> to vector<1x128xf32>
    %c1_70 = arith.constant 1 : index
    %c0_71 = arith.constant 0 : index
    %c0_72 = arith.constant 0 : index
    %172 = vector.load %arg6[%c1_70, %c0_71, %c0_72] : memref<2x1x128xf32, #tpu.memory_space<vmem>>, vector<1x1x128xf32>
    %173 = vector.shape_cast %172 : vector<1x1x128xf32> to vector<1x128xf32>
    %cst_73 = arith.constant dense<0.000000e+00> : vector<32xf32>
    %174 = vector.multi_reduction <add>, %169, %cst_73 [1] : vector<32x128xf32> to vector<32xf32>
    %175 = vector.shape_cast %174 : vector<32xf32> to vector<32x1xf32>
    %cst_74 = arith.constant 1.280000e+02 : f32
    %176 = vector.broadcast %cst_74 : f32 to vector<32x1xf32>
    %177 = arith.divf %175, %176 : vector<32x1xf32>
    %178 = vector.broadcast %177 : vector<32x1xf32> to vector<32x128xf32>
    %179 = arith.subf %169, %178 : vector<32x128xf32>
    %180 = arith.mulf %179, %179 : vector<32x128xf32>
    %cst_75 = arith.constant dense<0.000000e+00> : vector<32xf32>
    %181 = vector.multi_reduction <add>, %180, %cst_75 [1] : vector<32x128xf32> to vector<32xf32>
    %182 = vector.shape_cast %181 : vector<32xf32> to vector<32x1xf32>
    %cst_76 = arith.constant 1.280000e+02 : f32
    %183 = vector.broadcast %cst_76 : f32 to vector<32x1xf32>
    %184 = arith.divf %182, %183 : vector<32x1xf32>
    %cst_77 = arith.constant 9.99999974E-6 : f32
    %185 = vector.broadcast %cst_77 : f32 to vector<32x1xf32>
    %186 = arith.addf %184, %185 : vector<32x1xf32>
    %187 = math.rsqrt %186 : vector<32x1xf32>
    %188 = vector.broadcast %187 : vector<32x1xf32> to vector<32x128xf32>
    %189 = arith.mulf %179, %188 : vector<32x128xf32>
    %190 = vector.broadcast %171 : vector<1x128xf32> to vector<32x128xf32>
    %191 = arith.mulf %189, %190 : vector<32x128xf32>
    %192 = vector.broadcast %173 : vector<1x128xf32> to vector<32x128xf32>
    %193 = arith.addf %191, %192 : vector<32x128xf32>
    %194 = arith.truncf %193 : vector<32x128xf32> to vector<32x128xbf16>
    %c1_78 = arith.constant 1 : index
    %c0_79 = arith.constant 0 : index
    %c0_80 = arith.constant 0 : index
    %195 = vector.load %arg7[%c1_78, %c0_79, %c0_80] : memref<2x128x384xbf16, #tpu.memory_space<vmem>>, vector<1x128x384xbf16>
    %196 = vector.shape_cast %195 : vector<1x128x384xbf16> to vector<128x384xbf16>
    %cst_81 = arith.constant dense<0.000000e+00> : vector<32x384xf32>
    %197 = tpu.matmul %194, %196, %cst_81 {dimension_numbers = #tpu.dot_dimension_numbers<[1], [0], [0], [1], [0, 0, 1, 1], [], []>} : vector<32x128xbf16>, vector<128x384xbf16>, vector<32x384xf32> -> vector<32x384xf32>
    %c1_82 = arith.constant 1 : index
    %c0_83 = arith.constant 0 : index
    %c0_84 = arith.constant 0 : index
    %198 = vector.load %arg8[%c1_82, %c0_83, %c0_84] : memref<2x1x384xf32, #tpu.memory_space<vmem>>, vector<1x1x384xf32>
    %199 = vector.shape_cast %198 : vector<1x1x384xf32> to vector<1x384xf32>
    %200 = vector.broadcast %199 : vector<1x384xf32> to vector<32x384xf32>
    %201 = arith.addf %197, %200 : vector<32x384xf32>
    %202 = vector.extract_strided_slice %201 {offsets = [0, 0], sizes = [32, 128], strides = [1, 1]} : vector<32x384xf32> to vector<32x128xf32>
    %203 = vector.extract_strided_slice %202 {offsets = [0, 0], sizes = [32, 32], strides = [1, 1]} : vector<32x128xf32> to vector<32x32xf32>
    %204 = vector.shape_cast %203 : vector<32x32xf32> to vector<2x16x32xf32>
    %205 = vector.extract_strided_slice %202 {offsets = [0, 32], sizes = [32, 32], strides = [1, 1]} : vector<32x128xf32> to vector<32x32xf32>
    %206 = vector.shape_cast %205 : vector<32x32xf32> to vector<2x16x32xf32>
    %207 = vector.extract_strided_slice %202 {offsets = [0, 64], sizes = [32, 32], strides = [1, 1]} : vector<32x128xf32> to vector<32x32xf32>
    %208 = vector.shape_cast %207 : vector<32x32xf32> to vector<2x16x32xf32>
    %209 = vector.extract_strided_slice %202 {offsets = [0, 96], sizes = [32, 32], strides = [1, 1]} : vector<32x128xf32> to vector<32x32xf32>
    %210 = vector.shape_cast %209 : vector<32x32xf32> to vector<2x16x32xf32>
    %211 = vector.shape_cast %204 : vector<2x16x32xf32> to vector<1x2x16x32xf32>
    %212 = vector.shape_cast %206 : vector<2x16x32xf32> to vector<1x2x16x32xf32>
    %213 = vector.shape_cast %208 : vector<2x16x32xf32> to vector<1x2x16x32xf32>
    %214 = vector.shape_cast %210 : vector<2x16x32xf32> to vector<1x2x16x32xf32>
    %215 = tpu.concatenate %211, %212, %213, %214 in 0 : vector<1x2x16x32xf32>, vector<1x2x16x32xf32>, vector<1x2x16x32xf32>, vector<1x2x16x32xf32> -> vector<4x2x16x32xf32>
    %216 = vector.shape_cast %215 : vector<4x2x16x32xf32> to vector<8x16x32xf32>
    %217 = arith.truncf %216 : vector<8x16x32xf32> to vector<8x16x32xbf16>
    %218 = vector.extract_strided_slice %201 {offsets = [0, 128], sizes = [32, 128], strides = [1, 1]} : vector<32x384xf32> to vector<32x128xf32>
    %219 = vector.extract_strided_slice %218 {offsets = [0, 0], sizes = [32, 32], strides = [1, 1]} : vector<32x128xf32> to vector<32x32xf32>
    %220 = vector.shape_cast %219 : vector<32x32xf32> to vector<2x16x32xf32>
    %221 = vector.extract_strided_slice %218 {offsets = [0, 32], sizes = [32, 32], strides = [1, 1]} : vector<32x128xf32> to vector<32x32xf32>
    %222 = vector.shape_cast %221 : vector<32x32xf32> to vector<2x16x32xf32>
    %223 = vector.extract_strided_slice %218 {offsets = [0, 64], sizes = [32, 32], strides = [1, 1]} : vector<32x128xf32> to vector<32x32xf32>
    %224 = vector.shape_cast %223 : vector<32x32xf32> to vector<2x16x32xf32>
    %225 = vector.extract_strided_slice %218 {offsets = [0, 96], sizes = [32, 32], strides = [1, 1]} : vector<32x128xf32> to vector<32x32xf32>
    %226 = vector.shape_cast %225 : vector<32x32xf32> to vector<2x16x32xf32>
    %227 = vector.shape_cast %220 : vector<2x16x32xf32> to vector<1x2x16x32xf32>
    %228 = vector.shape_cast %222 : vector<2x16x32xf32> to vector<1x2x16x32xf32>
    %229 = vector.shape_cast %224 : vector<2x16x32xf32> to vector<1x2x16x32xf32>
    %230 = vector.shape_cast %226 : vector<2x16x32xf32> to vector<1x2x16x32xf32>
    %231 = tpu.concatenate %227, %228, %229, %230 in 0 : vector<1x2x16x32xf32>, vector<1x2x16x32xf32>, vector<1x2x16x32xf32>, vector<1x2x16x32xf32> -> vector<4x2x16x32xf32>
    %232 = vector.shape_cast %231 : vector<4x2x16x32xf32> to vector<8x16x32xf32>
    %233 = arith.truncf %232 : vector<8x16x32xf32> to vector<8x16x32xbf16>
    %234 = vector.extract_strided_slice %201 {offsets = [0, 256], sizes = [32, 128], strides = [1, 1]} : vector<32x384xf32> to vector<32x128xf32>
    %235 = vector.extract_strided_slice %234 {offsets = [0, 0], sizes = [32, 32], strides = [1, 1]} : vector<32x128xf32> to vector<32x32xf32>
    %236 = vector.shape_cast %235 : vector<32x32xf32> to vector<2x16x32xf32>
    %237 = vector.extract_strided_slice %234 {offsets = [0, 32], sizes = [32, 32], strides = [1, 1]} : vector<32x128xf32> to vector<32x32xf32>
    %238 = vector.shape_cast %237 : vector<32x32xf32> to vector<2x16x32xf32>
    %239 = vector.extract_strided_slice %234 {offsets = [0, 64], sizes = [32, 32], strides = [1, 1]} : vector<32x128xf32> to vector<32x32xf32>
    %240 = vector.shape_cast %239 : vector<32x32xf32> to vector<2x16x32xf32>
    %241 = vector.extract_strided_slice %234 {offsets = [0, 96], sizes = [32, 32], strides = [1, 1]} : vector<32x128xf32> to vector<32x32xf32>
    %242 = vector.shape_cast %241 : vector<32x32xf32> to vector<2x16x32xf32>
    %243 = vector.shape_cast %236 : vector<2x16x32xf32> to vector<1x2x16x32xf32>
    %244 = vector.shape_cast %238 : vector<2x16x32xf32> to vector<1x2x16x32xf32>
    %245 = vector.shape_cast %240 : vector<2x16x32xf32> to vector<1x2x16x32xf32>
    %246 = vector.shape_cast %242 : vector<2x16x32xf32> to vector<1x2x16x32xf32>
    %247 = tpu.concatenate %243, %244, %245, %246 in 0 : vector<1x2x16x32xf32>, vector<1x2x16x32xf32>, vector<1x2x16x32xf32>, vector<1x2x16x32xf32> -> vector<4x2x16x32xf32>
    %248 = vector.shape_cast %247 : vector<4x2x16x32xf32> to vector<8x16x32xf32>
    %249 = arith.truncf %248 : vector<8x16x32xf32> to vector<8x16x32xbf16>
    %cst_85 = arith.constant dense<0.000000e+00> : vector<8x16x16xf32>
    %250 = tpu.matmul %217, %233, %cst_85 {dimension_numbers = #tpu.dot_dimension_numbers<[2], [2], [1], [1], [0, 0, 0, 1, 1, 1], [0], [0]>} : vector<8x16x32xbf16>, vector<8x16x32xbf16>, vector<8x16x16xf32> -> vector<8x16x16xf32>
    %cst_86 = arith.constant dense<0xFF800000> : vector<8x16xf32>
    %251 = vector.multi_reduction <maximumf>, %250, %cst_86 [2] : vector<8x16x16xf32> to vector<8x16xf32>
    %252 = vector.shape_cast %251 : vector<8x16xf32> to vector<8x16x1xf32>
    %253 = vector.broadcast %252 : vector<8x16x1xf32> to vector<8x16x16xf32>
    %254 = arith.subf %250, %253 : vector<8x16x16xf32>
    %255 = math.exp %254 : vector<8x16x16xf32>
    %cst_87 = arith.constant dense<0.000000e+00> : vector<8x16xf32>
    %256 = vector.multi_reduction <add>, %255, %cst_87 [2] : vector<8x16x16xf32> to vector<8x16xf32>
    %257 = vector.shape_cast %256 : vector<8x16xf32> to vector<8x16x1xf32>
    %258 = tpu.reciprocal %257 {approx = true} : vector<8x16x1xf32> -> vector<8x16x1xf32>
    %259 = vector.broadcast %258 : vector<8x16x1xf32> to vector<8x16x16xf32>
    %260 = arith.mulf %255, %259 : vector<8x16x16xf32>
    %261 = arith.truncf %260 : vector<8x16x16xf32> to vector<8x16x16xbf16>
    %cst_88 = arith.constant dense<0.000000e+00> : vector<8x16x32xf32>
    %262 = tpu.matmul %261, %249, %cst_88 {dimension_numbers = #tpu.dot_dimension_numbers<[2], [1], [1], [2], [0, 0, 0, 1, 1, 2], [0], [0]>} : vector<8x16x16xbf16>, vector<8x16x32xbf16>, vector<8x16x32xf32> -> vector<8x16x32xf32>
    %263 = vector.shape_cast %262 : vector<8x16x32xf32> to vector<4x2x16x32xf32>
    %264 = vector.shape_cast %263 : vector<4x2x16x32xf32> to vector<4x32x32xf32>
    %265 = arith.truncf %264 : vector<4x32x32xf32> to vector<4x32x32xbf16>
    %c1_89 = arith.constant 1 : index
    %c0_90 = arith.constant 0 : index
    %c0_91 = arith.constant 0 : index
    %c0_92 = arith.constant 0 : index
    %266 = vector.load %arg9[%c1_89, %c0_90, %c0_91, %c0_92] : memref<2x4x32x128xbf16, #tpu.memory_space<vmem>>, vector<1x4x32x128xbf16>
    %267 = vector.shape_cast %266 : vector<1x4x32x128xbf16> to vector<4x32x128xbf16>
    %cst_93 = arith.constant dense<0.000000e+00> : vector<4x32x128xf32>
    %268 = tpu.matmul %265, %267, %cst_93 {dimension_numbers = #tpu.dot_dimension_numbers<[2], [1], [1], [2], [0, 0, 0, 1, 1, 2], [0], [0]>} : vector<4x32x32xbf16>, vector<4x32x128xbf16>, vector<4x32x128xf32> -> vector<4x32x128xf32>
    %cst_94 = arith.constant dense<0.000000e+00> : vector<32x128xf32>
    %269 = vector.multi_reduction <add>, %268, %cst_94 [0] : vector<4x32x128xf32> to vector<32x128xf32>
    %270 = arith.addf %169, %269 : vector<32x128xf32>
    %c1_95 = arith.constant 1 : index
    %c0_96 = arith.constant 0 : index
    %c0_97 = arith.constant 0 : index
    %271 = vector.load %arg10[%c1_95, %c0_96, %c0_97] : memref<2x1x128xf32, #tpu.memory_space<vmem>>, vector<1x1x128xf32>
    %272 = vector.shape_cast %271 : vector<1x1x128xf32> to vector<1x128xf32>
    %273 = vector.broadcast %272 : vector<1x128xf32> to vector<32x128xf32>
    %274 = arith.addf %270, %273 : vector<32x128xf32>
    %c1_98 = arith.constant 1 : index
    %c0_99 = arith.constant 0 : index
    %c0_100 = arith.constant 0 : index
    %275 = vector.load %arg11[%c1_98, %c0_99, %c0_100] : memref<2x1x128xf32, #tpu.memory_space<vmem>>, vector<1x1x128xf32>
    %276 = vector.shape_cast %275 : vector<1x1x128xf32> to vector<1x128xf32>
    %c1_101 = arith.constant 1 : index
    %c0_102 = arith.constant 0 : index
    %c0_103 = arith.constant 0 : index
    %277 = vector.load %arg12[%c1_101, %c0_102, %c0_103] : memref<2x1x128xf32, #tpu.memory_space<vmem>>, vector<1x1x128xf32>
    %278 = vector.shape_cast %277 : vector<1x1x128xf32> to vector<1x128xf32>
    %cst_104 = arith.constant dense<0.000000e+00> : vector<32xf32>
    %279 = vector.multi_reduction <add>, %274, %cst_104 [1] : vector<32x128xf32> to vector<32xf32>
    %280 = vector.shape_cast %279 : vector<32xf32> to vector<32x1xf32>
    %cst_105 = arith.constant 1.280000e+02 : f32
    %281 = vector.broadcast %cst_105 : f32 to vector<32x1xf32>
    %282 = arith.divf %280, %281 : vector<32x1xf32>
    %283 = vector.broadcast %282 : vector<32x1xf32> to vector<32x128xf32>
    %284 = arith.subf %274, %283 : vector<32x128xf32>
    %285 = arith.mulf %284, %284 : vector<32x128xf32>
    %cst_106 = arith.constant dense<0.000000e+00> : vector<32xf32>
    %286 = vector.multi_reduction <add>, %285, %cst_106 [1] : vector<32x128xf32> to vector<32xf32>
    %287 = vector.shape_cast %286 : vector<32xf32> to vector<32x1xf32>
    %cst_107 = arith.constant 1.280000e+02 : f32
    %288 = vector.broadcast %cst_107 : f32 to vector<32x1xf32>
    %289 = arith.divf %287, %288 : vector<32x1xf32>
    %cst_108 = arith.constant 9.99999974E-6 : f32
    %290 = vector.broadcast %cst_108 : f32 to vector<32x1xf32>
    %291 = arith.addf %289, %290 : vector<32x1xf32>
    %292 = math.rsqrt %291 : vector<32x1xf32>
    %293 = vector.broadcast %292 : vector<32x1xf32> to vector<32x128xf32>
    %294 = arith.mulf %284, %293 : vector<32x128xf32>
    %295 = vector.broadcast %276 : vector<1x128xf32> to vector<32x128xf32>
    %296 = arith.mulf %294, %295 : vector<32x128xf32>
    %297 = vector.broadcast %278 : vector<1x128xf32> to vector<32x128xf32>
    %298 = arith.addf %296, %297 : vector<32x128xf32>
    %299 = arith.truncf %298 : vector<32x128xf32> to vector<32x128xbf16>
    %c1_109 = arith.constant 1 : index
    %c0_110 = arith.constant 0 : index
    %c0_111 = arith.constant 0 : index
    %300 = vector.load %arg13[%c1_109, %c0_110, %c0_111] : memref<2x128x512xbf16, #tpu.memory_space<vmem>>, vector<1x128x512xbf16>
    %301 = vector.shape_cast %300 : vector<1x128x512xbf16> to vector<128x512xbf16>
    %cst_112 = arith.constant dense<0.000000e+00> : vector<32x512xf32>
    %302 = tpu.matmul %299, %301, %cst_112 {dimension_numbers = #tpu.dot_dimension_numbers<[1], [0], [0], [1], [0, 0, 1, 1], [], []>} : vector<32x128xbf16>, vector<128x512xbf16>, vector<32x512xf32> -> vector<32x512xf32>
    %c1_113 = arith.constant 1 : index
    %c0_114 = arith.constant 0 : index
    %c0_115 = arith.constant 0 : index
    %303 = vector.load %arg14[%c1_113, %c0_114, %c0_115] : memref<2x1x512xf32, #tpu.memory_space<vmem>>, vector<1x1x512xf32>
    %304 = vector.shape_cast %303 : vector<1x1x512xf32> to vector<1x512xf32>
    %305 = vector.broadcast %304 : vector<1x512xf32> to vector<32x512xf32>
    %306 = arith.addf %302, %305 : vector<32x512xf32>
    %307 = arith.mulf %306, %306 : vector<32x512xf32>
    %308 = arith.mulf %306, %307 : vector<32x512xf32>
    %cst_116 = arith.constant 4.471500e-02 : f32
    %309 = vector.broadcast %cst_116 : f32 to vector<32x512xf32>
    %310 = arith.mulf %309, %308 : vector<32x512xf32>
    %311 = arith.addf %306, %310 : vector<32x512xf32>
    %cst_117 = arith.constant 0.797884583 : f32
    %312 = vector.broadcast %cst_117 : f32 to vector<32x512xf32>
    %313 = arith.mulf %312, %311 : vector<32x512xf32>
    %314 = math.tanh %313 : vector<32x512xf32>
    %cst_118 = arith.constant 1.000000e+00 : f32
    %315 = vector.broadcast %cst_118 : f32 to vector<32x512xf32>
    %316 = arith.addf %315, %314 : vector<32x512xf32>
    %cst_119 = arith.constant 5.000000e-01 : f32
    %317 = vector.broadcast %cst_119 : f32 to vector<32x512xf32>
    %318 = arith.mulf %317, %316 : vector<32x512xf32>
    %319 = arith.mulf %306, %318 : vector<32x512xf32>
    %320 = arith.truncf %319 : vector<32x512xf32> to vector<32x512xbf16>
    %c1_120 = arith.constant 1 : index
    %c0_121 = arith.constant 0 : index
    %c0_122 = arith.constant 0 : index
    %321 = vector.load %arg15[%c1_120, %c0_121, %c0_122] : memref<2x512x128xbf16, #tpu.memory_space<vmem>>, vector<1x512x128xbf16>
    %322 = vector.shape_cast %321 : vector<1x512x128xbf16> to vector<512x128xbf16>
    %cst_123 = arith.constant dense<0.000000e+00> : vector<32x128xf32>
    %323 = tpu.matmul %320, %322, %cst_123 {dimension_numbers = #tpu.dot_dimension_numbers<[1], [0], [0], [1], [0, 0, 1, 1], [], []>} : vector<32x512xbf16>, vector<512x128xbf16>, vector<32x128xf32> -> vector<32x128xf32>
    %c1_124 = arith.constant 1 : index
    %c0_125 = arith.constant 0 : index
    %c0_126 = arith.constant 0 : index
    %324 = vector.load %arg16[%c1_124, %c0_125, %c0_126] : memref<2x1x128xf32, #tpu.memory_space<vmem>>, vector<1x1x128xf32>
    %325 = vector.shape_cast %324 : vector<1x1x128xf32> to vector<1x128xf32>
    %326 = vector.broadcast %325 : vector<1x128xf32> to vector<32x128xf32>
    %327 = arith.addf %323, %326 : vector<32x128xf32>
    %328 = arith.addf %274, %327 : vector<32x128xf32>
    %329 = vector.extract_strided_slice %328 {offsets = [15, 0], sizes = [1, 128], strides = [1, 1]} : vector<32x128xf32> to vector<1x128xf32>
    %330 = vector.extract_strided_slice %328 {offsets = [31, 0], sizes = [1, 128], strides = [1, 1]} : vector<32x128xf32> to vector<1x128xf32>
    %331 = tpu.concatenate %329, %330 in 0 : vector<1x128xf32>, vector<1x128xf32> -> vector<2x128xf32>
    %332 = arith.truncf %331 : vector<2x128xf32> to vector<2x128xbf16>
    %c0_127 = arith.constant 0 : index
    %c0_128 = arith.constant 0 : index
    %333 = vector.load %arg17[%c0_127, %c0_128] : memref<128x128xbf16, #tpu.memory_space<vmem>>, vector<128x128xbf16>
    %cst_129 = arith.constant dense<0.000000e+00> : vector<2x128xf32>
    %334 = tpu.matmul %332, %333, %cst_129 {dimension_numbers = #tpu.dot_dimension_numbers<[1], [0], [0], [1], [0, 0, 1, 1], [], []>} : vector<2x128xbf16>, vector<128x128xbf16>, vector<2x128xf32> -> vector<2x128xf32>
    %c0_130 = arith.constant 0 : index
    %c0_131 = arith.constant 0 : index
    %335 = vector.load %arg18[%c0_130, %c0_131] : memref<1x128xf32, #tpu.memory_space<vmem>>, vector<1x128xf32>
    %336 = vector.broadcast %335 : vector<1x128xf32> to vector<2x128xf32>
    %337 = arith.addf %334, %336 : vector<2x128xf32>
    %338 = tpu.iota {dimensions = array<i32: 1>} : vector<2x128xi32>
    %c1_i32 = arith.constant 1 : i32
    %339 = vector.broadcast %c1_i32 : i32 to vector<2x128xi32>
    %340 = arith.cmpi sge, %338, %339 : vector<2x128xi32>
    %c2_i32 = arith.constant 2 : i32
    %341 = vector.broadcast %c2_i32 : i32 to vector<2x128xi32>
    %342 = arith.cmpi slt, %338, %341 : vector<2x128xi32>
    %343 = arith.andi %340, %342 : vector<2x128xi1>
    %cst_132 = arith.constant -2.000000e+01 : f32
    %cst_133 = arith.constant 2.000000e+00 : f32
    %344 = vector.broadcast %cst_132 : f32 to vector<2x128xf32>
    %345 = arith.maximumf %344, %337 : vector<2x128xf32>
    %346 = vector.broadcast %cst_133 : f32 to vector<2x128xf32>
    %347 = arith.minimumf %346, %345 : vector<2x128xf32>
    %348 = math.exp %347 : vector<2x128xf32>
    %349 = arith.select %343, %348, %337 : vector<2x128xi1>, vector<2x128xf32>
    %c0_134 = arith.constant 0 : index
    %c0_135 = arith.constant 0 : index
    %350 = vector.load %arg19[%c0_134, %c0_135] : memref<2x128xf32, #tpu.memory_space<vmem>>, vector<2x128xf32>
    tpu.vector_store %arg19[%c0_134, %c0_135], %349 {strides = array<i32>} : memref<2x128xf32, #tpu.memory_space<vmem>>, vector<2x128xf32>,
    return
  }
  func.func @transform_0(%arg0: i32) -> (i32, i32, i32) {
    %c0_i32 = arith.constant 0 : i32
    %c0_i32_0 = arith.constant 0 : i32
    %c0_i32_1 = arith.constant 0 : i32
    %c0_i32_2 = arith.constant 0 : i32
    return %c0_i32, %c0_i32_0, %c0_i32_1 : i32, i32, i32
  }
  func.func @transform_1(%arg0: i32) -> (i32, i32) {
    %c0_i32 = arith.constant 0 : i32
    %c0_i32_0 = arith.constant 0 : i32
    %c0_i32_1 = arith.constant 0 : i32
    return %c0_i32, %c0_i32_0 : i32, i32
  }
  func.func @transform_2(%arg0: i32) -> (i32, i32) {
    %c0_i32 = arith.constant 0 : i32
    %c0_i32_0 = arith.constant 0 : i32
    %c0_i32_1 = arith.constant 0 : i32
    return %c0_i32, %c0_i32_0 : i32, i32
  }
  func.func @transform_3(%arg0: i32) -> (i32, i32) {
    %c0_i32 = arith.constant 0 : i32
    %c0_i32_0 = arith.constant 0 : i32
    %c0_i32_1 = arith.constant 0 : i32
    return %c0_i32, %c0_i32_0 : i32, i32
  }
  func.func @transform_4(%arg0: i32) -> (i32, i32, i32) {
    %c0_i32 = arith.constant 0 : i32
    %c0_i32_0 = arith.constant 0 : i32
    %c0_i32_1 = arith.constant 0 : i32
    %c0_i32_2 = arith.constant 0 : i32
    return %c0_i32, %c0_i32_0, %c0_i32_1 : i32, i32, i32
  }
  func.func @transform_5(%arg0: i32) -> (i32, i32, i32) {
    %c0_i32 = arith.constant 0 : i32
    %c0_i32_0 = arith.constant 0 : i32
    %c0_i32_1 = arith.constant 0 : i32
    %c0_i32_2 = arith.constant 0 : i32
    return %c0_i32, %c0_i32_0, %c0_i32_1 : i32, i32, i32
  }
  func.func @transform_6(%arg0: i32) -> (i32, i32, i32) {
    %c0_i32 = arith.constant 0 : i32
    %c0_i32_0 = arith.constant 0 : i32
    %c0_i32_1 = arith.constant 0 : i32
    %c0_i32_2 = arith.constant 0 : i32
    return %c0_i32, %c0_i32_0, %c0_i32_1 : i32, i32, i32
  }
  func.func @transform_7(%arg0: i32) -> (i32, i32, i32) {
    %c0_i32 = arith.constant 0 : i32
    %c0_i32_0 = arith.constant 0 : i32
    %c0_i32_1 = arith.constant 0 : i32
    %c0_i32_2 = arith.constant 0 : i32
    return %c0_i32, %c0_i32_0, %c0_i32_1 : i32, i32, i32
  }
  func.func @transform_8(%arg0: i32) -> (i32, i32, i32, i32) {
    %c0_i32 = arith.constant 0 : i32
    %c0_i32_0 = arith.constant 0 : i32
    %c0_i32_1 = arith.constant 0 : i32
    %c0_i32_2 = arith.constant 0 : i32
    %c0_i32_3 = arith.constant 0 : i32
    return %c0_i32, %c0_i32_0, %c0_i32_1, %c0_i32_2 : i32, i32, i32, i32
  }
  func.func @transform_9(%arg0: i32) -> (i32, i32, i32) {
    %c0_i32 = arith.constant 0 : i32
    %c0_i32_0 = arith.constant 0 : i32
    %c0_i32_1 = arith.constant 0 : i32
    %c0_i32_2 = arith.constant 0 : i32
    return %c0_i32, %c0_i32_0, %c0_i32_1 : i32, i32, i32
  }
  func.func @transform_10(%arg0: i32) -> (i32, i32, i32) {
    %c0_i32 = arith.constant 0 : i32
    %c0_i32_0 = arith.constant 0 : i32
    %c0_i32_1 = arith.constant 0 : i32
    %c0_i32_2 = arith.constant 0 : i32
    return %c0_i32, %c0_i32_0, %c0_i32_1 : i32, i32, i32
  }
  func.func @transform_11(%arg0: i32) -> (i32, i32, i32) {
    %c0_i32 = arith.constant 0 : i32
    %c0_i32_0 = arith.constant 0 : i32
    %c0_i32_1 = arith.constant 0 : i32
    %c0_i32_2 = arith.constant 0 : i32
    return %c0_i32, %c0_i32_0, %c0_i32_1 : i32, i32, i32
  }
  func.func @transform_12(%arg0: i32) -> (i32, i32, i32) {
    %c0_i32 = arith.constant 0 : i32
    %c0_i32_0 = arith.constant 0 : i32
    %c0_i32_1 = arith.constant 0 : i32
    %c0_i32_2 = arith.constant 0 : i32
    return %c0_i32, %c0_i32_0, %c0_i32_1 : i32, i32, i32
  }
  func.func @transform_13(%arg0: i32) -> (i32, i32, i32) {
    %c0_i32 = arith.constant 0 : i32
    %c0_i32_0 = arith.constant 0 : i32
    %c0_i32_1 = arith.constant 0 : i32
    %c0_i32_2 = arith.constant 0 : i32
    return %c0_i32, %c0_i32_0, %c0_i32_1 : i32, i32, i32
  }
  func.func @transform_14(%arg0: i32) -> (i32, i32, i32) {
    %c0_i32 = arith.constant 0 : i32
    %c0_i32_0 = arith.constant 0 : i32
    %c0_i32_1 = arith.constant 0 : i32
    %c0_i32_2 = arith.constant 0 : i32
    return %c0_i32, %c0_i32_0, %c0_i32_1 : i32, i32, i32
  }
  func.func @transform_15(%arg0: i32) -> (i32, i32, i32) {
    %c0_i32 = arith.constant 0 : i32
    %c0_i32_0 = arith.constant 0 : i32
    %c0_i32_1 = arith.constant 0 : i32
    %c0_i32_2 = arith.constant 0 : i32
    return %c0_i32, %c0_i32_0, %c0_i32_1 : i32, i32, i32
  }
  func.func @transform_16(%arg0: i32) -> (i32, i32) {
    %c0_i32 = arith.constant 0 : i32
    %c0_i32_0 = arith.constant 0 : i32
    %c0_i32_1 = arith.constant 0 : i32
    return %c0_i32, %c0_i32_0 : i32, i32
  }
  func.func @transform_17(%arg0: i32) -> (i32, i32) {
    %c0_i32 = arith.constant 0 : i32
    %c0_i32_0 = arith.constant 0 : i32
    %c0_i32_1 = arith.constant 0 : i32
    return %c0_i32, %c0_i32_0 : i32, i32
  }
  func.func @transform_18(%arg0: i32) -> (i32, i32) {
    %c0_i32 = arith.constant 0 : i32
    %c0_i32_0 = arith.constant 0 : i32
    %c0_i32_1 = arith.constant 0 : i32
    return %c0_i32, %c0_i32_0 : i32, i32
  }
}

</mosaic_0001>

<bundles_post_ra>
// kernel: tpu_custom_call.1
= control target key start
LH: loop header
LB: loop body
LE: loop exit
PB: predicated region body
PF: predicated region fallthrough
CT: control target
= control target key end

     0   :  { %s8879_s0 = inlined_call_operand.hbm [shape: f32[2,16,32], index: 0, kind: input, shape index: {}]   ;;  %s8880_s1 = inlined_call_operand.hbm [shape: bf16[32,128], index: 1, kind: input, shape index: {}]   ;;  %s8881_s2 = inlined_call_operand.hbm [shape: f32[1,128], index: 2, kind: input, shape index: {}]   ;;  %s8882_s3 = inlined_call_operand.hbm [shape: f32[32,128], index: 3, kind: input, shape index: {}]   ;;  %s8883_s4 = inlined_call_operand.hbm [shape: f32[2,1,128], index: 4, kind: input, shape index: {}]   ;;  %s8884_s5 = inlined_call_operand.vmem [shape: f32[2,1,128], index: 5, kind: input, shape index: {}]   ;;  %s8885_s6 = inlined_call_operand.hbm [shape: bf16[2,128,384], index: 6, kind: input, shape index: {}]   ;;  %s8886_s7 = inlined_call_operand.vmem [shape: f32[2,1,384], index: 7, kind: input, shape index: {}]   ;;  %s8887_s8 = inlined_call_operand.hbm [shape: bf16[2,4,32,128], index: 8, kind: input, shape index: {}]   ;;  %s8888_s9 = inlined_call_operand.vmem [shape: f32[2,1,128], index: 9, kind: input, shape index: {}]   ;;  %s8889_s10 = inlined_call_operand.vmem [shape: f32[2,1,128], index: 10, kind: input, shape index: {}]   ;;  %s8890_s11 = inlined_call_operand.vmem [shape: f32[2,1,128], index: 11, kind: input, shape index: {}]   ;;  %s8891_s12 = inlined_call_operand.hbm [shape: bf16[2,128,512], index: 12, kind: input, shape index: {}]   ;;  %s8892_s13 = inlined_call_operand.vmem [shape: f32[2,1,512], index: 13, kind: input, shape index: {}]   ;;  %s8893_s14 = inlined_call_operand.hbm [shape: bf16[2,512,128], index: 14, kind: input, shape index: {}]   ;;  %s8894_s15 = inlined_call_operand.vmem [shape: f32[2,1,128], index: 15, kind: input, shape index: {}]   ;;  %s8895_s16 = inlined_call_operand.hbm [shape: bf16[128,128], index: 16, kind: input, shape index: {}]   ;;  %s8896_s17 = inlined_call_operand.vmem [shape: f32[1,128], index: 17, kind: input, shape index: {}]   ;;  %s8897_s18 = inlined_call_operand.hbm [shape: f32[2,128], index: 18, kind: output, shape index: {}]  }
   0x1   :  { %8906 = sst [smem:[#allocation27_spill]] %s8879_s0 }
   0x2   :  { %8907 = sst [smem:[#allocation28_spill]] %s8880_s1 }
   0x3   :  { %8908 = sst [smem:[#allocation29_spill]] %s8881_s2 }
   0x4   :  { %8909 = sst [smem:[#allocation30_spill]] %s8896_s17 }
   0x5   :  { %8910 = sst [smem:[#allocation31_spill]] %s8897_s18 }
   0x6   :  { %23 = vsyncpa [#allocation3], 0 }
   0x7   :  { %24 = vsyncpa [#allocation6], 0 }
   0x8   :  { %25 = vsyncpa [#allocation9], 0 }
   0x9   :  { %26 = vsyncpa [#allocation12], 0 }
   0xa   :  { %27 = vsyncpa [#allocation15], 0 }
   0xb   :  { %28 = vsyncpa [#allocation18], 0 }
   0xc   :  { %29 = vsyncpa [#allocation4], 0  ;;  %s7498_s27 = smov [#allocation5]   ;;  %s8911_s0 = sld [smem:[#allocation28_spill]] }
   0xd   :  { %s47_s28 = sshll.u32 %s7498_s27, 4  ;;  %s48_s28 = int_to_ptr.vmem [resolvable:$true] %s47_s28 }
  0x12   :  { %s7242_s19 = scalar_lea.hbm %s8911_s0, 256 }
  0x13   :  { %p7243_p0 = scmp.ne.s32.totalorder %s8911_s0, %s7242_s19  ;;  %p7246_p1 = scmp.lt.u32.totalorder %s7242_s19, %s8911_s0 }
  0x15   :  { %p7248_p2 = pnand %p7246_p1, %p7243_p0 }
  0x17   :  { %7251 = shalt.err (!%p7248_p2)
}
  0x18   :  { %s7252_s2 = scalar_lea.vmem %s48_s28, 256  ;;  %p7257_p4 = scmp.lt.s32.totalorder %s48_s28, %s48_s28 }
  0x19   :  { %p7253_p3 = scmp.ne.s32.totalorder %s48_s28, %s7252_s2  ;;  %p7258_p5 = scmp.lt.s32.totalorder %s7252_s2, %s7252_s2 }
  0x1b   :  { %p7259_p6 = por %p7258_p5, %p7257_p4 }
  0x1d   :  { %p7260_p7 = pnand %p7259_p6, %p7253_p3 }
  0x1f   :  { %7263 = shalt.err (!%p7260_p7)
}
  0x20   :  { %s8902_s23 = smov 64   ;;  %s8904_s24 = smov 4  }
  0x21   :  { %53 = dma.hbm_to_vmem [thread:$0]  %s8911_s0, 256, %s48_s28, [#allocation6], %s8902_s23, %s8902_s23, %s8904_s24  }
  0x22   :  { %s7501_s27 = smov [#allocation8]   ;;  %s7502_s30 = smov [#allocation11]  }
  0x23   :  { %s69_s29 = sshll.u32 %s7501_s27, 4  ;;  %s95_s19 = sshll.u32 %s7502_s30, 4  ;;  %s70_s29 = int_to_ptr.vmem [resolvable:$true] %s69_s29  ;;  %s96_s19 = int_to_ptr.vmem [resolvable:$true] %s95_s19 }
  0x24   :  { %s7264_s21 = scalar_lea.hbm %s8882_s3, 512 }
  0x25   :  { %p7265_p8 = scmp.ne.s32.totalorder %s8882_s3, %s7264_s21  ;;  %p7268_p9 = scmp.lt.u32.totalorder %s7264_s21, %s8882_s3 }
  0x27   :  { %p7270_p10 = pnand %p7268_p9, %p7265_p8 }
  0x29   :  { %7273 = shalt.err (!%p7270_p10)
}
  0x2a   :  { %s7274_s28 = scalar_lea.vmem %s70_s29, 512  ;;  %p7279_p12 = scmp.lt.s32.totalorder %s70_s29, %s70_s29 }
  0x2b   :  { %p7275_p11 = scmp.ne.s32.totalorder %s70_s29, %s7274_s28  ;;  %p7280_p13 = scmp.lt.s32.totalorder %s7274_s28, %s7274_s28 }
  0x2d   :  { %p7281_p0 = por %p7280_p13, %p7279_p12 }
  0x2f   :  { %p7282_p1 = pnand %p7281_p0, %p7275_p11 }
  0x31   :  { %7285 = shalt.err (!%p7282_p1)
}
  0x32   :  { %s7503_s0 = smov 128   ;;  %s7504_s25 = smov 8  }
  0x33   :  { %75 = dma.hbm_to_vmem [thread:$0]  %s8882_s3, 512, %s70_s29, [#allocation9], %s7503_s0, %s7503_s0, %s7504_s25  }
  0x34   :  { %s7286_s30 = scalar_lea.hbm %s8885_s6, 6144 }
  0x35   :  { %p7287_p2 = scmp.ne.s32.totalorder %s8885_s6, %s7286_s30  ;;  %p7290_p3 = scmp.lt.u32.totalorder %s7286_s30, %s8885_s6 }
  0x37   :  { %p7292_p4 = pnand %p7290_p3, %p7287_p2 }
  0x39   :  { %7295 = shalt.err (!%p7292_p4)
}
  0x3a   :  { %s7296_s2 = scalar_lea.vmem %s96_s19, 6144  ;;  %p7301_p6 = scmp.lt.s32.totalorder %s96_s19, %s96_s19 }
  0x3b   :  { %p7297_p5 = scmp.ne.s32.totalorder %s96_s19, %s7296_s2  ;;  %p7302_p7 = scmp.lt.s32.totalorder %s7296_s2, %s7296_s2 }
  0x3d   :  { %p7303_p8 = por %p7302_p7, %p7301_p6 }
  0x3f   :  { %p7304_p9 = pnand %p7303_p8, %p7297_p5 }
  0x41   :  { %7307 = shalt.err (!%p7304_p9)
}
  0x42   :  { %s7505_s3 = smov 192   ;;  %s7506_s29 = smov 12  }
  0x43   :  { %101 = dma.hbm_to_vmem [thread:$0]  %s8885_s6, 6144, %s96_s19, [#allocation12], %s7505_s3, %s7505_s3, %s7506_s29  }
  0x44   :  { %s7507_s27 = smov [#allocation14]   ;;  %s7508_s18 = smov [#allocation2]  }
  0x45   :  { %s127_s17 = sshll.u32 %s7507_s27, 4  ;;  %s35_s30 = sshll.u32 %s7508_s18, 4  ;;  %s128_s17 = int_to_ptr.vmem [resolvable:$true] %s127_s17  ;;  %s36_s30 = int_to_ptr.vmem [resolvable:$true] %s35_s30 }
  0x46   :  { %s7308_s21 = scalar_lea.hbm %s8891_s12, 8192 }
  0x47   :  { %p7309_p10 = scmp.ne.s32.totalorder %s8891_s12, %s7308_s21  ;;  %p7312_p11 = scmp.lt.u32.totalorder %s7308_s21, %s8891_s12 }
  0x49   :  { %p7314_p12 = pnand %p7312_p11, %p7309_p10 }
  0x4b   :  { %7317 = shalt.err (!%p7314_p12)
}
  0x4c   :  { %s7318_s6 = scalar_lea.vmem %s128_s17, 8192  ;;  %p7323_p0 = scmp.lt.s32.totalorder %s128_s17, %s128_s17 }
  0x4d   :  { %p7319_p13 = scmp.ne.s32.totalorder %s128_s17, %s7318_s6  ;;  %p7324_p1 = scmp.lt.s32.totalorder %s7318_s6, %s7318_s6 }
  0x4f   :  { %p7325_p2 = por %p7324_p1, %p7323_p0 }
  0x51   :  { %p7326_p3 = pnand %p7325_p2, %p7319_p13 }
  0x53   :  { %7329 = shalt.err (!%p7326_p3)
}
  0x54   :  { %s7509_s19 = smov 256   ;;  %s7510_s3 = smov 16  }
  0x55   :  { %133 = dma.hbm_to_vmem [thread:$0]  %s8891_s12, 8192, %s128_s17, [#allocation15], %s7509_s19, %s7509_s19, %s7510_s3  }
  0x56   :  { %s8912_s24 = sld [smem:[#allocation27_spill]] }
  0x5c   :  { %s7330_s27 = scalar_lea.hbm %s8912_s24, 512 }
  0x5d   :  { %p7331_p4 = scmp.ne.s32.totalorder %s8912_s24, %s7330_s27  ;;  %p7334_p5 = scmp.lt.u32.totalorder %s7330_s27, %s8912_s24 }
  0x5f   :  { %p7336_p6 = pnand %p7334_p5, %p7331_p4 }
  0x61   :  { %7339 = shalt.err (!%p7336_p6)
}
  0x62   :  { %s7340_s22 = scalar_lea.vmem %s36_s30, 512  ;;  %p7345_p8 = scmp.lt.s32.totalorder %s36_s30, %s36_s30 }
  0x63   :  { %p7341_p7 = scmp.ne.s32.totalorder %s36_s30, %s7340_s22  ;;  %p7346_p9 = scmp.lt.s32.totalorder %s7340_s22, %s7340_s22 }
  0x65   :  { %p7347_p10 = por %p7346_p9, %p7345_p8 }
  0x67   :  { %p7348_p11 = pnand %p7347_p10, %p7341_p7 }
  0x69   :  { %7351 = shalt.err (!%p7348_p11)
}
  0x6a   :  { %41 = dma.hbm_to_vmem [thread:$0]  %s8912_s24, 512, %s36_s30, [#allocation3], %s7503_s0, %s7503_s0, %s7504_s25  }
  0x6b   :  { %s7511_s2 = smov [#allocation7]   ;;  %s7512_s19 = smov [#allocation10]  }
  0x6c   :  { %s60_s6 = sshll.u32 %s7511_s2, 4  ;;  %s81_s29 = sshll.u32 %s7512_s19, 4  ;;  %s61_s6 = int_to_ptr.vmem [resolvable:$true] %s60_s6  ;;  %s82_s29 = int_to_ptr.vmem [resolvable:$true] %s81_s29 }
  0x6d   :  { %s8913_s23 = sld [smem:[#allocation29_spill]] }
  0x73   :  { %s7352_s27 = scalar_lea.hbm %s8913_s23, 16 }
  0x74   :  { %p7353_p12 = scmp.ne.s32.totalorder %s8913_s23, %s7352_s27  ;;  %p7356_p13 = scmp.lt.u32.totalorder %s7352_s27, %s8913_s23 }
  0x76   :  { %p7358_p0 = pnand %p7356_p13, %p7353_p12 }
  0x78   :  { %7361 = shalt.err (!%p7358_p0)
}
  0x79   :  { %s7362_s0 = scalar_lea.vmem %s61_s6, 16  ;;  %s7366_s25 = scalar_lea.vmem %s61_s6, 32 }
  0x7a   :  { %p7363_p1 = scmp.ne.s32.totalorder %s61_s6, %s7362_s0  ;;  %p7367_p2 = scmp.lt.s32.totalorder %s61_s6, %s61_s6 }
  0x7b   :  { %p7368_p3 = scmp.lt.s32.totalorder %s7366_s25, %s7362_s0 }
  0x7d   :  { %p7369_p4 = por %p7368_p3, %p7367_p2 }
  0x7f   :  { %p7370_p5 = pnand %p7369_p4, %p7363_p1 }
  0x81   :  { %7373 = shalt.err (!%p7370_p5)
}
  0x82   :  { %63 = dma.hbm_to_vmem [thread:$0]  %s8913_s23, 16, %s61_s6, [#allocation6]  }
  0x83   :  { %s7374_s17 = scalar_lea.hbm %s8883_s4, 32 }
  0x84   :  { %p7375_p6 = scmp.ne.s32.totalorder %s8883_s4, %s7374_s17  ;;  %p7378_p7 = scmp.lt.u32.totalorder %s7374_s17, %s8883_s4 }
  0x86   :  { %p7380_p8 = pnand %p7378_p7, %p7375_p6 }
  0x88   :  { %7383 = shalt.err (!%p7380_p8)
}
  0x89   :  { %s7384_s27 = scalar_lea.vmem %s82_s29, 32  ;;  %p7389_p10 = scmp.lt.s32.totalorder %s82_s29, %s82_s29 }
  0x8a   :  { %p7385_p9 = scmp.ne.s32.totalorder %s82_s29, %s7384_s27  ;;  %p7390_p11 = scmp.lt.s32.totalorder %s7384_s27, %s7384_s27 }
  0x8c   :  { %p7391_p12 = por %p7390_p11, %p7389_p10 }
  0x8e   :  { %p7392_p13 = pnand %p7391_p12, %p7385_p9 }
  0x90   :  { %7395 = shalt.err (!%p7392_p13)
}
  0x91   :  { %s7513_s6 = smov 1   ;;  %s7514_s1 = smov [#allocation13]  }
  0x92   :  { %87 = dma.hbm_to_vmem [thread:$0]  %s8883_s4, 32, %s82_s29, [#allocation9], %s7510_s3, %s7510_s3, %s7513_s6  }
  0x93   :  { %s109_s20 = sshll.u32 %s7514_s1, 4  ;;  %s7515_s21 = smov [#allocation16]   ;;  %s110_s20 = int_to_ptr.vmem [resolvable:$true] %s109_s20 }
  0x94   :  { %s141_s0 = sshll.u32 %s7515_s21, 4  ;;  %s7396_s24 = scalar_lea.hbm %s8887_s8, 2048  ;;  %s7714_s0 = int_to_ptr.vmem [resolvable:$true] %s141_s0 }
  0x95   :  { %p7397_p0 = scmp.ne.s32.totalorder %s8887_s8, %s7396_s24  ;;  %p7400_p1 = scmp.lt.u32.totalorder %s7396_s24, %s8887_s8 }
  0x97   :  { %p7402_p2 = pnand %p7400_p1, %p7397_p0 }
  0x99   :  { %7405 = shalt.err (!%p7402_p2)
}
  0x9a   :  { %s7406_s4 = scalar_lea.vmem %s110_s20, 2048  ;;  %p7411_p4 = scmp.lt.s32.totalorder %s110_s20, %s110_s20 }
  0x9b   :  { %p7407_p3 = scmp.ne.s32.totalorder %s110_s20, %s7406_s4  ;;  %p7412_p5 = scmp.lt.s32.totalorder %s7406_s4, %s7406_s4 }
  0x9d   :  { %p7413_p6 = por %p7412_p5, %p7411_p4 }
  0x9f   :  { %p7414_p7 = pnand %p7413_p6, %p7407_p3 }
  0xa1   :  { %7417 = shalt.err (!%p7414_p7)
}
  0xa2   :  { %s8914_s3 = smov 4   ;;  %s8915_s29 = smov 64  }
  0xa3   :  { %115 = dma.hbm_to_vmem [thread:$0]  %s8887_s8, 2048, %s110_s20, [#allocation12], %s8915_s29, %s8915_s29, %s8914_s3  }
  0xa4   :  { %s7418_s6 = scalar_lea.hbm %s8893_s14, 8192 }
  0xa5   :  { %p7419_p8 = scmp.ne.s32.totalorder %s8893_s14, %s7418_s6  ;;  %p7422_p9 = scmp.lt.u32.totalorder %s7418_s6, %s8893_s14 }
  0xa7   :  { %p7424_p10 = pnand %p7422_p9, %p7419_p8 }
  0xa9   :  { %7427 = shalt.err (!%p7424_p10)
}
  0xaa   :  { %s7428_s25 = scalar_lea.vmem %s7714_s0, 8192  ;;  %p7433_p12 = scmp.lt.s32.totalorder %s7714_s0, %s7714_s0 }
  0xab   :  { %p7429_p11 = scmp.ne.s32.totalorder %s7714_s0, %s7428_s25  ;;  %p7434_p13 = scmp.lt.s32.totalorder %s7428_s25, %s7428_s25 }
  0xad   :  { %p7435_p0 = por %p7434_p13, %p7433_p12 }
  0xaf   :  { %p7436_p1 = pnand %p7435_p0, %p7429_p11 }
  0xb1   :  { %7439 = shalt.err (!%p7436_p1)
}
  0xb2   :  { %147 = dma.hbm_to_vmem [thread:$0]  %s8893_s14, 8192, %s7714_s0, [#allocation15], %s8915_s29, %s8915_s29, %s8914_s3  }
  0xb3   :  { %s7516_s30 = smov [#allocation17]   ;;  %s7440_s17 = scalar_lea.hbm %s8895_s16, 1024 }
  0xb4   :  { %s155_s24 = sshll.u32 %s7516_s30, 4  ;;  %p7441_p2 = scmp.ne.s32.totalorder %s8895_s16, %s7440_s17  ;;  %s156_s24 = int_to_ptr.vmem [resolvable:$true] %s155_s24 }
  0xb5   :  { %p7444_p3 = scmp.lt.u32.totalorder %s7440_s17, %s8895_s16 }
  0xb7   :  { %p7446_p4 = pnand %p7444_p3, %p7441_p2 }
  0xb9   :  { %7449 = shalt.err (!%p7446_p4)
}
  0xba   :  { %s7450_s26 = scalar_lea.vmem %s156_s24, 1024  ;;  %p7455_p6 = scmp.lt.s32.totalorder %s156_s24, %s156_s24 }
  0xbb   :  { %p7451_p5 = scmp.ne.s32.totalorder %s156_s24, %s7450_s26  ;;  %p7456_p7 = scmp.lt.s32.totalorder %s7450_s26, %s7450_s26 }
  0xbd   :  { %p7457_p8 = por %p7456_p7, %p7455_p6 }
  0xbf   :  { %p7458_p9 = pnand %p7457_p8, %p7451_p5 }
  0xc1   :  { %7461 = shalt.err (!%p7458_p9)
}
  0xc2   :  { %161 = dma.hbm_to_vmem [thread:$0]  %s8895_s16, 1024, %s156_s24, [#allocation18], %s8915_s29, %s8915_s29, %s8914_s3  }
  0xc3   :  { %7484 = dma.done.wait [#allocation3], 512  }
  0xc4   :  { %7485 = vsyncadd [#allocation3], 4294966784 }
  0xc5   :  { %7486 = dma.done.wait [#allocation6], 272  }
  0xc6   :  { %7487 = vsyncadd [#allocation6], 4294967024 }
  0xc7   :  { %7488 = dma.done.wait [#allocation9], 544  }
  0xc8   :  { %7489 = vsyncadd [#allocation9], 4294966752 }
  0xc9   :  { %7490 = dma.done.wait [#allocation12], 8192  }
  0xca   :  { %7491 = vsyncadd [#allocation12], 4294959104 }
  0xcb   :  { %7492 = dma.done.wait [#allocation15], 16384  }
  0xcc   :  { %7493 = vsyncadd [#allocation15], 4294950912 }
  0xcd   :  { %7494 = dma.done.wait [#allocation18], 1024  }
  0xce   :  { %7495 = vsyncadd [#allocation18], 4294966272  ;;  %v6766_v0 = vld [vmem:[#allocation5] sm:$0xff]   ;;  %v6767_v1 = vld [vmem:[#allocation5 + $0x8] sm:$0xff]   ;;  %vm226_vm0 = vcmask 261120   ;;  %v7517_v58 = vmov 0  }
  0xcf   :  { %6213 = vmatprep.subr.bf16.mxu0 %v6766_v0  ;;  %v195_v2 = vld [vmem:[#allocation2] sm:$0xff]  ;;  %v196_v3 = vld [vmem:[#allocation2 + $0x8] sm:$0xff]  ;;  %v197_v5 = vld [vmem:[#allocation2 + $0x10] sm:$0xff]  ;;  %564 = vmatprep.mubr.bf16.mxu1 %v7517_v58  ;;  %vm7519_vm1 = vmmov 0   ;;  %s7520_s23 = smov 96   ;;  %s7521_s18 = smov 32  }
  0xd0   :  { %6214 = vmatpush3.bf16.msra.mxu0 %v6766_v0  ;;  %v199_v4 = vpack.c.bf16 %v196_v3, %v195_v2  ;;  %v198_v6 = vld [vmem:[#allocation2 + $0x18] sm:$0xff]  ;;  %v5699_v8 = vld [vmem:[#allocation7] ss:$0 sm:$0xff]  ;;  %v6770_v24 = vld [vmem:[#allocation11] ss:$12 sps:$4 sm:$0xff]   ;;  %vm1154_vm2 = vcmask 130048  }
  0xd1   :  { %6215 = vmatprep.subr.bf16.mxu0 %v6767_v1  ;;  %v200_v7 = vpack.c.bf16 %v198_v6, %v197_v5  ;;  %v205_v9 = vld [vmem:[#allocation8] sm:$0xff]  ;;  %v206_v19 = vld [vmem:[#allocation8 + $0x8] sm:$0xff]  ;;  %vm5554_vm3 = vcmask 1040384   ;;  %s8916_s3 = sld [smem:[#allocation30_spill]]  ;;  %s7522_s27 = smov [#allocation19]  }
  0xd2   :  { %6217 = vmatprep.mubr.msk.bf16.mxu0 %vm226_vm0, %v199_v4  ;;  %v6768_v23 = vld [vmem:[#allocation11 + $0x4] ss:$12 sps:$4 sm:$0xff]   ;;  %v6771_v25 = vld [vmem:[#allocation11 + $0x1c] ss:$12 sps:$4 sm:$0xff]   ;;  %v6775_v44 = vld [vmem:[#allocation11 + $0x34] ss:$12 sps:$4 sm:$0xff]  }
  0xd3   :  { %v6773_v26 = vld [vmem:[#allocation11 + $0x8] ss:$12 sps:$4 sm:$0xff]   ;;  %532 = vmatprep.subr.bf16.mxu1 %v6768_v23  ;;  %v6774_v43 = vld [vmem:[#allocation11 + $0x18] ss:$12 sps:$4 sm:$0xff]   ;;  %v6777_v45 = vld [vmem:[#allocation11 + $0x20] ss:$12 sps:$4 sm:$0xff]  }
  0xd4   :  { %6216 = vmatpush3.bf16.msra.mxu0 %v6767_v1  ;;  %533 = vmatpush1.bf16.msra.mxu1 %v6770_v24  ;;  %v6778_v46 = vld [vmem:[#allocation11 + $0x30] ss:$12 sps:$4 sm:$0xff]   ;;  %v6779_v47 = vld [vmem:[#allocation11 + $0x4c] ss:$12 sps:$4 sm:$0xff]   ;;  %v6782_v49 = vld [vmem:[#allocation11 + $0x48] ss:$12 sps:$4 sm:$0xff]  }
  0xd5   :  { %6221 = vmatprep.subr.bf16.mxu0 %v6773_v26  ;;  %534 = vmatprep.subr.bf16.mxu1 %v6771_v25  ;;  %v6781_v48 = vld [vmem:[#allocation11 + $0x38] ss:$12 sps:$4 sm:$0xff]   ;;  %v6785_v51 = vld [vmem:[#allocation11 + $0x50] ss:$12 sps:$4 sm:$0xff]   ;;  %v6786_v52 = vld [vmem:[#allocation11 + $0x60] ss:$12 sps:$4 sm:$0xff]  }
  0xd6   :  { %v6783_v50 = vld [vmem:[#allocation11 + $0x64] ss:$12 sps:$4 sm:$0xff]   ;;  %v6787_v53 = vld [vmem:[#allocation11 + $0x7c] ss:$12 sps:$4 sm:$0xff]   ;;  %v6791_v56 = vld [vmem:[#allocation11 + $0x94] ss:$12 sps:$4 sm:$0xff]  }
  0xd7   :  { %6218 = vmatmul.mubr.msk.bf16.vlgmr.msra.gmra.mrb[0].mxu0 %vm226_vm0, %v200_v7  ;;  %v6789_v54 = vld [vmem:[#allocation11 + $0x68] ss:$12 sps:$4 sm:$0xff]   ;;  %v6790_v55 = vld [vmem:[#allocation11 + $0x78] ss:$12 sps:$4 sm:$0xff]   ;;  %v6793_v57 = vld [vmem:[#allocation11 + $0x80] ss:$12 sps:$4 sm:$0xff]  }
  0xd8   :  { %6222 = vmatpush3.bf16.msra.mxu0 %v6773_v26  ;;  %535 = vmatpush1.bf16.msra.mxu1 %v6774_v43  ;;  %v6794_v59 = vld [vmem:[#allocation11 + $0x90] ss:$12 sps:$4 sm:$0xff]   ;;  %v6795_v60 = vld [vmem:[#allocation11 + $0xac] ss:$12 sps:$4 sm:$0xff]   ;;  %v6798_v62 = vld [vmem:[#allocation11 + $0xa8] ss:$12 sps:$4 sm:$0xff]  }
  0xd9   :  { %536 = vmatprep.subr.bf16.mxu1 %v6775_v44  ;;  %6223 = vmatprep.subr.bf16.mxu0 %v6777_v45  ;;  %v6797_v61 = vld [vmem:[#allocation11 + $0x98] ss:$12 sps:$4 sm:$0xff]   ;;  %v6799_v63 = vld [vmem:[#allocation11 + $0xb0] ss:$12 sps:$4 sm:$0xff]   ;;  %v5705_v23 = vld [vmem:[%s8884_s5] ss:$0 sm:$0xff] }
  0xda   :  { %s5685_s6 = sshll.u32 %s7522_s27, 4  ;;  %s5686_s6 = int_to_ptr.vmem [resolvable:$true] %s5685_s6 }
  0xdb   :  { %p7467_p11 = scmp.lt.s32.totalorder %s5686_s6, %s5686_s6 }
  0xdc   :  { %6224 = vmatpush3.bf16.msra.mxu0 %v6777_v45  ;;  %537 = vmatpush1.bf16.msra.mxu1 %v6778_v46 }
  0xdd   :  { %538 = vmatprep.subr.bf16.mxu1 %v6779_v47  ;;  %6225 = vmatprep.subr.bf16.mxu0 %v6781_v48 }
  0xe0   :  { %539 = vmatpush1.bf16.msra.mxu1 %v6782_v49  ;;  %6226 = vmatpush3.bf16.msra.mxu0 %v6781_v48 }
  0xe1   :  { %540 = vmatprep.subr.bf16.mxu1 %v6783_v50  ;;  %6227 = vmatprep.subr.bf16.mxu0 %v6785_v51 }
  0xe4   :  { %541 = vmatpush1.bf16.msra.mxu1 %v6786_v52  ;;  %6228 = vmatpush3.bf16.msra.mxu0 %v6785_v51 }
  0xe5   :  { %542 = vmatprep.subr.bf16.mxu1 %v6787_v53  ;;  %6229 = vmatprep.subr.bf16.mxu0 %v6789_v54 }
  0xe8   :  { %543 = vmatpush1.bf16.msra.mxu1 %v6790_v55  ;;  %6230 = vmatpush3.bf16.msra.mxu0 %v6789_v54 }
  0xe9   :  { %544 = vmatprep.subr.bf16.mxu1 %v6791_v56  ;;  %6231 = vmatprep.subr.bf16.mxu0 %v6793_v57 }
  0xec   :  { %545 = vmatpush1.bf16.msra.mxu1 %v6794_v59  ;;  %6232 = vmatpush3.bf16.msra.mxu0 %v6793_v57 }
  0xed   :  { %546 = vmatprep.subr.bf16.mxu1 %v6795_v60  ;;  %6233 = vmatprep.subr.bf16.mxu0 %v6797_v61 }
  0xf0   :  { %547 = vmatpush1.bf16.msra.mxu1 %v6798_v62  ;;  %6234 = vmatpush3.bf16.msra.mxu0 %v6797_v61 }
  0xf1   :  { %6235 = vmatprep.subr.bf16.mxu0 %v6799_v63 }
  0xf4   :  { %6236 = vmatpush3.bf16.msra.mxu0 %v6799_v63 }
 0x1aa   :  { %v6219_v10 = vpop.f32.mrb[0].mxu0 }
 0x1ab   :  { %v276_v11 = vadd.f32 %v6219_v10, %v5699_v8  ;;  %v267_v12 = vpop.f32.mrb[1].mxu0 }
 0x1ac   :  { %v268_v13 = vadd.f32 %v5699_v8, %v267_v12  ;;  %v6220_v14 = vpop.f32.mrb[2].mxu0 }
 0x1ad   :  { %v7768_v15 = vadd.f32 %v276_v11, %v205_v9  ;;  %v279_v16 = vadd.f32 %v6220_v14, %v5699_v8  ;;  %v270_v17 = vpop.f32.mrb[3].mxu0  ;;  %v5704_v14 = vld [vmem:[#allocation10] ss:$0 sm:$0xff] }
 0x1ae   :  { %v7770_v18 = vadd.f32 %v268_v13, %v205_v9  ;;  %v271_v20 = vadd.f32 %v5699_v8, %v270_v17 }
 0x1af   :  { %292 = vadd.xlane.f32.xlu1 %v7768_v15  ;;  %v7774_v21 = vadd.f32 %v279_v16, %v206_v19 }
 0x1b0   :  { %288 = vadd.xlane.f32.xlu0 %v7770_v18  ;;  %v7776_v22 = vadd.f32 %v271_v20, %v206_v19 }
 0x1b3   :  { %294 = vadd.xlane.f32.xlu1 %v7774_v21 }
 0x1b4   :  { %290 = vadd.xlane.f32.xlu0 %v7776_v22 }
 0x23c   :  { %v293_v27 = vpop.xlane.xlu1 %292 }
 0x23d   :  { %v289_v28 = vpop.xlane.xlu0 %288  ;;  %v299_v29 = vmul.f32 0.0078125, %v293_v27 }
 0x23e   :  { %v297_v30 = vmul.f32 0.0078125, %v289_v28 }
 0x23f   :  { %v7786_v37 = vsub.f32 %v7768_v15, %v299_v29 }
 0x240   :  { %v295_v31 = vpop.xlane.xlu1 %294  ;;  %v7781_v32 = vsub.f32 %v7770_v18, %v297_v30 }
 0x241   :  { %v291_v33 = vpop.xlane.xlu0 %290  ;;  %v300_v34 = vmul.f32 0.0078125, %v295_v31  ;;  %v307_v39 = vmul.f32 %v7786_v37, %v7786_v37 }
 0x242   :  { %v298_v35 = vmul.f32 0.0078125, %v291_v33  ;;  %v305_v36 = vmul.f32 %v7781_v32, %v7781_v32 }
 0x243   :  { %v7796_v41 = vsub.f32 %v7774_v21, %v300_v34 }
 0x244   :  { %309 = vadd.xlane.f32.xlu0 %v305_v36  ;;  %v7789_v38 = vsub.f32 %v7776_v22, %v298_v35  ;;  %v7518_v36 = vmov 0.0  }
 0x245   :  { %v308_v42 = vmul.f32 %v7796_v41, %v7796_v41  ;;  %6241 = vmatprep.subr.bf16.mxu0 %v7518_v36  ;;  %6247 = vmatprep.subr.bf16.mxu1 %v7518_v36 }
 0x246   :  { %v306_v40 = vmul.f32 %v7789_v38, %v7789_v38 }
 0x248   :  { %313 = vadd.xlane.f32.xlu0 %v307_v39  ;;  %311 = vadd.xlane.f32.xlu1 %v306_v40  ;;  %v387_v40 = vld [vmem:[%s8886_s7] sm:$0x7] }
 0x24c   :  { %315 = vadd.xlane.f32.xlu1 %v308_v42 }
 0x2d1   :  { %v310_v0 = vpop.xlane.xlu0 %309 }
 0x2d2   :  { %v317_v1 = vmul.f32 0.0078125, %v310_v0 }
 0x2d4   :  { %v321_v2 = vadd.f32 1e-05, %v317_v1 }
 0x2d5   :  { %v312_v3 = vpop.xlane.xlu1 %311  ;;  %v314_v4 = vpop.xlane.xlu0 %313 }
 0x2d6   :  { %7016 = vrsqrt.f32 %v321_v2  ;;  %v318_v5 = vmul.f32 0.0078125, %v312_v3  ;;  %v319_v6 = vmul.f32 0.0078125, %v314_v4 }
 0x2d8   :  { %v322_v7 = vadd.f32 1e-05, %v318_v5  ;;  %v323_v8 = vadd.f32 1e-05, %v319_v6 }
 0x2d9   :  { %v316_v9 = vpop.xlane.xlu1 %315 }
 0x2da   :  { %7018 = vrsqrt.f32 %v322_v7  ;;  %v320_v10 = vmul.f32 0.0078125, %v316_v9 }
 0x2db   :  { %7020 = vrsqrt.f32 %v323_v8 }
 0x2dc   :  { %v324_v11 = vadd.f32 1e-05, %v320_v10 }
 0x2de   :  { %7022 = vrsqrt.f32 %v324_v11 }
 0x2e0   :  { %v7017_v12 = vpop.eup %7016 }
 0x2e1   :  { %v329_v13 = vmul.f32 %v7017_v12, %v7781_v32 }
 0x2e3   :  { %v339_v20 = vmul.f32 %v5704_v14, %v329_v13 }
 0x2e4   :  { %v7019_v16 = vpop.eup %7018 }
 0x2e5   :  { %v7021_v17 = vpop.eup %7020  ;;  %v330_v19 = vmul.f32 %v7019_v16, %v7789_v38  ;;  %v349_v27 = vadd.f32 %v5705_v23, %v339_v20 }
 0x2e6   :  { %v331_v24 = vmul.f32 %v7021_v17, %v7786_v37  ;;  %v389_v37 = vlaneseq }
 0x2e7   :  { %v340_v25 = vmul.f32 %v5704_v14, %v330_v19 }
 0x2e8   :  { %v7023_v26 = vpop.eup %7022  ;;  %v341_v30 = vmul.f32 %v5704_v14, %v331_v24  ;;  %v7816_v38 = vshrl.u32 %v389_v37, 7 }
 0x2e9   :  { %v350_v28 = vadd.f32 %v5705_v23, %v340_v25  ;;  %v332_v29 = vmul.f32 %v7023_v26, %v7796_v41 }
 0x2ea   :  { %v351_v33 = vadd.f32 %v5705_v23, %v341_v30  ;;  %v7819_v39 = vsub.s32 0, %v7816_v38  ;;  %v7825_v41 = vsub.s32 1, %v7816_v38  ;;  %v7829_v43 = vsub.s32 2, %v7816_v38 }
 0x2eb   :  { %v353_v31 = vpack.c.bf16 %v350_v28, %v349_v27  ;;  %v342_v32 = vmul.f32 %v5704_v14, %v332_v29 }
 0x2ec   :  { %v392_v42 = vrot.slane %v387_v40, %v7819_v39  ;;  %v396_v45 = vrot.slane %v387_v40, %v7825_v41  ;;  %v400_v51 = vrot.slane %v387_v40, %v7829_v43 }
 0x2ed   :  { %565 = vmatmul.mubr.bf16.vlgmr.msra.gmra.mrb[0].mxu1 %v353_v31  ;;  %6237 = vmatprep.mubr.bf16.mxu0 %v353_v31  ;;  %v352_v34 = vadd.f32 %v5705_v23, %v342_v32 }
 0x2ee   :  { %574 = vmatprep.mubr.bf16.mxu1 %v7517_v58 }
 0x2ef   :  { %v354_v35 = vpack.c.bf16 %v352_v34, %v351_v33 }
 0x2f1   :  { %6238 = vmatmul.mubr.bf16.vlgmr.msra.gmra.mrb[4].mxu0 %v354_v35 }
 0x2f2   :  { %6243 = vmatprep.mubr.msk.bf16.mxu0 %vm7519_vm1, %v7518_v36 }
 0x2f5   :  { %575 = vmatmul.mubr.bf16.gmra.mrb[4].mxu1 %v354_v35 }
 0x2f6   :  { %6249 = vmatprep.mubr.msk.bf16.mxu1 %vm7519_vm1, %v7518_v36 }
 0x3c0   :  { %v566_v44 = vpop.f32.mrb[0].mxu1 }
 0x3c1   :  { %v568_v46 = vpop.f32.mrb[1].mxu1  ;;  %v567_v48 = vadd.f32 %v566_v44, %v392_v42 }
 0x3c2   :  { %v570_v47 = vpop.f32.mrb[2].mxu1  ;;  %v569_v52 = vadd.f32 %v568_v46, %v396_v45 }
 0x3c3   :  { %v571_v49 = vadd.f32 %v570_v47, %v392_v42  ;;  %v572_v50 = vpop.f32.mrb[3].mxu1 }
 0x3c4   :  { %v573_v53 = vadd.f32 %v572_v50, %v396_v45  ;;  %v6239_v54 = vpop.f32.mrb[4].mxu0 }
 0x3c5   :  { %v674_v55 = vpack.c.bf16 %v571_v49, %v567_v48  ;;  %v619_v56 = vpop.f32.mrb[5].mxu0  ;;  %v6616_v57 = vpack.i.bf16 %v571_v49, %v567_v48  ;;  %v7833_v62 = vadd.f32 %v6239_v54, %v400_v51 }
 0x3c6   :  { %v6240_v59 = vpop.f32.mrb[6].mxu0  ;;  %v6586_v60 = vpack.i.bf16 %v573_v53, %v569_v52  ;;  %v722_v61 = vpack.c.bf16 %v573_v53, %v569_v52  ;;  %v7837_v1 = vadd.f32 %v619_v56, %v400_v51 }
 0x3c7   :  { %v7835_v63 = vadd.f32 %v6240_v59, %v400_v51  ;;  %v622_v0 = vpop.f32.mrb[7].mxu0 }
 0x3c8   :  { %v7839_v2 = vadd.f32 %v622_v0, %v400_v51  ;;  %6587 = vrot.lane.b32.xlu0 %v6586_v60, %s7520_s23  ;;  %v576_v3 = vpop.f32.mrb[4].mxu1  ;;  %v782_v4 = vsel %vm226_vm0, %v722_v61, 0 }
 0x3c9   :  { %v578_v5 = vpop.f32.mrb[5].mxu1  ;;  %6242 = vmatpush3.bf16.xpose.msra.mxu0 %v782_v4  ;;  %v771_v6 = vpack.c.bf16 %v7835_v63, %v7833_v62  ;;  %v7847_v7 = vpack.i.bf16 %v7835_v63, %v7833_v62  ;;  %v577_v11 = vadd.f32 %v576_v3, %v392_v42 }
 0x3ca   :  { %v580_v8 = vpop.f32.mrb[6].mxu1  ;;  %6253 = vmatprep.subr.bf16.mxu0 %v7518_v36  ;;  %v770_v9 = vpack.c.bf16 %v7839_v2, %v7837_v1  ;;  %v7854_v10 = vpack.i.bf16 %v7839_v2, %v7837_v1  ;;  %v579_v14 = vadd.f32 %v578_v5, %v396_v45 }
 0x3cb   :  { %v581_v12 = vadd.f32 %v580_v8, %v392_v42  ;;  %v582_v13 = vpop.f32.mrb[7].mxu1 }
 0x3cc   :  { %v583_v16 = vadd.f32 %v582_v13, %v396_v45  ;;  %6607 = vrot.lane.b32.xlu0 %v6586_v60, %s8915_s29 }
 0x3cd   :  { %v675_v17 = vpack.c.bf16 %v581_v12, %v577_v11  ;;  %v6601_v19 = vpack.i.bf16 %v581_v12, %v577_v11 }
 0x3ce   :  { %v6591_v20 = vpack.i.bf16 %v583_v16, %v579_v14  ;;  %v723_v23 = vpack.c.bf16 %v583_v16, %v579_v14 }
 0x3d0   :  { %6617 = vrot.lane.b32.xlu0 %v6616_v57, %s8915_s29  ;;  %6244 = vmatmul.mubr.msk.bf16.vlgmr.msra.gmra.mrb[8].mxu0 %vm226_vm0, %v674_v55  ;;  %v829_v24 = vsel %vm226_vm0, %v723_v23, 0 }
 0x3d1   :  { %6592 = vrot.lane.b32.xlu1 %v6591_v20, %s7520_s23  ;;  %6248 = vmatpush3.bf16.xpose.msra.mxu1 %v829_v24 }
 0x3d2   :  { %6259 = vmatprep.subr.bf16.mxu1 %v7518_v36  ;;  %6255 = vmatprep.mubr.msk.bf16.mxu0 %vm7519_vm1, %v7518_v36 }
 0x3d4   :  { %6627 = vrot.lane.b32.xlu0 %v6586_v60, %s7521_s18 }
 0x3d5   :  { %6597 = vrot.lane.b32.xlu1 %v6616_v57, %s7520_s23 }
 0x3d8   :  { %6637 = vrot.lane.b32.xlu0 %v6616_v57, %s7521_s18  ;;  %6250 = vmatmul.mubr.msk.bf16.vlgmr.msra.gmra.mrb[8].mxu1 %vm226_vm0, %v675_v17 }
 0x3d9   :  { %6602 = vrot.lane.b32.xlu1 %v6601_v19, %s7520_s23  ;;  %6261 = vmatprep.mubr.msk.bf16.mxu1 %vm7519_vm1, %v7518_v36 }
 0x3dd   :  { %6612 = vrot.lane.b32.xlu1 %v6591_v20, %s8915_s29 }
 0x3e1   :  { %6622 = vrot.lane.b32.xlu1 %v6601_v19, %s8915_s29 }
 0x3e5   :  { %6632 = vrot.lane.b32.xlu1 %v6591_v20, %s7521_s18 }
 0x3e9   :  { %6642 = vrot.lane.b32.xlu1 %v6601_v19, %s7521_s18 }
 0x43a   :  { %v6588_v25 = vpop.permute.xlu0 %6587 }
 0x43b   :  { %v6590_v26 = vunpack.i.h.bf16 %v6588_v25  ;;  %v6589_v27 = vunpack.i.l.bf16 %v6588_v25 }
 0x43d   :  { %v724_v28 = vpack.c.bf16 %v6590_v26, %v6589_v27 }
 0x43e   :  { %v6608_v29 = vpop.permute.xlu0 %6607 }
 0x43f   :  { %v876_v30 = vsel %vm226_vm0, %v724_v28, 0  ;;  %v6610_v31 = vunpack.i.h.bf16 %v6608_v29  ;;  %v6609_v32 = vunpack.i.l.bf16 %v6608_v29 }
 0x440   :  { %6254 = vmatpush3.bf16.xpose.msra.mxu0 %v876_v30 }
 0x441   :  { %6265 = vmatprep.subr.bf16.mxu0 %v7518_v36  ;;  %v726_v45 = vpack.c.bf16 %v6610_v31, %v6609_v32 }
 0x442   :  { %v6618_v34 = vpop.permute.xlu0 %6617 }
 0x443   :  { %v6593_v33 = vpop.permute.xlu1 %6592  ;;  %v970_v52 = vsel %vm226_vm0, %v726_v45, 0  ;;  %v6620_v57 = vunpack.i.h.bf16 %v6618_v34  ;;  %v6619_v59 = vunpack.i.l.bf16 %v6618_v34 }
 0x444   :  { %v6595_v35 = vunpack.i.h.bf16 %v6593_v33  ;;  %v6594_v40 = vunpack.i.l.bf16 %v6593_v33 }
 0x445   :  { %v678_v5 = vpack.c.bf16 %v6620_v57, %v6619_v59 }
 0x446   :  { %v725_v42 = vpack.c.bf16 %v6595_v35, %v6594_v40  ;;  %v6628_v49 = vpop.permute.xlu0 %6627 }
 0x447   :  { %v6598_v44 = vpop.permute.xlu1 %6597  ;;  %v6630_v53 = vunpack.i.h.bf16 %v6628_v49  ;;  %v6629_v54 = vunpack.i.l.bf16 %v6628_v49 }
 0x448   :  { %v6600_v46 = vunpack.i.h.bf16 %v6598_v44  ;;  %v6599_v47 = vunpack.i.l.bf16 %v6598_v44  ;;  %v923_v48 = vsel %vm226_vm0, %v725_v42, 0 }
 0x449   :  { %6260 = vmatpush3.bf16.xpose.msra.mxu1 %v923_v48  ;;  %v728_v4 = vpack.c.bf16 %v6630_v53, %v6629_v54 }
 0x44a   :  { %v676_v50 = vpack.c.bf16 %v6600_v46, %v6599_v47  ;;  %6271 = vmatprep.subr.bf16.mxu1 %v7518_v36  ;;  %v6638_v11 = vpop.permute.xlu0 %6637 }
 0x44b   :  { %v6603_v51 = vpop.permute.xlu1 %6602  ;;  %v1064_v13 = vsel %vm226_vm0, %v728_v4, 0  ;;  %v6640_v16 = vunpack.i.h.bf16 %v6638_v11  ;;  %v6639_v17 = vunpack.i.l.bf16 %v6638_v11 }
 0x44c   :  { %v6605_v55 = vunpack.i.h.bf16 %v6603_v51  ;;  %v6604_v56 = vunpack.i.l.bf16 %v6603_v51  ;;  %6256 = vmatmul.mubr.msk.bf16.vlgmr.msra.gmra.mrb[12].mxu0 %vm226_vm0, %v676_v50 }
 0x44d   :  { %6266 = vmatpush3.bf16.xpose.msra.mxu0 %v970_v52  ;;  %6267 = vmatprep.mubr.msk.bf16.mxu0 %vm7519_vm1, %v7518_v36  ;;  %v680_v26 = vpack.c.bf16 %v6640_v16, %v6639_v17 }
 0x44e   :  { %v677_v60 = vpack.c.bf16 %v6605_v55, %v6604_v56  ;;  %6277 = vmatprep.subr.bf16.mxu0 %v7518_v36 }
 0x44f   :  { %v6613_v61 = vpop.permute.xlu1 %6612 }
 0x450   :  { %v6615_v0 = vunpack.i.h.bf16 %v6613_v61  ;;  %v6614_v3 = vunpack.i.l.bf16 %v6613_v61  ;;  %6262 = vmatmul.mubr.msk.bf16.vlgmr.msra.gmra.mrb[12].mxu1 %vm226_vm0, %v677_v60 }
 0x451   :  { %6273 = vmatprep.mubr.msk.bf16.mxu1 %vm7519_vm1, %v7518_v36 }
 0x452   :  { %v727_v8 = vpack.c.bf16 %v6615_v0, %v6614_v3 }
 0x453   :  { %v6623_v12 = vpop.permute.xlu1 %6622 }
 0x454   :  { %6268 = vmatmul.mubr.msk.bf16.vlgmr.msra.gmra.mrb[16].mxu0 %vm226_vm0, %v678_v5  ;;  %v1017_v14 = vsel %vm226_vm0, %v727_v8, 0  ;;  %v6625_v19 = vunpack.i.h.bf16 %v6623_v12  ;;  %v6624_v20 = vunpack.i.l.bf16 %v6623_v12 }
 0x455   :  { %6278 = vmatpush3.bf16.xpose.msra.mxu0 %v1064_v13  ;;  %6272 = vmatpush3.bf16.xpose.msra.mxu1 %v1017_v14 }
 0x456   :  { %6279 = vmatprep.mubr.msk.bf16.mxu0 %vm7519_vm1, %v7518_v36  ;;  %6289 = vmatprep.subr.bf16.mxu0 %v7518_v36  ;;  %v679_v27 = vpack.c.bf16 %v6625_v19, %v6624_v20 }
 0x457   :  { %v6633_v23 = vpop.permute.xlu1 %6632  ;;  %6283 = vmatprep.subr.bf16.mxu1 %v7518_v36 }
 0x458   :  { %v6635_v24 = vunpack.i.h.bf16 %v6633_v23  ;;  %v6634_v25 = vunpack.i.l.bf16 %v6633_v23 }
 0x45a   :  { %v729_v28 = vpack.c.bf16 %v6635_v24, %v6634_v25 }
 0x45b   :  { %v6643_v29 = vpop.permute.xlu1 %6642 }
 0x45c   :  { %6274 = vmatmul.mubr.msk.bf16.vlgmr.msra.gmra.mrb[16].mxu1 %vm226_vm0, %v679_v27  ;;  %6280 = vmatmul.mubr.msk.bf16.vlgmr.msra.gmra.mrb[20].mxu0 %vm226_vm0, %v680_v26  ;;  %v1111_v30 = vsel %vm226_vm0, %v729_v28, 0  ;;  %v6645_v31 = vunpack.i.h.bf16 %v6643_v29  ;;  %v6644_v32 = vunpack.i.l.bf16 %v6643_v29 }
 0x45d   :  { %6290 = vmatpush3.bf16.msra.mxu0 %v770_v9  ;;  %6284 = vmatpush3.bf16.xpose.msra.mxu1 %v1111_v30 }
 0x45e   :  { %6285 = vmatprep.mubr.msk.bf16.mxu1 %vm7519_vm1, %v7518_v36  ;;  %6295 = vmatprep.subr.bf16.mxu1 %v7518_v36  ;;  %v681_v33 = vpack.c.bf16 %v6645_v31, %v6644_v32 }
 0x45f   :  { %6291 = vmatprep.mubr.msk.bf16.mxu0 %vm7519_vm1, %v7518_v36  ;;  %6301 = vmatprep.subr.bf16.mxu0 %v7518_v36 }
 0x464   :  { %6286 = vmatmul.mubr.msk.bf16.vlgmr.msra.gmra.mrb[20].mxu1 %vm226_vm0, %v681_v33 }
 0x465   :  { %6296 = vmatpush3.bf16.msra.mxu1 %v771_v6  ;;  %6297 = vmatprep.mubr.msk.bf16.mxu1 %vm7519_vm1, %v7518_v36 }
 0x466   :  { %6307 = vmatprep.subr.bf16.mxu1 %v7518_v36 }
 0x4a3   :  { %v7913_v1 = vpop.f32.mrb[8].mxu0 }
 0x4a4   :  { %v6245_v2 = vpop.f32.mrb[9].mxu0  ;;  %v1155_v9 = vsel %vm1154_vm2, %v7913_v1, -inf }
 0x4a5   :  { %1156 = vmax.xlane.f32.xlu0 %v1155_v9  ;;  %v7917_v34 = vpop.f32.mrb[10].mxu0 }
 0x4a6   :  { %v6246_v35 = vpop.f32.mrb[11].mxu0  ;;  %v1158_v62 = vsel %vm1154_vm2, %v7917_v34, -inf }
 0x4a7   :  { %1159 = vmax.xlane.f32.xlu1 %v1158_v62 }
 0x4ab   :  { %v7921_v63 = vpop.f32.mrb[8].mxu1 }
 0x4ac   :  { %v6251_v6 = vpop.f32.mrb[9].mxu1  ;;  %v1161_v40 = vsel %vm1154_vm2, %v7921_v63, -inf }
 0x4ad   :  { %1162 = vmax.xlane.f32.xlu0 %v1161_v40  ;;  %v7925_v42 = vpop.f32.mrb[10].mxu1 }
 0x4ae   :  { %v6252_v44 = vpop.f32.mrb[11].mxu1  ;;  %v1164_v45 = vsel %vm1154_vm2, %v7925_v42, -inf }
 0x4b1   :  { %1165 = vmax.xlane.f32.xlu0 %v1164_v45 }
 0x51f   :  { %v7929_v46 = vpop.f32.mrb[12].mxu0 }
 0x520   :  { %v6257_v47 = vpop.f32.mrb[13].mxu0  ;;  %v1167_v48 = vsel %vm1154_vm2, %v7929_v46, -inf }
 0x521   :  { %1168 = vmax.xlane.f32.xlu0 %v1167_v48  ;;  %v7933_v49 = vpop.f32.mrb[14].mxu0 }
 0x522   :  { %v6258_v50 = vpop.f32.mrb[15].mxu0  ;;  %v1170_v51 = vsel %vm1154_vm2, %v7933_v49, -inf }
 0x523   :  { %v7937_v52 = vpop.f32.mrb[12].mxu1  ;;  %1171 = vmax.xlane.f32.xlu1 %v1170_v51 }
 0x524   :  { %v6263_v53 = vpop.f32.mrb[13].mxu1  ;;  %v1173_v54 = vsel %vm1154_vm2, %v7937_v52, -inf }
 0x525   :  { %v7941_v55 = vpop.f32.mrb[14].mxu1  ;;  %1174 = vmax.xlane.f32.xlu0 %v1173_v54 }
 0x526   :  { %v6264_v56 = vpop.f32.mrb[15].mxu1  ;;  %v1176_v57 = vsel %vm1154_vm2, %v7941_v55, -inf }
 0x527   :  { %1177 = vmax.xlane.f32.xlu1 %v1176_v57  ;;  %v7945_v59 = vpop.f32.mrb[16].mxu0 }
 0x528   :  { %v6269_v60 = vpop.f32.mrb[17].mxu0  ;;  %v1179_v61 = vsel %vm1154_vm2, %v7945_v59, -inf }
 0x529   :  { %1180 = vmax.xlane.f32.xlu0 %v1179_v61  ;;  %v7949_v0 = vpop.f32.mrb[18].mxu0 }
 0x52a   :  { %v6270_v3 = vpop.f32.mrb[19].mxu0  ;;  %v1182_v4 = vsel %vm1154_vm2, %v7949_v0, -inf }
 0x52b   :  { %1183 = vmax.xlane.f32.xlu1 %v1182_v4 }
 0x52f   :  { %v7953_v5 = vpop.f32.mrb[16].mxu1  ;;  %v7955_v8 = vpop.f32.mrb[20].mxu0 }
 0x530   :  { %v6275_v11 = vpop.f32.mrb[17].mxu1  ;;  %v6281_v12 = vpop.f32.mrb[21].mxu0  ;;  %v1185_v13 = vsel %vm1154_vm2, %v7953_v5, -inf  ;;  %v1191_v23 = vsel %vm1154_vm2, %v7955_v8, -inf }
 0x531   :  { %v7959_v14 = vpop.f32.mrb[18].mxu1  ;;  %1186 = vmax.xlane.f32.xlu0 %v1185_v13  ;;  %v7961_v16 = vpop.f32.mrb[22].mxu0 }
 0x532   :  { %v6276_v17 = vpop.f32.mrb[19].mxu1  ;;  %v6282_v19 = vpop.f32.mrb[23].mxu0  ;;  %v1188_v20 = vsel %vm1154_vm2, %v7959_v14, -inf  ;;  %v1194_v24 = vsel %vm1154_vm2, %v7961_v16, -inf }
 0x533   :  { %1189 = vmax.xlane.f32.xlu1 %v1188_v20  ;;  %v1157_v30 = vpop.xlane.xlu0 %1156 }
 0x534   :  { %v1160_v32 = vpop.xlane.xlu1 %1159  ;;  %v1203_v33 = vsub.f32 %v7913_v1, %v1157_v30 }
 0x535   :  { %1192 = vmax.xlane.f32.xlu0 %v1191_v23  ;;  %v1204_v2 = vsub.f32 %v7917_v34, %v1160_v32 }
 0x536   :  { %v1219_v35 = vmul.f32 1.442695, %v1203_v33 }
 0x537   :  { %v7969_v25 = vpop.f32.mrb[20].mxu1  ;;  %1195 = vmax.xlane.f32.xlu1 %v1194_v24  ;;  %v1221_v6 = vmul.f32 1.442695, %v1204_v2 }
 0x538   :  { %v6287_v26 = vpop.f32.mrb[21].mxu1  ;;  %v1197_v27 = vsel %vm1154_vm2, %v7969_v25, -inf  ;;  %7024 = vpow2.f32 %v1219_v35 }
 0x539   :  { %v7973_v28 = vpop.f32.mrb[22].mxu1  ;;  %1198 = vmax.xlane.f32.xlu0 %v1197_v27  ;;  %7026 = vpow2.f32 %v1221_v6 }
 0x53a   :  { %v6288_v29 = vpop.f32.mrb[23].mxu1  ;;  %v1163_v31 = vpop.xlane.xlu0 %1162  ;;  %v1200_v1 = vsel %vm1154_vm2, %v7973_v28, -inf }
 0x53b   :  { %v1205_v62 = vsub.f32 %v7921_v63, %v1163_v31 }
 0x53d   :  { %v1223_v44 = vmul.f32 1.442695, %v1205_v62 }
 0x53e   :  { %v1166_v9 = vpop.xlane.xlu0 %1165 }
 0x53f   :  { %v1206_v40 = vsub.f32 %v7925_v42, %v1166_v9  ;;  %7028 = vpow2.f32 %v1223_v44 }
 0x541   :  { %v1225_v45 = vmul.f32 1.442695, %v1206_v40 }
 0x542   :  { %v7983_v47 = vpop.eup %7024 }
 0x543   :  { %7030 = vpow2.f32 %v1225_v45  ;;  %v7987_v48 = vpop.eup %7026  ;;  %v1251_v34 = vsel %vm1154_vm2, %v7983_v47, 0.0 }
 0x544   :  { %v1254_v42 = vsel %vm1154_vm2, %v7987_v48, 0.0 }
 0x548   :  { %6652 = vrot.lane.b32.xlu1 %v7847_v7, %s7520_s23 }
 0x549   :  { %v7991_v63 = vpop.eup %7028 }
 0x54a   :  { %v1257_v51 = vsel %vm1154_vm2, %v7991_v63, 0.0 }
 0x54d   :  { %v7995_v50 = vpop.eup %7030 }
 0x54e   :  { %v1260_v53 = vsel %vm1154_vm2, %v7995_v50, 0.0 }
 0x54f   :  { %6647 = vrot.lane.b32.xlu0 %v7854_v10, %s7520_s23 }
 0x56c   :  { %1201 = vmax.xlane.f32.xlu1 %v1200_v1 }
 0x56e   :  { %1252 = vadd.xlane.f32.xlu0 %v1251_v34 }
 0x570   :  { %1255 = vadd.xlane.f32.xlu1 %v1254_v42 }
 0x572   :  { %1258 = vadd.xlane.f32.xlu0 %v1257_v51 }
 0x574   :  { %1261 = vadd.xlane.f32.xlu1 %v1260_v53 }
 0x5ae   :  { %v1169_v54 = vpop.xlane.xlu0 %1168 }
 0x5af   :  { %v1207_v56 = vsub.f32 %v7929_v46, %v1169_v54 }
 0x5b0   :  { %v1172_v57 = vpop.xlane.xlu1 %1171 }
 0x5b1   :  { %v1227_v60 = vmul.f32 1.442695, %v1207_v56  ;;  %v1208_v61 = vsub.f32 %v7933_v49, %v1172_v57 }
 0x5b2   :  { %v1175_v3 = vpop.xlane.xlu0 %1174 }
 0x5b3   :  { %7032 = vpow2.f32 %v1227_v60  ;;  %v1229_v4 = vmul.f32 1.442695, %v1208_v61  ;;  %v1209_v11 = vsub.f32 %v7937_v52, %v1175_v3 }
 0x5b4   :  { %v1178_v23 = vpop.xlane.xlu1 %1177 }
 0x5b5   :  { %7034 = vpow2.f32 %v1229_v4  ;;  %v1231_v12 = vmul.f32 1.442695, %v1209_v11  ;;  %v1210_v26 = vsub.f32 %v7941_v55, %v1178_v23 }
 0x5b6   :  { %v1181_v20 = vpop.xlane.xlu0 %1180 }
 0x5b7   :  { %7036 = vpow2.f32 %v1231_v12  ;;  %v1211_v30 = vsub.f32 %v7945_v59, %v1181_v20  ;;  %v1233_v31 = vmul.f32 1.442695, %v1210_v26 }
 0x5b8   :  { %v1184_v27 = vpop.xlane.xlu1 %1183 }
 0x5b9   :  { %v1212_v32 = vsub.f32 %v7949_v0, %v1184_v27  ;;  %v1235_v33 = vmul.f32 1.442695, %v1211_v30  ;;  %7038 = vpow2.f32 %v1233_v31 }
 0x5bb   :  { %v1237_v62 = vmul.f32 1.442695, %v1212_v32  ;;  %7040 = vpow2.f32 %v1235_v33 }
 0x5bd   :  { %v8004_v13 = vpop.eup %7032  ;;  %7042 = vpow2.f32 %v1237_v62 }
 0x5be   :  { %v1263_v17 = vsel %vm1154_vm2, %v8004_v13, 0.0  ;;  %v1187_v24 = vpop.xlane.xlu0 %1186 }
 0x5bf   :  { %v8008_v19 = vpop.eup %7034  ;;  %1264 = vadd.xlane.f32.xlu0 %v1263_v17  ;;  %v1213_v2 = vsub.f32 %v7953_v5, %v1187_v24 }
 0x5c0   :  { %v1266_v46 = vsel %vm1154_vm2, %v8008_v19, 0.0  ;;  %v1190_v9 = vpop.xlane.xlu1 %1189 }
 0x5c1   :  { %v8012_v49 = vpop.eup %7036  ;;  %1267 = vadd.xlane.f32.xlu1 %v1266_v46  ;;  %v1239_v40 = vmul.f32 1.442695, %v1213_v2  ;;  %v1214_v44 = vsub.f32 %v7959_v14, %v1190_v9 }
 0x5c2   :  { %v1269_v52 = vsel %vm1154_vm2, %v8012_v49, 0.0  ;;  %v1193_v29 = vpop.xlane.xlu0 %1192 }
 0x5c3   :  { %1270 = vadd.xlane.f32.xlu0 %v1269_v52  ;;  %v1215_v6 = vsub.f32 %v7955_v8, %v1193_v29  ;;  %7044 = vpow2.f32 %v1239_v40  ;;  %v1241_v1 = vmul.f32 1.442695, %v1214_v44  ;;  %v8028_v34 = vpop.eup %7038 }
 0x5c4   :  { %v1196_v45 = vpop.xlane.xlu1 %1195 }
 0x5c5   :  { %v1243_v59 = vmul.f32 1.442695, %v1215_v6  ;;  %v1216_v5 = vsub.f32 %v7961_v16, %v1196_v45  ;;  %v8030_v42 = vpop.eup %7040 }
 0x5c6   :  { %v1199_v35 = vpop.xlane.xlu0 %1198  ;;  %v1275_v54 = vsel %vm1154_vm2, %v8030_v42, 0.0 }
 0x5c7   :  { %v1217_v55 = vsub.f32 %v7969_v25, %v1199_v35  ;;  %7046 = vpow2.f32 %v1243_v59  ;;  %v1245_v8 = vmul.f32 1.442695, %v1216_v5  ;;  %v1272_v25 = vsel %vm1154_vm2, %v8028_v34, 0.0  ;;  %v8034_v14 = vpop.eup %7042 }
 0x5c8   :  { %v6653_v51 = vpop.permute.xlu1 %6652  ;;  %v1278_v57 = vsel %vm1154_vm2, %v8034_v14, 0.0 }
 0x5c9   :  { %v1247_v0 = vmul.f32 1.442695, %v1217_v55  ;;  %v6655_v40 = vunpack.i.h.bf16 %v6653_v51  ;;  %v6654_v55 = vunpack.i.l.bf16 %v6653_v51 }
 0x5ca   :  { %v6648_v53 = vpop.permute.xlu0 %6647 }
 0x5cb   :  { %7048 = vpow2.f32 %v1247_v0  ;;  %v6650_v32 = vunpack.i.h.bf16 %v6648_v53  ;;  %v6649_v33 = vunpack.i.l.bf16 %v6648_v53 }
 0x5cc   :  { %7050 = vpow2.f32 %v1241_v1 }
 0x5cd   :  { %v8038_v56 = vpop.eup %7044  ;;  %7052 = vpow2.f32 %v1245_v8  ;;  %v772_v59 = vpack.c.bf16 %v6650_v32, %v6649_v33 }
 0x5ce   :  { %v1281_v4 = vsel %vm1154_vm2, %v8038_v56, 0.0 }
 0x5d1   :  { %v8042_v60 = vpop.eup %7046 }
 0x5d2   :  { %6662 = vrot.lane.b32.xlu1 %v7847_v7, %s8915_s29  ;;  %v1287_v46 = vsel %vm1154_vm2, %v8042_v60, 0.0 }
 0x5d5   :  { %v8047_v11 = vpop.eup %7048 }
 0x5d6   :  { %v8051_v52 = vpop.eup %7050  ;;  %v1293_v20 = vsel %vm1154_vm2, %v8047_v11, 0.0 }
 0x5d7   :  { %v1284_v24 = vsel %vm1154_vm2, %v8051_v52, 0.0  ;;  %v8057_v26 = vpop.eup %7052 }
 0x5d8   :  { %v1290_v27 = vsel %vm1154_vm2, %v8057_v26, 0.0 }
 0x5d9   :  { %6657 = vrot.lane.b32.xlu0 %v7854_v10, %s8915_s29 }
 0x5f6   :  { %1273 = vadd.xlane.f32.xlu1 %v1272_v25 }
 0x5f8   :  { %1276 = vadd.xlane.f32.xlu0 %v1275_v54 }
 0x5f9   :  { %v1202_v16 = vpop.xlane.xlu1 %1201 }
 0x5fa   :  { %v1218_v61 = vsub.f32 %v7973_v28, %v1202_v16  ;;  %1279 = vadd.xlane.f32.xlu1 %v1278_v57 }
 0x5fb   :  { %v1253_v3 = vpop.xlane.xlu0 %1252 }
 0x5fc   :  { %v1249_v12 = vmul.f32 1.442695, %v1218_v61  ;;  %1282 = vadd.xlane.f32.xlu0 %v1281_v4  ;;  %7054 = vrcp.f32 %v1253_v3 }
 0x5fd   :  { %v1256_v17 = vpop.xlane.xlu1 %1255 }
 0x5fe   :  { %7056 = vpow2.f32 %v1249_v12  ;;  %1288 = vadd.xlane.f32.xlu1 %v1287_v46 }
 0x5ff   :  { %7058 = vrcp.f32 %v1256_v17  ;;  %v1259_v28 = vpop.xlane.xlu0 %1258 }
 0x600   :  { %7060 = vrcp.f32 %v1259_v28  ;;  %1294 = vadd.xlane.f32.xlu0 %v1293_v20 }
 0x601   :  { %v1262_v23 = vpop.xlane.xlu1 %1261 }
 0x602   :  { %7062 = vrcp.f32 %v1262_v23  ;;  %1285 = vadd.xlane.f32.xlu1 %v1284_v24 }
 0x606   :  { %1291 = vadd.xlane.f32.xlu1 %v1290_v27  ;;  %v7055_v29 = vpop.eup %7054 }
 0x607   :  { %v1315_v35 = vmul.f32 %v7055_v29, %v7983_v47  ;;  %v773_v47 = vpack.c.bf16 %v6655_v40, %v6654_v55  ;;  %v6800_v55 = vld [vmem:[#allocation13] sm:$0xff]  }
 0x608   :  { %v8061_v30 = vpop.eup %7056 }
 0x609   :  { %v7059_v31 = vpop.eup %7058  ;;  %v1296_v2 = vsel %vm1154_vm2, %v8061_v30, 0.0 }
 0x60a   :  { %v7061_v9 = vpop.eup %7060  ;;  %v1316_v62 = vmul.f32 %v7059_v31, %v7987_v48  ;;  %1297 = vadd.xlane.f32.xlu1 %v1296_v2 }
 0x60b   :  { %v1317_v45 = vmul.f32 %v7061_v9, %v7991_v63 }
 0x60c   :  { %v7063_v6 = vpop.eup %7062  ;;  %v1331_v44 = vpack.c.bf16 %v1316_v62, %v1315_v35 }
 0x60d   :  { %v1318_v0 = vmul.f32 %v7063_v6, %v7995_v50 }
 0x60e   :  { %6292 = vmatmul.mubr.msk.bf16.vlgmr.msra.gmra.mrb[24].mxu0 %vm1154_vm2, %v1331_v44 }
 0x60f   :  { %6302 = vmatpush3.bf16.msra.mxu0 %v772_v59  ;;  %v1332_v1 = vpack.c.bf16 %v1318_v0, %v1317_v45  ;;  %6303 = vmatprep.mubr.msk.bf16.mxu0 %vm7519_vm1, %v7518_v36 }
 0x610   :  { %6313 = vmatprep.subr.bf16.mxu0 %v7518_v36 }
 0x611   :  { %6298 = vmatmul.mubr.msk.bf16.vlgmr.msra.gmra.mrb[24].mxu1 %vm1154_vm2, %v1332_v1 }
 0x612   :  { %6308 = vmatpush3.bf16.msra.mxu1 %v773_v47  ;;  %6309 = vmatprep.mubr.msk.bf16.mxu1 %vm7519_vm1, %v7518_v36 }
 0x613   :  { %6319 = vmatprep.subr.bf16.mxu1 %v7518_v36 }
 0x616   :  { %6667 = vrot.lane.b32.xlu0 %v7854_v10, %s7521_s18 }
 0x61b   :  { %6672 = vrot.lane.b32.xlu1 %v7847_v7, %s7521_s18 }
 0x64c   :  { %v1265_v48 = vpop.xlane.xlu0 %1264 }
 0x64d   :  { %7064 = vrcp.f32 %v1265_v48 }
 0x64e   :  { %v1268_v63 = vpop.xlane.xlu1 %1267 }
 0x64f   :  { %7066 = vrcp.f32 %v1268_v63 }
 0x650   :  { %v1271_v50 = vpop.xlane.xlu0 %1270 }
 0x651   :  { %7068 = vrcp.f32 %v1271_v50 }
 0x652   :  { %v6663_v7 = vpop.permute.xlu1 %6662 }
 0x653   :  { %v6665_v28 = vunpack.i.h.bf16 %v6663_v7  ;;  %v6664_v20 = vunpack.i.l.bf16 %v6663_v7 }
 0x654   :  { %v6658_v5 = vpop.permute.xlu0 %6657 }
 0x655   :  { %v6660_v25 = vunpack.i.h.bf16 %v6658_v5  ;;  %v6659_v53 = vunpack.i.l.bf16 %v6658_v5  ;;  %v775_v2 = vpack.c.bf16 %v6665_v28, %v6664_v20 }
 0x657   :  { %v7065_v8 = vpop.eup %7064  ;;  %v774_v61 = vpack.c.bf16 %v6660_v25, %v6659_v53 }
 0x658   :  { %v1319_v54 = vmul.f32 %v7065_v8, %v8004_v13 }
 0x659   :  { %v7067_v51 = vpop.eup %7066 }
 0x65a   :  { %v1320_v16 = vmul.f32 %v7067_v51, %v8008_v19 }
 0x65b   :  { %v7069_v12 = vpop.eup %7068 }
 0x65c   :  { %v1333_v57 = vpack.c.bf16 %v1320_v16, %v1319_v54  ;;  %v1321_v23 = vmul.f32 %v7069_v12, %v8012_v49  ;;  %v6803_v12 = vld [vmem:[#allocation13 + $0x18] sm:$0xff]  }
 0x65e   :  { %6304 = vmatmul.mubr.msk.bf16.vlgmr.msra.gmra.mrb[28].mxu0 %vm1154_vm2, %v1333_v57 }
 0x65f   :  { %6314 = vmatpush3.bf16.msra.mxu0 %v774_v61  ;;  %6315 = vmatprep.mubr.msk.bf16.mxu0 %vm7519_vm1, %v7518_v36 }
 0x660   :  { %6325 = vmatprep.subr.bf16.mxu0 %v7518_v36 }
 0x683   :  { %v1274_v10 = vpop.xlane.xlu1 %1273 }
 0x684   :  { %7070 = vrcp.f32 %v1274_v10 }
 0x685   :  { %v1277_v3 = vpop.xlane.xlu0 %1276 }
 0x686   :  { %7072 = vrcp.f32 %v1277_v3 }
 0x687   :  { %v1280_v4 = vpop.xlane.xlu1 %1279 }
 0x688   :  { %7074 = vrcp.f32 %v1280_v4 }
 0x689   :  { %v1283_v13 = vpop.xlane.xlu0 %1282 }
 0x68a   :  { %7076 = vrcp.f32 %v1283_v13 }
 0x68b   :  { %v1289_v19 = vpop.xlane.xlu1 %1288 }
 0x68d   :  { %v1295_v17 = vpop.xlane.xlu0 %1294 }
 0x68e   :  { %v7071_v46 = vpop.eup %7070 }
 0x68f   :  { %v1322_v24 = vmul.f32 %v7071_v46, %v8028_v34  ;;  %v1286_v27 = vpop.xlane.xlu1 %1285 }
 0x690   :  { %v7073_v29 = vpop.eup %7072  ;;  %7078 = vrcp.f32 %v1286_v27 }
 0x691   :  { %v6668_v31 = vpop.permute.xlu0 %6667  ;;  %v1334_v32 = vpack.c.bf16 %v1322_v24, %v1321_v23  ;;  %7080 = vrcp.f32 %v1289_v19  ;;  %v1323_v62 = vmul.f32 %v7073_v29, %v8030_v42 }
 0x692   :  { %v7075_v33 = vpop.eup %7074  ;;  %v6670_v9 = vunpack.i.h.bf16 %v6668_v31  ;;  %v6669_v35 = vunpack.i.l.bf16 %v6668_v31 }
 0x693   :  { %v1324_v6 = vmul.f32 %v7075_v33, %v8034_v14  ;;  %v1292_v40 = vpop.xlane.xlu1 %1291  ;;  %6310 = vmatmul.mubr.msk.bf16.vlgmr.msra.gmra.mrb[28].mxu1 %vm1154_vm2, %v1334_v32 }
 0x694   :  { %v776_v49 = vpack.c.bf16 %v6670_v9, %v6669_v35  ;;  %7082 = vrcp.f32 %v1292_v40  ;;  %6320 = vmatpush3.bf16.msra.mxu1 %v775_v2  ;;  %6321 = vmatprep.mubr.msk.bf16.mxu1 %vm7519_vm1, %v7518_v36  ;;  %v7077_v42 = vpop.eup %7076  ;;  %v6805_v2 = vld [vmem:[#allocation13 + $0x28] sm:$0xff]  }
 0x695   :  { %v1335_v34 = vpack.c.bf16 %v1324_v6, %v1323_v62  ;;  %6331 = vmatprep.subr.bf16.mxu1 %v7518_v36  ;;  %7084 = vrcp.f32 %v1295_v17  ;;  %v1325_v59 = vmul.f32 %v7077_v42, %v8038_v56  ;;  %v6804_v17 = vld [vmem:[#allocation13 + $0x20] sm:$0xff]  }
 0x697   :  { %6316 = vmatmul.mubr.msk.bf16.vlgmr.msra.gmra.mrb[32].mxu0 %vm1154_vm2, %v1335_v34  ;;  %v1298_v44 = vpop.xlane.xlu1 %1297 }
 0x698   :  { %6326 = vmatpush3.bf16.msra.mxu0 %v776_v49  ;;  %7086 = vrcp.f32 %v1298_v44  ;;  %6327 = vmatprep.mubr.msk.bf16.mxu0 %vm7519_vm1, %v7518_v36  ;;  %v6806_v49 = vld [vmem:[#allocation13 + $0x30] sm:$0xff]  }
 0x699   :  { %6337 = vmatprep.subr.bf16.mxu0 %v6800_v55 }
 0x69a   :  { %v7079_v14 = vpop.eup %7078 }
 0x69b   :  { %v1326_v45 = vmul.f32 %v7079_v14, %v8051_v52  ;;  %v6673_v0 = vpop.permute.xlu1 %6672  ;;  %v7081_v1 = vpop.eup %7080  ;;  %v6801_v52 = vld [vmem:[#allocation13 + $0x8] sm:$0xff]  }
 0x69c   :  { %v6675_v47 = vunpack.i.h.bf16 %v6673_v0  ;;  %v6674_v48 = vunpack.i.l.bf16 %v6673_v0  ;;  %v1327_v8 = vmul.f32 %v7081_v1, %v8042_v60 }
 0x69d   :  { %v1336_v63 = vpack.c.bf16 %v1326_v45, %v1325_v59  ;;  %v6807_v59 = vld [vmem:[#allocation13 + $0x38] sm:$0xff]  }
 0x69e   :  { %v7083_v50 = vpop.eup %7082  ;;  %v777_v5 = vpack.c.bf16 %v6675_v47, %v6674_v48 }
 0x69f   :  { %v1328_v51 = vmul.f32 %v7083_v50, %v8057_v26  ;;  %6322 = vmatmul.mubr.msk.bf16.vlgmr.msra.gmra.mrb[32].mxu1 %vm1154_vm2, %v1336_v63  ;;  %v7085_v25 = vpop.eup %7084  ;;  %v6802_v26 = vld [vmem:[#allocation13 + $0x10] sm:$0xff]  }
 0x6a0   :  { %6332 = vmatpush3.bf16.msra.mxu1 %v777_v5  ;;  %6333 = vmatprep.mubr.msk.bf16.mxu1 %vm7519_vm1, %v7518_v36  ;;  %v1329_v54 = vmul.f32 %v7085_v25, %v8047_v11 }
 0x6a1   :  { %v1337_v56 = vpack.c.bf16 %v1328_v51, %v1327_v8 }
 0x6a2   :  { %v7087_v53 = vpop.eup %7086 }
 0x6a3   :  { %v1330_v16 = vmul.f32 %v7087_v53, %v8061_v30  ;;  %6328 = vmatmul.mubr.msk.bf16.vlgmr.msra.gmra.mrb[36].mxu0 %vm1154_vm2, %v1337_v56  ;;  %v5762_v56 = vld [vmem:[%s8888_s9] ss:$0 sm:$0xff] }
 0x6a4   :  { %6338 = vmatpush3.bf16.msra.mxu0 %v6800_v55 }
 0x6a5   :  { %v1338_v60 = vpack.c.bf16 %v1330_v16, %v1329_v54  ;;  %6339 = vmatprep.subr.bf16.mxu0 %v6801_v52 }
 0x6a7   :  { %6334 = vmatmul.mubr.msk.bf16.vlgmr.msra.gmra.mrb[36].mxu1 %vm1154_vm2, %v1338_v60 }
 0x6a8   :  { %6340 = vmatpush3.bf16.msra.mxu0 %v6801_v52  ;;  %2324 = vmatprep.mubr.bf16.mxu1 %v7517_v58 }
 0x6a9   :  { %6345 = vmatprep.subr.bf16.mxu0 %v6802_v26 }
 0x6e1   :  { %v1376_v57 = vpop.f32.mrb[24].mxu0 }
 0x6e2   :  { %v6293_v61 = vpop.f32.mrb[25].mxu0 }
 0x6e3   :  { %v1379_v7 = vpop.f32.mrb[26].mxu0 }
 0x6e4   :  { %v1691_v10 = vpack.c.bf16 %v1379_v7, %v1376_v57  ;;  %v6294_v3 = vpop.f32.mrb[27].mxu0  ;;  %v1420_v11 = vpop.f32.mrb[24].mxu1 }
 0x6e5   :  { %v6299_v4 = vpop.f32.mrb[25].mxu1  ;;  %v6810_v3 = vld [vmem:[#allocation14 + $0x4] ss:$16 sps:$4 sm:$0xff]  }
 0x6e6   :  { %6341 = vmatprep.mubr.msk.bf16.mxu0 %vm226_vm0, %v1691_v10  ;;  %v1423_v30 = vpop.f32.mrb[26].mxu1  ;;  %v6816_v4 = vld [vmem:[#allocation14 + $0x24] ss:$16 sps:$4 sm:$0xff]   ;;  %2292 = vmatprep.subr.bf16.mxu1 %v6810_v3 }
 0x6e7   :  { %v1692_v13 = vpack.c.bf16 %v1423_v30, %v1420_v11  ;;  %v6300_v19 = vpop.f32.mrb[27].mxu1  ;;  %v6811_v11 = vld [vmem:[#allocation14 + $0x8] ss:$16 sps:$4 sm:$0xff]   ;;  %v6819_v30 = vld [vmem:[#allocation14 + $0x2c] ss:$16 sps:$4 sm:$0xff]  }
 0x6e9   :  { %6342 = vmatmul.mubr.msk.bf16.vlgmr.msra.gmra.mrb[40].mxu0 %vm226_vm0, %v1692_v13  ;;  %v6814_v13 = vld [vmem:[#allocation14 + $0x20] ss:$16 sps:$4 sm:$0xff]  }
 0x6ea   :  { %6346 = vmatpush3.bf16.msra.mxu0 %v6802_v26 }
 0x6eb   :  { %6347 = vmatprep.subr.bf16.mxu0 %v6803_v12 }
 0x6ee   :  { %6348 = vmatpush3.bf16.msra.mxu0 %v6803_v12 }
 0x6ef   :  { %6353 = vmatprep.subr.bf16.mxu0 %v6804_v17 }
 0x731   :  { %v1464_v46 = vpop.f32.mrb[28].mxu0 }
 0x732   :  { %v6305_v28 = vpop.f32.mrb[29].mxu0 }
 0x733   :  { %v1467_v20 = vpop.f32.mrb[30].mxu0 }
 0x734   :  { %v1693_v23 = vpack.c.bf16 %v1467_v20, %v1464_v46  ;;  %v6306_v24 = vpop.f32.mrb[31].mxu0 }
 0x736   :  { %6349 = vmatprep.mubr.msk.bf16.mxu0 %vm226_vm0, %v1693_v23 }
 0x766   :  { %v1508_v27 = vpop.f32.mrb[28].mxu1 }
 0x767   :  { %v6311_v29 = vpop.f32.mrb[29].mxu1 }
 0x768   :  { %v1511_v31 = vpop.f32.mrb[30].mxu1 }
 0x769   :  { %v1694_v32 = vpack.c.bf16 %v1511_v31, %v1508_v27  ;;  %v6312_v33 = vpop.f32.mrb[31].mxu1 }
 0x76a   :  { %v1552_v9 = vpop.f32.mrb[32].mxu0 }
 0x76b   :  { %v6317_v35 = vpop.f32.mrb[33].mxu0  ;;  %6350 = vmatmul.mubr.msk.bf16.vlgmr.msra.gmra.mrb[40].mxu0 %vm226_vm0, %v1694_v32 }
 0x76c   :  { %6354 = vmatpush3.bf16.msra.mxu0 %v6804_v17  ;;  %v1555_v62 = vpop.f32.mrb[34].mxu0 }
 0x76d   :  { %v1695_v6 = vpack.c.bf16 %v1555_v62, %v1552_v9  ;;  %v6318_v40 = vpop.f32.mrb[35].mxu0  ;;  %6355 = vmatprep.subr.bf16.mxu0 %v6805_v2  ;;  %v6822_v62 = vld [vmem:[#allocation14 + $0x44] ss:$16 sps:$4 sm:$0xff]  }
 0x76e   :  { %v6820_v40 = vld [vmem:[#allocation14 + $0x40] ss:$16 sps:$4 sm:$0xff]  }
 0x76f   :  { %6357 = vmatprep.mubr.msk.bf16.mxu0 %vm226_vm0, %v1695_v6  ;;  %v6825_v6 = vld [vmem:[#allocation14 + $0x4c] ss:$16 sps:$4 sm:$0xff]  }
 0x770   :  { %6356 = vmatpush3.bf16.msra.mxu0 %v6805_v2 }
 0x771   :  { %6361 = vmatprep.subr.bf16.mxu0 %v6806_v49 }
 0x772   :  { %v1596_v34 = vpop.f32.mrb[32].mxu1 }
 0x773   :  { %v6323_v55 = vpop.f32.mrb[33].mxu1 }
 0x774   :  { %v1599_v44 = vpop.f32.mrb[34].mxu1  ;;  %v6831_v55 = vld [vmem:[#allocation14 + $0x6c] ss:$16 sps:$4 sm:$0xff]  }
 0x775   :  { %v1696_v42 = vpack.c.bf16 %v1599_v44, %v1596_v34  ;;  %v6324_v14 = vpop.f32.mrb[35].mxu1  ;;  %v6828_v34 = vld [vmem:[#allocation14 + $0x64] ss:$16 sps:$4 sm:$0xff]   ;;  %v6826_v44 = vld [vmem:[#allocation14 + $0x60] ss:$16 sps:$4 sm:$0xff]  }
 0x776   :  { %v1640_v45 = vpop.f32.mrb[36].mxu0  ;;  %v6834_v14 = vld [vmem:[#allocation14 + $0x84] ss:$16 sps:$4 sm:$0xff]  }
 0x777   :  { %v6329_v0 = vpop.f32.mrb[37].mxu0  ;;  %6358 = vmatmul.mubr.msk.bf16.vlgmr.msra.gmra.mrb[40].mxu0 %vm226_vm0, %v1696_v42  ;;  %v6829_v42 = vld [vmem:[#allocation14 + $0x68] ss:$16 sps:$4 sm:$0xff]  }
 0x778   :  { %6362 = vmatpush3.bf16.msra.mxu0 %v6806_v49  ;;  %v1643_v1 = vpop.f32.mrb[38].mxu0  ;;  %v6823_v49 = vld [vmem:[#allocation14 + $0x48] ss:$16 sps:$4 sm:$0xff]  }
 0x779   :  { %v1697_v47 = vpack.c.bf16 %v1643_v1, %v1640_v45  ;;  %v6330_v48 = vpop.f32.mrb[39].mxu0  ;;  %6363 = vmatprep.subr.bf16.mxu0 %v6807_v59  ;;  %v6832_v45 = vld [vmem:[#allocation14 + $0x80] ss:$16 sps:$4 sm:$0xff]   ;;  %v6835_v0 = vld [vmem:[#allocation14 + $0x88] ss:$16 sps:$4 sm:$0xff]  }
 0x77a   :  { %v1684_v63 = vpop.f32.mrb[36].mxu1  ;;  %v6840_v1 = vld [vmem:[#allocation14 + $0xa4] ss:$16 sps:$4 sm:$0xff]   ;;  %v6838_v48 = vld [vmem:[#allocation14 + $0xa0] ss:$16 sps:$4 sm:$0xff]  }
 0x77b   :  { %v6335_v50 = vpop.f32.mrb[37].mxu1  ;;  %6365 = vmatprep.mubr.msk.bf16.mxu0 %vm226_vm0, %v1697_v47  ;;  %v6843_v47 = vld [vmem:[#allocation14 + $0xac] ss:$16 sps:$4 sm:$0xff]  }
 0x77c   :  { %v1687_v5 = vpop.f32.mrb[38].mxu1  ;;  %6364 = vmatpush3.bf16.msra.mxu0 %v6807_v59  ;;  %v6837_v59 = vld [vmem:[#allocation14 + $0x8c] ss:$16 sps:$4 sm:$0xff]   ;;  %v6844_v50 = vld [vmem:[#allocation14 + $0xc0] ss:$16 sps:$4 sm:$0xff]  }
 0x77d   :  { %v1698_v8 = vpack.c.bf16 %v1687_v5, %v1684_v63  ;;  %v6336_v51 = vpop.f32.mrb[39].mxu1  ;;  %v6841_v63 = vld [vmem:[#allocation14 + $0xa8] ss:$16 sps:$4 sm:$0xff]   ;;  %v6846_v5 = vld [vmem:[#allocation14 + $0xc4] ss:$16 sps:$4 sm:$0xff]  }
 0x77e   :  { %v6849_v51 = vld [vmem:[#allocation14 + $0xcc] ss:$16 sps:$4 sm:$0xff]  }
 0x783   :  { %6366 = vmatmul.mubr.msk.bf16.vlgmr.msra.gmra.mrb[40].mxu0 %vm226_vm0, %v1698_v8  ;;  %v6847_v8 = vld [vmem:[#allocation14 + $0xc8] ss:$16 sps:$4 sm:$0xff]  }
 0x784   :  { %2377 = vmatprep.mubr.bf16.mxu0 %v7517_v58 }
 0x856   :  { %v6367_v25 = vpop.f32.mrb[40].mxu0 }
 0x857   :  { %v1968_v52 = vpop.f32.mrb[41].mxu0  ;;  %v1997_v60 = vadd.f32 %v6367_v25, %v7768_v15  ;;  %v6808_v15 = vld [vmem:[#allocation14] ss:$16 sps:$4 sm:$0xff]   ;;  %v6852_v25 = vld [vmem:[#allocation14 + $0xe4] ss:$16 sps:$4 sm:$0xff]  }
 0x858   :  { %v1995_v53 = vadd.f32 %v1968_v52, %v7770_v18  ;;  %v6368_v54 = vpop.f32.mrb[42].mxu0  ;;  %2293 = vmatpush1.bf16.msra.mxu1 %v6808_v15  ;;  %v6850_v52 = vld [vmem:[#allocation14 + $0xe0] ss:$16 sps:$4 sm:$0xff]  }
 0x859   :  { %v1971_v16 = vpop.f32.mrb[43].mxu0  ;;  %v8130_v7 = vadd.f32 %v5762_v56, %v1997_v60  ;;  %v1998_v10 = vadd.f32 %v6368_v54, %v7774_v21  ;;  %2294 = vmatprep.subr.bf16.mxu1 %v6816_v4  ;;  %v6817_v21 = vld [vmem:[#allocation14 + $0x28] ss:$16 sps:$4 sm:$0xff]  }
 0x85a   :  { %v8124_v26 = vadd.f32 %v5762_v56, %v1995_v53  ;;  %v1996_v57 = vadd.f32 %v1971_v16, %v7776_v22  ;;  %v6813_v22 = vld [vmem:[#allocation14 + $0xc] ss:$16 sps:$4 sm:$0xff]   ;;  %v6853_v53 = vld [vmem:[#allocation14 + $0xe8] ss:$16 sps:$4 sm:$0xff]  }
 0x85b   :  { %v8135_v18 = vadd.f32 %v5762_v56, %v1998_v10  ;;  %2345 = vmatprep.subr.bf16.mxu0 %v6813_v22 }
 0x85c   :  { %v8127_v61 = vadd.f32 %v5762_v56, %v1996_v57  ;;  %2012 = vadd.xlane.f32.xlu0 %v8124_v26  ;;  %2346 = vmatpush1.bf16.msra.mxu0 %v6811_v11  ;;  %v6855_v56 = vld [vmem:[#allocation14 + $0xec] ss:$16 sps:$4 sm:$0xff]  }
 0x85d   :  { %2347 = vmatprep.subr.bf16.mxu0 %v6819_v30  ;;  %2295 = vmatpush1.bf16.msra.mxu1 %v6814_v13 }
 0x85e   :  { %2014 = vadd.xlane.f32.xlu1 %v8127_v61  ;;  %2296 = vmatprep.subr.bf16.mxu1 %v6822_v62 }
 0x860   :  { %2016 = vadd.xlane.f32.xlu0 %v8130_v7  ;;  %2348 = vmatpush1.bf16.msra.mxu0 %v6817_v21 }
 0x861   :  { %2349 = vmatprep.subr.bf16.mxu0 %v6825_v6  ;;  %2297 = vmatpush1.bf16.msra.mxu1 %v6820_v40 }
 0x862   :  { %2298 = vmatprep.subr.bf16.mxu1 %v6828_v34 }
 0x864   :  { %2018 = vadd.xlane.f32.xlu0 %v8135_v18  ;;  %2350 = vmatpush1.bf16.msra.mxu0 %v6823_v49 }
 0x865   :  { %2351 = vmatprep.subr.bf16.mxu0 %v6831_v55  ;;  %2299 = vmatpush1.bf16.msra.mxu1 %v6826_v44  ;;  %v6856_v55 = vld [vmem:[#allocation16 + $0x40] sm:$0xff]  }
 0x866   :  { %2300 = vmatprep.subr.bf16.mxu1 %v6834_v14  ;;  %v6857_v44 = vld [vmem:[#allocation16 + $0xc0] sm:$0xff]   ;;  %v6861_v14 = vld [vmem:[#allocation16 + $0xc8] sm:$0xff]  }
 0x868   :  { %2352 = vmatpush1.bf16.msra.mxu0 %v6829_v42  ;;  %v6859_v42 = vld [vmem:[#allocation16 + $0x80] sm:$0xff]  }
 0x869   :  { %2353 = vmatprep.subr.bf16.mxu0 %v6837_v59  ;;  %2301 = vmatpush1.bf16.msra.mxu1 %v6832_v45  ;;  %v6862_v59 = vld [vmem:[#allocation16 + $0x8] sm:$0xff]  }
 0x86a   :  { %2302 = vmatprep.subr.bf16.mxu1 %v6840_v1  ;;  %v6863_v45 = vld [vmem:[#allocation16 + $0x88] sm:$0xff]   ;;  %v6865_v1 = vld [vmem:[#allocation16 + $0xd0] sm:$0xff]  }
 0x86c   :  { %2354 = vmatpush1.bf16.msra.mxu0 %v6835_v0  ;;  %v6864_v0 = vld [vmem:[#allocation16 + $0x50] sm:$0xff]  }
 0x86d   :  { %2355 = vmatprep.subr.bf16.mxu0 %v6843_v47  ;;  %2303 = vmatpush1.bf16.msra.mxu1 %v6838_v48  ;;  %v6866_v47 = vld [vmem:[#allocation16 + $0x10] sm:$0xff]  }
 0x86e   :  { %2304 = vmatprep.subr.bf16.mxu1 %v6846_v5  ;;  %v6867_v48 = vld [vmem:[#allocation16 + $0x90] sm:$0xff]   ;;  %v6870_v5 = vld [vmem:[#allocation16 + $0x18] sm:$0xff]  }
 0x870   :  { %2356 = vmatpush1.bf16.msra.mxu0 %v6841_v63  ;;  %v6868_v63 = vld [vmem:[#allocation16 + $0x58] sm:$0xff]  }
 0x871   :  { %2357 = vmatprep.subr.bf16.mxu0 %v6849_v51  ;;  %2305 = vmatpush1.bf16.msra.mxu1 %v6844_v50  ;;  %v6869_v50 = vld [vmem:[#allocation16 + $0xd8] sm:$0xff]   ;;  %v6872_v51 = vld [vmem:[#allocation16 + $0x60] sm:$0xff]  }
 0x872   :  { %2306 = vmatprep.subr.bf16.mxu1 %v6852_v25  ;;  %v6873_v25 = vld [vmem:[#allocation16 + $0xe0] sm:$0xff]  }
 0x874   :  { %2358 = vmatpush1.bf16.msra.mxu0 %v6847_v8  ;;  %v6871_v8 = vld [vmem:[#allocation16 + $0x98] sm:$0xff]  }
 0x875   :  { %2359 = vmatprep.subr.bf16.mxu0 %v6855_v56  ;;  %2307 = vmatpush1.bf16.msra.mxu1 %v6850_v52  ;;  %v6874_v56 = vld [vmem:[#allocation16 + $0x20] sm:$0xff]  }
 0x876   :  { %6034 = vmatprep.subr.bf16.mxu1 %v6856_v55  ;;  %v6875_v52 = vld [vmem:[#allocation16 + $0xa0] sm:$0xff]  }
 0x878   :  { %2360 = vmatpush1.bf16.msra.mxu0 %v6853_v53  ;;  %v6876_v53 = vld [vmem:[#allocation16 + $0x68] sm:$0xff]  }
 0x879   :  { %6062 = vmatprep.subr.bf16.mxu0 %v6857_v44 }
 0x8e9   :  { %v2013_v19 = vpop.xlane.xlu0 %2012 }
 0x8ea   :  { %v2020_v12 = vmul.f32 0.0078125, %v2013_v19  ;;  %v5763_v19 = vld [vmem:[%s8889_s10] ss:$0 sm:$0xff] }
 0x8eb   :  { %v2015_v17 = vpop.xlane.xlu1 %2014 }
 0x8ec   :  { %v8139_v46 = vsub.f32 %v8124_v26, %v2020_v12  ;;  %v2021_v28 = vmul.f32 0.0078125, %v2015_v17 }
 0x8ed   :  { %v2017_v20 = vpop.xlane.xlu0 %2016 }
 0x8ee   :  { %v8142_v23 = vsub.f32 %v8127_v61, %v2021_v28  ;;  %v2022_v24 = vmul.f32 0.0078125, %v2017_v20  ;;  %v2028_v27 = vmul.f32 %v8139_v46, %v8139_v46 }
 0x8f0   :  { %v8147_v29 = vsub.f32 %v8130_v7, %v2022_v24  ;;  %2032 = vadd.xlane.f32.xlu0 %v2028_v27  ;;  %v2029_v31 = vmul.f32 %v8142_v23, %v8142_v23  ;;  %v5764_v27 = vld [vmem:[%s8890_s11] ss:$0 sm:$0xff] }
 0x8f1   :  { %v2019_v32 = vpop.xlane.xlu0 %2018 }
 0x8f2   :  { %v2023_v33 = vmul.f32 0.0078125, %v2019_v32  ;;  %2034 = vadd.xlane.f32.xlu1 %v2029_v31  ;;  %v2030_v2 = vmul.f32 %v8147_v29, %v8147_v29 }
 0x8f4   :  { %v8154_v9 = vsub.f32 %v8135_v18, %v2023_v33  ;;  %2036 = vadd.xlane.f32.xlu0 %v2030_v2 }
 0x8f6   :  { %v2031_v35 = vmul.f32 %v8154_v9, %v8154_v9 }
 0x8f8   :  { %2038 = vadd.xlane.f32.xlu1 %v2031_v35 }
 0x97d   :  { %v2033_v54 = vpop.xlane.xlu0 %2032 }
 0x97e   :  { %v2040_v16 = vmul.f32 0.0078125, %v2033_v54  ;;  %v6877_v54 = vld [vmem:[#allocation16 + $0xe8] sm:$0xff]  }
 0x97f   :  { %v2035_v60 = vpop.xlane.xlu1 %2034 }
 0x980   :  { %v2044_v57 = vadd.f32 1e-05, %v2040_v16  ;;  %v2041_v10 = vmul.f32 0.0078125, %v2035_v60  ;;  %v6878_v16 = vld [vmem:[#allocation16 + $0x28] sm:$0xff]  }
 0x981   :  { %v2037_v15 = vpop.xlane.xlu0 %2036  ;;  %v6879_v60 = vld [vmem:[#allocation16 + $0xa8] sm:$0xff]  }
 0x982   :  { %7088 = vrsqrt.f32 %v2044_v57  ;;  %v2045_v3 = vadd.f32 1e-05, %v2041_v10  ;;  %v2042_v11 = vmul.f32 0.0078125, %v2037_v15  ;;  %v6880_v57 = vld [vmem:[#allocation16 + $0x70] sm:$0xff]  }
 0x983   :  { %v6881_v10 = vld [vmem:[#allocation16 + $0xf0] sm:$0xff]  }
 0x984   :  { %7090 = vrsqrt.f32 %v2045_v3  ;;  %v2046_v22 = vadd.f32 1e-05, %v2042_v11  ;;  %v6882_v15 = vld [vmem:[#allocation16 + $0x30] sm:$0xff]   ;;  %v6884_v11 = vld [vmem:[#allocation16 + $0x78] sm:$0xff]  }
 0x985   :  { %v2039_v4 = vpop.xlane.xlu1 %2038  ;;  %v6883_v3 = vld [vmem:[#allocation16 + $0xb0] sm:$0xff]  }
 0x986   :  { %7092 = vrsqrt.f32 %v2046_v22  ;;  %v2043_v30 = vmul.f32 0.0078125, %v2039_v4  ;;  %v6885_v22 = vld [vmem:[#allocation16 + $0xf8] sm:$0xff]  }
 0x987   :  { %v6886_v4 = vld [vmem:[#allocation16 + $0x38] sm:$0xff]  }
 0x988   :  { %v2047_v13 = vadd.f32 1e-05, %v2043_v30  ;;  %v6887_v30 = vld [vmem:[#allocation16 + $0xb8] sm:$0xff]  }
 0x98a   :  { %7094 = vrsqrt.f32 %v2047_v13  ;;  %v2110_v13 = vld [vmem:[%s8892_s13] sm:$0xf] }
 0x98c   :  { %v7089_v21 = vpop.eup %7088 }
 0x98d   :  { %v2052_v12 = vmul.f32 %v7089_v21, %v8139_v46  ;;  %v2126_v21 = vsub.s32 3, %v7816_v38 }
 0x98e   :  { %v7091_v17 = vpop.eup %7090 }
 0x98f   :  { %v2053_v28 = vmul.f32 %v7091_v17, %v8142_v23  ;;  %v2062_v20 = vmul.f32 %v5763_v19, %v2052_v12  ;;  %v8178_v12 = vrot.slane %v2110_v13, %v7829_v43  ;;  %v8181_v17 = vrot.slane %v2110_v13, %v7825_v41 }
 0x990   :  { %v7093_v24 = vpop.eup %7092 }
 0x991   :  { %v2063_v31 = vmul.f32 %v5763_v19, %v2053_v28  ;;  %v2072_v32 = vadd.f32 %v5764_v27, %v2062_v20  ;;  %v2054_v2 = vmul.f32 %v7093_v24, %v8147_v29  ;;  %v6858_v29 = vld [vmem:[#allocation16] sm:$0xff]   ;;  %v8185_v28 = vrot.slane %v2110_v13, %v2126_v21 }
 0x993   :  { %v2073_v33 = vadd.f32 %v5764_v27, %v2063_v31  ;;  %v2064_v46 = vmul.f32 %v5763_v19, %v2054_v2 }
 0x994   :  { %v7095_v35 = vpop.eup %7094 }
 0x995   :  { %v2076_v62 = vpack.c.bf16 %v2073_v33, %v2072_v32  ;;  %v2055_v6 = vmul.f32 %v7095_v35, %v8154_v9  ;;  %v2074_v49 = vadd.f32 %v5764_v27, %v2064_v46  ;;  %v6860_v9 = vld [vmem:[#allocation16 + $0x48] sm:$0xff]  }
 0x997   :  { %2325 = vmatmul.mubr.bf16.vlgmr.msra.gmra.mrb[40].mxu1 %v2076_v62  ;;  %2378 = vmatmul.mubr.bf16.vlgmr.msra.gmra.mrb[44].mxu0 %v2076_v62  ;;  %v2065_v40 = vmul.f32 %v5763_v19, %v2055_v6  ;;  %v8175_v19 = vrot.slane %v2110_v13, %v7819_v39 }
 0x998   :  { %2334 = vmatprep.mubr.bf16.mxu1 %v7517_v58  ;;  %2387 = vmatprep.mubr.bf16.mxu0 %v7517_v58 }
 0x999   :  { %v2075_v23 = vadd.f32 %v5764_v27, %v2065_v40  ;;  %6035 = vmatpush3.bf16.msra.mxu1 %v6858_v29  ;;  %6063 = vmatpush3.bf16.msra.mxu0 %v6859_v42 }
 0x99a   :  { %6036 = vmatprep.subr.bf16.mxu1 %v6860_v9  ;;  %6064 = vmatprep.subr.bf16.mxu0 %v6861_v14 }
 0x99b   :  { %v2077_v34 = vpack.c.bf16 %v2075_v23, %v2074_v49 }
 0x99d   :  { %6037 = vmatpush3.bf16.msra.mxu1 %v6862_v59  ;;  %6065 = vmatpush3.bf16.msra.mxu0 %v6863_v45 }
 0x99e   :  { %6038 = vmatprep.subr.bf16.mxu1 %v6864_v0  ;;  %6066 = vmatprep.subr.bf16.mxu0 %v6865_v1 }
 0x99f   :  { %2335 = vmatmul.mubr.bf16.gmra.mrb[44].mxu1 %v2077_v34  ;;  %2388 = vmatmul.mubr.bf16.gmra.mrb[48].mxu0 %v2077_v34 }
 0x9a1   :  { %6039 = vmatpush3.bf16.msra.mxu1 %v6866_v47  ;;  %6067 = vmatpush3.bf16.msra.mxu0 %v6867_v48 }
 0x9a2   :  { %6040 = vmatprep.subr.bf16.mxu1 %v6868_v63  ;;  %6068 = vmatprep.subr.bf16.mxu0 %v6869_v50 }
 0x9a5   :  { %6041 = vmatpush3.bf16.msra.mxu1 %v6870_v5  ;;  %6069 = vmatpush3.bf16.msra.mxu0 %v6871_v8 }
 0x9a6   :  { %6042 = vmatprep.subr.bf16.mxu1 %v6872_v51  ;;  %6070 = vmatprep.subr.bf16.mxu0 %v6873_v25 }
 0x9a9   :  { %6043 = vmatpush3.bf16.msra.mxu1 %v6874_v56  ;;  %6071 = vmatpush3.bf16.msra.mxu0 %v6875_v52 }
 0x9aa   :  { %6044 = vmatprep.subr.bf16.mxu1 %v6876_v53  ;;  %6072 = vmatprep.subr.bf16.mxu0 %v6877_v54 }
 0x9ad   :  { %6045 = vmatpush3.bf16.msra.mxu1 %v6878_v16  ;;  %6073 = vmatpush3.bf16.msra.mxu0 %v6879_v60 }
 0x9ae   :  { %6046 = vmatprep.subr.bf16.mxu1 %v6880_v57  ;;  %6074 = vmatprep.subr.bf16.mxu0 %v6881_v10 }
 0x9b1   :  { %6047 = vmatpush3.bf16.msra.mxu1 %v6882_v15  ;;  %6075 = vmatpush3.bf16.msra.mxu0 %v6883_v3 }
 0x9b2   :  { %6048 = vmatprep.subr.bf16.mxu1 %v6884_v11  ;;  %6076 = vmatprep.subr.bf16.mxu0 %v6885_v22 }
 0x9b5   :  { %6049 = vmatpush3.bf16.msra.mxu1 %v6886_v4  ;;  %6077 = vmatpush3.bf16.msra.mxu0 %v6887_v30 }
 0xa6a   :  { %v2326_v20 = vpop.f32.mrb[40].mxu1  ;;  %v2379_v24 = vpop.f32.mrb[44].mxu0 }
 0xa6b   :  { %v8188_v27 = vadd.f32 %v2326_v20, %v8175_v19  ;;  %v8191_v31 = vadd.f32 %v2379_v24, %v8178_v12  ;;  %v2328_v32 = vpop.f32.mrb[41].mxu1  ;;  %v2381_v33 = vpop.f32.mrb[45].mxu0 }
 0xa6c   :  { %v8194_v2 = vadd.f32 %v2328_v32, %v8181_v17  ;;  %v8197_v35 = vadd.f32 %v2381_v33, %v8185_v28  ;;  %v2330_v62 = vpop.f32.mrb[42].mxu1  ;;  %v2383_v6 = vpop.f32.mrb[46].mxu0 }
 0xa6d   :  { %v2398_v46 = vmul.f32 %v8188_v27, %v8188_v27  ;;  %v2400_v40 = vmul.f32 %v8191_v31, %v8191_v31  ;;  %v8204_v23 = vadd.f32 %v2330_v62, %v8175_v19  ;;  %v8207_v49 = vadd.f32 %v2383_v6, %v8178_v12  ;;  %v2332_v34 = vpop.f32.mrb[43].mxu1  ;;  %v2385_v55 = vpop.f32.mrb[47].mxu0 }
 0xa6e   :  { %v2399_v44 = vmul.f32 %v8194_v2, %v8194_v2  ;;  %v2401_v29 = vmul.f32 %v8197_v35, %v8197_v35  ;;  %v8214_v42 = vadd.f32 %v2332_v34, %v8181_v17  ;;  %v8217_v9 = vadd.f32 %v2385_v55, %v8185_v28 }
 0xa6f   :  { %v2414_v14 = vmul.f32 %v2398_v46, %v8188_v27  ;;  %v2416_v59 = vmul.f32 %v2400_v40, %v8191_v31  ;;  %v2402_v45 = vmul.f32 %v8204_v23, %v8204_v23  ;;  %v2404_v0 = vmul.f32 %v8207_v49, %v8207_v49 }
 0xa70   :  { %v2415_v1 = vmul.f32 %v2399_v44, %v8194_v2  ;;  %v2417_v47 = vmul.f32 %v2401_v29, %v8197_v35  ;;  %v2403_v48 = vmul.f32 %v8214_v42, %v8214_v42  ;;  %v2405_v63 = vmul.f32 %v8217_v9, %v8217_v9 }
 0xa71   :  { %v2430_v50 = vmul.f32 0.044715, %v2414_v14  ;;  %v2432_v5 = vmul.f32 0.044715, %v2416_v59  ;;  %v2418_v8 = vmul.f32 %v2402_v45, %v8204_v23  ;;  %v2420_v51 = vmul.f32 %v2404_v0, %v8207_v49 }
 0xa72   :  { %v2431_v25 = vmul.f32 0.044715, %v2415_v1  ;;  %v2433_v56 = vmul.f32 0.044715, %v2417_v47  ;;  %v2419_v52 = vmul.f32 %v2403_v48, %v8214_v42  ;;  %v2421_v53 = vmul.f32 %v2405_v63, %v8217_v9  ;;  %v2336_v54 = vpop.f32.mrb[44].mxu1  ;;  %v2389_v16 = vpop.f32.mrb[48].mxu0 }
 0xa73   :  { %v2446_v60 = vadd.f32 %v2430_v50, %v8188_v27  ;;  %v2448_v57 = vadd.f32 %v2432_v5, %v8191_v31  ;;  %v2434_v10 = vmul.f32 0.044715, %v2418_v8  ;;  %v2436_v15 = vmul.f32 0.044715, %v2420_v51  ;;  %v2338_v3 = vpop.f32.mrb[45].mxu1  ;;  %v2391_v11 = vpop.f32.mrb[49].mxu0 }
 0xa74   :  { %v2447_v22 = vadd.f32 %v2431_v25, %v8194_v2  ;;  %v2449_v4 = vadd.f32 %v2433_v56, %v8197_v35  ;;  %v2435_v30 = vmul.f32 0.044715, %v2419_v52  ;;  %v2437_v13 = vmul.f32 0.044715, %v2421_v53  ;;  %v2340_v20 = vpop.f32.mrb[46].mxu1  ;;  %v2393_v24 = vpop.f32.mrb[50].mxu0 }
 0xa75   :  { %v2462_v32 = vmul.f32 0.7978846, %v2446_v60  ;;  %v2464_v33 = vmul.f32 0.7978846, %v2448_v57  ;;  %v2450_v62 = vadd.f32 %v2434_v10, %v8204_v23  ;;  %v2452_v6 = vadd.f32 %v2436_v15, %v8207_v49  ;;  %v2342_v46 = vpop.f32.mrb[47].mxu1  ;;  %v2395_v40 = vpop.f32.mrb[51].mxu0 }
 0xa76   :  { %v2463_v34 = vmul.f32 0.7978846, %v2447_v22  ;;  %v2465_v55 = vmul.f32 0.7978846, %v2449_v4  ;;  %v2451_v44 = vadd.f32 %v2435_v30, %v8214_v42  ;;  %v2453_v29 = vadd.f32 %v2437_v13, %v8217_v9 }
 0xa77   :  { %7096 = vtanh.f32 %v2462_v32  ;;  %v2466_v14 = vmul.f32 0.7978846, %v2450_v62  ;;  %v2468_v59 = vmul.f32 0.7978846, %v2452_v6  ;;  %v8244_v45 = vadd.f32 %v2336_v54, %v8175_v19 }
 0xa78   :  { %7098 = vtanh.f32 %v2464_v33  ;;  %v2467_v0 = vmul.f32 0.7978846, %v2451_v44  ;;  %v2469_v1 = vmul.f32 0.7978846, %v2453_v29  ;;  %v8247_v47 = vadd.f32 %v2389_v16, %v8178_v12 }
 0xa79   :  { %7100 = vtanh.f32 %v2463_v34  ;;  %v2406_v48 = vmul.f32 %v8244_v45, %v8244_v45  ;;  %v8252_v63 = vadd.f32 %v2338_v3, %v8181_v17  ;;  %v8255_v50 = vadd.f32 %v2391_v11, %v8185_v28 }
 0xa7a   :  { %7102 = vtanh.f32 %v2465_v55  ;;  %v2408_v5 = vmul.f32 %v8247_v47, %v8247_v47  ;;  %v8260_v8 = vadd.f32 %v2340_v20, %v8175_v19  ;;  %v8263_v51 = vadd.f32 %v2393_v24, %v8178_v12 }
 0xa7b   :  { %7104 = vtanh.f32 %v2466_v14  ;;  %v2422_v25 = vmul.f32 %v2406_v48, %v8244_v45  ;;  %v2407_v56 = vmul.f32 %v8252_v63, %v8252_v63  ;;  %v2409_v52 = vmul.f32 %v8255_v50, %v8255_v50 }
 0xa7c   :  { %7106 = vtanh.f32 %v2468_v59  ;;  %v2424_v53 = vmul.f32 %v2408_v5, %v8247_v47  ;;  %v2410_v54 = vmul.f32 %v8260_v8, %v8260_v8  ;;  %v2412_v19 = vmul.f32 %v8263_v51, %v8263_v51 }
 0xa7d   :  { %7108 = vtanh.f32 %v2467_v0  ;;  %v2438_v12 = vmul.f32 0.044715, %v2422_v25  ;;  %v2423_v16 = vmul.f32 %v2407_v56, %v8252_v63  ;;  %v2425_v60 = vmul.f32 %v2409_v52, %v8255_v50 }
 0xa7e   :  { %7110 = vtanh.f32 %v2469_v1  ;;  %v2440_v57 = vmul.f32 0.044715, %v2424_v53  ;;  %v2426_v10 = vmul.f32 %v2410_v54, %v8260_v8  ;;  %v2428_v15 = vmul.f32 %v2412_v19, %v8263_v51 }
 0xa7f   :  { %v2454_v3 = vadd.f32 %v2438_v12, %v8244_v45  ;;  %v2439_v11 = vmul.f32 0.044715, %v2423_v16  ;;  %v2441_v22 = vmul.f32 0.044715, %v2425_v60  ;;  %v8281_v4 = vadd.f32 %v2342_v46, %v8181_v17 }
 0xa80   :  { %v2456_v30 = vadd.f32 %v2440_v57, %v8247_v47  ;;  %v2442_v13 = vmul.f32 0.044715, %v2426_v10  ;;  %v2444_v20 = vmul.f32 0.044715, %v2428_v15  ;;  %v8285_v24 = vadd.f32 %v2395_v40, %v8185_v28 }
 0xa81   :  { %v7097_v32 = vpop.eup %7096  ;;  %v2470_v33 = vmul.f32 0.7978846, %v2454_v3  ;;  %v2455_v62 = vadd.f32 %v2439_v11, %v8252_v63  ;;  %v2457_v6 = vadd.f32 %v2441_v22, %v8255_v50  ;;  %v2411_v34 = vmul.f32 %v8281_v4, %v8281_v4 }
 0xa82   :  { %v7099_v55 = vpop.eup %7098  ;;  %v2494_v44 = vadd.f32 1.0, %v7097_v32  ;;  %v2472_v17 = vmul.f32 0.7978846, %v2456_v30  ;;  %v2458_v46 = vadd.f32 %v2442_v13, %v8260_v8  ;;  %v2460_v29 = vadd.f32 %v2444_v20, %v8263_v51 }
 0xa83   :  { %v7101_v14 = vpop.eup %7100  ;;  %v2496_v59 = vadd.f32 1.0, %v7099_v55  ;;  %7112 = vtanh.f32 %v2470_v33  ;;  %v2471_v28 = vmul.f32 0.7978846, %v2455_v62  ;;  %v2473_v40 = vmul.f32 0.7978846, %v2457_v6 }
 0xa84   :  { %v7103_v0 = vpop.eup %7102  ;;  %v2510_v1 = vmul.f32 0.5, %v2494_v44  ;;  %7114 = vtanh.f32 %v2472_v17  ;;  %v2474_v48 = vmul.f32 0.7978846, %v2458_v46  ;;  %v2476_v5 = vmul.f32 0.7978846, %v2460_v29 }
 0xa85   :  { %v7105_v25 = vpop.eup %7104  ;;  %v2512_v56 = vmul.f32 0.5, %v2496_v59  ;;  %7116 = vtanh.f32 %v2471_v28  ;;  %v2427_v52 = vmul.f32 %v2411_v34, %v8281_v4  ;;  %v2413_v53 = vmul.f32 %v8285_v24, %v8285_v24 }
 0xa86   :  { %v7107_v54 = vpop.eup %7106  ;;  %v2526_v19 = vmul.f32 %v2510_v1, %v8188_v27  ;;  %v2498_v12 = vadd.f32 1.0, %v7105_v25  ;;  %7118 = vtanh.f32 %v2473_v40  ;;  %v2495_v16 = vadd.f32 1.0, %v7101_v14 }
 0xa87   :  { %v7109_v60 = vpop.eup %7108  ;;  %v2528_v57 = vmul.f32 %v2512_v56, %v8191_v31  ;;  %v2500_v10 = vadd.f32 1.0, %v7107_v54  ;;  %7120 = vtanh.f32 %v2474_v48  ;;  %v2443_v15 = vmul.f32 0.044715, %v2427_v52 }
 0xa88   :  { %v7111_v3 = vpop.eup %7110  ;;  %v2514_v11 = vmul.f32 0.5, %v2498_v12  ;;  %7122 = vtanh.f32 %v2476_v5  ;;  %v2429_v22 = vmul.f32 %v2413_v53, %v8285_v24  ;;  %v2499_v30 = vadd.f32 1.0, %v7109_v60 }
 0xa89   :  { %v2516_v13 = vmul.f32 0.5, %v2500_v10  ;;  %v2459_v20 = vadd.f32 %v2443_v15, %v8281_v4  ;;  %v2511_v32 = vmul.f32 0.5, %v2495_v16  ;;  %v2497_v27 = vadd.f32 1.0, %v7103_v0 }
 0xa8a   :  { %v2530_v33 = vmul.f32 %v2514_v11, %v8204_v23  ;;  %v2445_v62 = vmul.f32 0.044715, %v2429_v22  ;;  %v2515_v6 = vmul.f32 0.5, %v2499_v30  ;;  %v2501_v34 = vadd.f32 1.0, %v7111_v3 }
 0xa8b   :  { %v2532_v31 = vmul.f32 %v2516_v13, %v8207_v49  ;;  %v2475_v55 = vmul.f32 0.7978846, %v2459_v20  ;;  %v2527_v44 = vmul.f32 %v2511_v32, %v8194_v2  ;;  %v2513_v17 = vmul.f32 0.5, %v2497_v27 }
 0xa8c   :  { %v2542_v46 = vpack.c.bf16 %v2530_v33, %v2526_v19  ;;  %v2461_v29 = vadd.f32 %v2445_v62, %v8285_v24  ;;  %v2531_v14 = vmul.f32 %v2515_v6, %v8214_v42  ;;  %v2517_v59 = vmul.f32 0.5, %v2501_v34 }
 0xa8d   :  { %v7113_v28 = vpop.eup %7112  ;;  %v2544_v40 = vpack.c.bf16 %v2532_v31, %v2528_v57  ;;  %7124 = vtanh.f32 %v2475_v55  ;;  %v2529_v23 = vmul.f32 %v2513_v17, %v8197_v35 }
 0xa8e   :  { %v7115_v0 = vpop.eup %7114  ;;  %v2477_v1 = vmul.f32 0.7978846, %v2461_v29  ;;  %v2543_v48 = vpack.c.bf16 %v2531_v14, %v2527_v44  ;;  %v2533_v49 = vmul.f32 %v2517_v59, %v8217_v9  ;;  %v2502_v5 = vadd.f32 1.0, %v7113_v28 }
 0xa8f   :  { %v7117_v25 = vpop.eup %7116  ;;  %v2504_v2 = vadd.f32 1.0, %v7115_v0 }
 0xa90   :  { %v7119_v56 = vpop.eup %7118  ;;  %7126 = vtanh.f32 %v2477_v1  ;;  %2845 = vmatprep.mubr.bf16.mxu1 %v2543_v48  ;;  %v2545_v52 = vpack.c.bf16 %v2533_v49, %v2529_v23  ;;  %v2518_v19 = vmul.f32 0.5, %v2502_v5  ;;  %v2503_v16 = vadd.f32 1.0, %v7117_v25 }
 0xa91   :  { %v7121_v53 = vpop.eup %7120  ;;  %2846 = vmatmul.mubr.bf16.vlgmr.msra.gmra.mrb[48].mxu1 %v2542_v46  ;;  %v2520_v12 = vmul.f32 0.5, %v2504_v2  ;;  %v2505_v3 = vadd.f32 1.0, %v7119_v56 }
 0xa92   :  { %v7123_v42 = vpop.eup %7122  ;;  %2894 = vmatprep.mubr.bf16.mxu0 %v2545_v52  ;;  %v2506_v54 = vadd.f32 1.0, %v7121_v53  ;;  %v2534_v9 = vmul.f32 %v2518_v19, %v8244_v45  ;;  %v2519_v13 = vmul.f32 0.5, %v2503_v16 }
 0xa93   :  { %2895 = vmatmul.mubr.bf16.vlgmr.msra.gmra.mrb[52].mxu0 %v2544_v40  ;;  %v2508_v35 = vadd.f32 1.0, %v7123_v42  ;;  %v2536_v11 = vmul.f32 %v2520_v12, %v8247_v47  ;;  %v2521_v6 = vmul.f32 0.5, %v2505_v3 }
 0xa94   :  { %v2522_v60 = vmul.f32 0.5, %v2506_v54  ;;  %v2535_v34 = vmul.f32 %v2519_v13, %v8252_v63  ;;  %v5797_v63 = vld [vmem:[%s8894_s15] ss:$0 sm:$0xff]  ;;  %v6891_v13 = vld [vmem:[#allocation11 + $0xd8] ss:$12 sps:$4 sm:$0xff]  }
 0xa95   :  { %v2524_v57 = vmul.f32 0.5, %v2508_v35  ;;  %v2537_v55 = vmul.f32 %v2521_v6, %v8255_v50 }
 0xa96   :  { %v2538_v10 = vmul.f32 %v2522_v60, %v8260_v8 }
 0xa97   :  { %v7125_v15 = vpop.eup %7124  ;;  %v2540_v22 = vmul.f32 %v2524_v57, %v8263_v51 }
 0xa98   :  { %v2507_v30 = vadd.f32 1.0, %v7125_v15  ;;  %v2546_v20 = vpack.c.bf16 %v2538_v10, %v2534_v9 }
 0xa99   :  { %v2548_v32 = vpack.c.bf16 %v2540_v22, %v2536_v11  ;;  %v6888_v11 = vld [vmem:[#allocation11 + $0xc0] ss:$12 sps:$4 sm:$0xff]   ;;  %v6890_v22 = vld [vmem:[#allocation11 + $0xc4] ss:$12 sps:$4 sm:$0xff]  }
 0xa9a   :  { %v7127_v27 = vpop.eup %7126  ;;  %v2523_v33 = vmul.f32 0.5, %v2507_v30  ;;  %v6893_v30 = vld [vmem:[#allocation11 + $0xdc] ss:$12 sps:$4 sm:$0xff]   ;;  %3164 = vmatprep.subr.bf16.mxu1 %v6890_v22 }
 0xa9b   :  { %v2509_v62 = vadd.f32 1.0, %v7127_v27  ;;  %3165 = vmatpush1.bf16.msra.mxu1 %v6888_v11 }
 0xa9c   :  { %v2539_v45 = vmul.f32 %v2523_v33, %v8281_v4  ;;  %3166 = vmatprep.subr.bf16.mxu1 %v6893_v30 }
 0xa9d   :  { %v2525_v31 = vmul.f32 0.5, %v2509_v62 }
 0xa9e   :  { %v2547_v8 = vpack.c.bf16 %v2539_v45, %v2535_v34 }
 0xa9f   :  { %v2541_v47 = vmul.f32 %v2525_v31, %v8285_v24  ;;  %3167 = vmatpush1.bf16.msra.mxu1 %v6891_v13  ;;  %v5832_v13 = vld [vmem:[%s8884_s5 + $0x1] ss:$0 sm:$0xff] }
 0xaa0   :  { %2853 = vmatprep.mubr.bf16.mxu1 %v2547_v8 }
 0xaa1   :  { %v2549_v51 = vpack.c.bf16 %v2541_v47, %v2537_v55  ;;  %2854 = vmatmul.mubr.bf16.gmra.mrb[52].mxu1 %v2546_v20 }
 0xaa2   :  { %3196 = vmatprep.mubr.bf16.mxu1 %v7517_v58 }
 0xaa3   :  { %2902 = vmatprep.mubr.bf16.mxu0 %v2549_v51 }
 0xaa4   :  { %2903 = vmatmul.mubr.bf16.gmra.mrb[56].mxu0 %v2548_v32 }
 0xb64   :  { %v6050_v44 = vpop.f32.mrb[48].mxu1 }
 0xb65   :  { %v6051_v17 = vpop.f32.mrb[49].mxu1 }
 0xb66   :  { %v6078_v4 = vpop.f32.mrb[52].mxu0  ;;  %v6052_v46 = vadd.f32 %v6051_v17, %v6050_v44  ;;  %v6053_v29 = vpop.f32.mrb[50].mxu1  ;;  %v6897_v17 = vld [vmem:[#allocation11 + $0xc8] ss:$12 sps:$4 sm:$0xff]  }
 0xb67   :  { %v6079_v14 = vpop.f32.mrb[53].mxu0  ;;  %v6054_v50 = vpop.f32.mrb[51].mxu1  ;;  %6369 = vmatprep.subr.bf16.mxu0 %v6897_v17 }
 0xb68   :  { %v2848_v59 = vadd.f32 %v6052_v46, %v5797_v63  ;;  %v6080_v24 = vadd.f32 %v6079_v14, %v6078_v4  ;;  %v6081_v28 = vpop.f32.mrb[54].mxu0  ;;  %v6055_v40 = vadd.f32 %v6054_v50, %v6053_v29  ;;  %v6894_v4 = vld [vmem:[#allocation11 + $0xf0] ss:$12 sps:$4 sm:$0xff]   ;;  %6370 = vmatpush3.bf16.msra.mxu0 %v6897_v17  ;;  %v6900_v46 = vld [vmem:[#allocation11 + $0x10c] ss:$12 sps:$4 sm:$0xff]  }
 0xb69   :  { %v6082_v23 = vpop.f32.mrb[55].mxu0  ;;  %v6901_v29 = vld [vmem:[#allocation11 + $0xe0] ss:$12 sps:$4 sm:$0xff]   ;;  %v6898_v14 = vld [vmem:[#allocation11 + $0x108] ss:$12 sps:$4 sm:$0xff]  }
 0xb6a   :  { %v2897_v0 = vadd.f32 %v6080_v24, %v2848_v59  ;;  %v2851_v1 = vadd.f32 %v6055_v40, %v5797_v63  ;;  %v6083_v48 = vadd.f32 %v6082_v23, %v6081_v28  ;;  %6371 = vmatprep.subr.bf16.mxu0 %v6901_v29  ;;  %v6904_v50 = vld [vmem:[#allocation11 + $0x124] ss:$12 sps:$4 sm:$0xff]   ;;  %v6902_v24 = vld [vmem:[#allocation11 + $0x120] ss:$12 sps:$4 sm:$0xff]   ;;  %v6908_v28 = vld [vmem:[#allocation11 + $0x13c] ss:$12 sps:$4 sm:$0xff]  }
 0xb6b   :  { %v6905_v59 = vld [vmem:[#allocation11 + $0xf8] ss:$12 sps:$4 sm:$0xff]   ;;  %v6909_v40 = vld [vmem:[#allocation11 + $0x110] ss:$12 sps:$4 sm:$0xff]  }
 0xb6c   :  { %v2900_v49 = vadd.f32 %v6083_v48, %v2851_v1  ;;  %v8320_v5 = vadd.f32 %v2897_v0, %v8124_v26  ;;  %6372 = vmatpush3.bf16.msra.mxu0 %v6901_v29  ;;  %v6906_v23 = vld [vmem:[#allocation11 + $0x138] ss:$12 sps:$4 sm:$0xff]   ;;  %v6912_v0 = vld [vmem:[#allocation11 + $0x154] ss:$12 sps:$4 sm:$0xff]   ;;  %v6910_v48 = vld [vmem:[#allocation11 + $0x150] ss:$12 sps:$4 sm:$0xff]  }
 0xb6d   :  { %6373 = vmatprep.subr.bf16.mxu0 %v6905_v59  ;;  %v6913_v1 = vld [vmem:[#allocation11 + $0x128] ss:$12 sps:$4 sm:$0xff]  }
 0xb6e   :  { %2919 = vadd.xlane.f32.xlu0 %v8320_v5  ;;  %v8324_v25 = vadd.f32 %v2900_v49, %v8127_v61  ;;  %v6916_v49 = vld [vmem:[#allocation11 + $0x16c] ss:$12 sps:$4 sm:$0xff]  }
 0xb70   :  { %2921 = vadd.xlane.f32.xlu1 %v8324_v25  ;;  %6374 = vmatpush3.bf16.msra.mxu0 %v6905_v59 }
 0xb71   :  { %6375 = vmatprep.subr.bf16.mxu0 %v6909_v40 }
 0xb74   :  { %v6056_v2 = vpop.f32.mrb[52].mxu1  ;;  %6376 = vmatpush3.bf16.msra.mxu0 %v6909_v40 }
 0xb75   :  { %v6057_v56 = vpop.f32.mrb[53].mxu1  ;;  %6377 = vmatprep.subr.bf16.mxu0 %v6913_v1 }
 0xb76   :  { %v6058_v52 = vadd.f32 %v6057_v56, %v6056_v2  ;;  %v6059_v53 = vpop.f32.mrb[54].mxu1  ;;  %v6917_v2 = vld [vmem:[#allocation11 + $0x140] ss:$12 sps:$4 sm:$0xff]   ;;  %v6914_v56 = vld [vmem:[#allocation11 + $0x168] ss:$12 sps:$4 sm:$0xff]  }
 0xb77   :  { %v6084_v42 = vpop.f32.mrb[56].mxu0  ;;  %v6060_v54 = vpop.f32.mrb[55].mxu1 }
 0xb78   :  { %v2856_v19 = vadd.f32 %v6058_v52, %v5797_v63  ;;  %v6085_v35 = vpop.f32.mrb[57].mxu0  ;;  %v6061_v12 = vadd.f32 %v6060_v54, %v6059_v53  ;;  %6378 = vmatpush3.bf16.msra.mxu0 %v6913_v1  ;;  %v6918_v52 = vld [vmem:[#allocation11 + $0x158] ss:$12 sps:$4 sm:$0xff]   ;;  %v6919_v53 = vld [vmem:[#allocation11 + $0x170] ss:$12 sps:$4 sm:$0xff]  }
 0xb79   :  { %v6086_v16 = vadd.f32 %v6085_v35, %v6084_v42  ;;  %v6087_v60 = vpop.f32.mrb[58].mxu0  ;;  %6379 = vmatprep.subr.bf16.mxu0 %v6917_v2 }
 0xb7a   :  { %v2859_v26 = vadd.f32 %v6061_v12, %v5797_v63  ;;  %v6088_v57 = vpop.f32.mrb[59].mxu0  ;;  %v6896_v63 = vld [vmem:[#allocation11 + $0xf4] ss:$12 sps:$4 sm:$0xff]  }
 0xb7b   :  { %v2905_v9 = vadd.f32 %v6086_v16, %v2856_v19  ;;  %v6089_v10 = vadd.f32 %v6088_v57, %v6087_v60  ;;  %3168 = vmatprep.subr.bf16.mxu1 %v6896_v63 }
 0xb7c   :  { %3169 = vmatpush1.bf16.msra.mxu1 %v6894_v4  ;;  %6380 = vmatpush3.bf16.msra.mxu0 %v6917_v2 }
 0xb7d   :  { %v2908_v15 = vadd.f32 %v6089_v10, %v2859_v26  ;;  %v8328_v61 = vadd.f32 %v2905_v9, %v8130_v7  ;;  %3170 = vmatprep.subr.bf16.mxu1 %v6900_v46  ;;  %6381 = vmatprep.subr.bf16.mxu0 %v6918_v52  ;;  %v5831_v26 = vld [vmem:[#allocation10 + $0x1] ss:$0 sm:$0xff] }
 0xb7f   :  { %2923 = vadd.xlane.f32.xlu0 %v8328_v61  ;;  %v8332_v3 = vadd.f32 %v2908_v15, %v8135_v18 }
 0xb80   :  { %3171 = vmatpush1.bf16.msra.mxu1 %v6898_v14  ;;  %6382 = vmatpush3.bf16.msra.mxu0 %v6918_v52 }
 0xb81   :  { %2925 = vadd.xlane.f32.xlu1 %v8332_v3  ;;  %3172 = vmatprep.subr.bf16.mxu1 %v6904_v50 }
 0xb82   :  { %6383 = vmatprep.subr.bf16.mxu0 %v6919_v53 }
 0xb84   :  { %3173 = vmatpush1.bf16.msra.mxu1 %v6902_v24  ;;  %6384 = vmatpush3.bf16.msra.mxu0 %v6919_v53 }
 0xb85   :  { %3174 = vmatprep.subr.bf16.mxu1 %v6908_v28  ;;  %6407 = vmatprep.subr.bf16.mxu0 %v7518_v36 }
 0xb88   :  { %3175 = vmatpush1.bf16.msra.mxu1 %v6906_v23 }
 0xb89   :  { %3176 = vmatprep.subr.bf16.mxu1 %v6912_v0 }
 0xb8c   :  { %3177 = vmatpush1.bf16.msra.mxu1 %v6910_v48 }
 0xb8d   :  { %3178 = vmatprep.subr.bf16.mxu1 %v6916_v49 }
 0xb90   :  { %3179 = vmatpush1.bf16.msra.mxu1 %v6914_v56 }
 0xb91   :  { %6389 = vmatprep.subr.bf16.mxu1 %v7518_v36 }
 0xbfb   :  { %v2920_v20 = vpop.xlane.xlu0 %2919 }
 0xbfc   :  { %v2927_v32 = vmul.f32 0.0078125, %v2920_v20 }
 0xbfd   :  { %v2922_v27 = vpop.xlane.xlu1 %2921 }
 0xbfe   :  { %v8336_v7 = vsub.f32 %v8320_v5, %v2927_v32  ;;  %v2928_v33 = vmul.f32 0.0078125, %v2922_v27 }
 0xc00   :  { %v8339_v18 = vsub.f32 %v8324_v25, %v2928_v33  ;;  %v2935_v62 = vmul.f32 %v8336_v7, %v8336_v7 }
 0xc02   :  { %2939 = vadd.xlane.f32.xlu0 %v2935_v62  ;;  %v2936_v6 = vmul.f32 %v8339_v18, %v8339_v18 }
 0xc04   :  { %2941 = vadd.xlane.f32.xlu1 %v2936_v6 }
 0xc0c   :  { %v2924_v34 = vpop.xlane.xlu0 %2923 }
 0xc0d   :  { %v2929_v45 = vmul.f32 0.0078125, %v2924_v34 }
 0xc0e   :  { %v2926_v31 = vpop.xlane.xlu1 %2925 }
 0xc0f   :  { %v8346_v8 = vsub.f32 %v8328_v61, %v2929_v45  ;;  %v2930_v55 = vmul.f32 0.0078125, %v2926_v31 }
 0xc11   :  { %v8349_v47 = vsub.f32 %v8332_v3, %v2930_v55  ;;  %v2937_v51 = vmul.f32 %v8346_v8, %v8346_v8 }
 0xc13   :  { %2943 = vadd.xlane.f32.xlu0 %v2937_v51  ;;  %v2938_v44 = vmul.f32 %v8349_v47, %v8349_v47 }
 0xc15   :  { %2945 = vadd.xlane.f32.xlu1 %v2938_v44 }
 0xc8f   :  { %v2940_v42 = vpop.xlane.xlu0 %2939 }
 0xc90   :  { %v2947_v54 = vmul.f32 0.0078125, %v2940_v42 }
 0xc91   :  { %v2942_v19 = vpop.xlane.xlu1 %2941 }
 0xc92   :  { %v2951_v35 = vadd.f32 1e-05, %v2947_v54  ;;  %v2948_v12 = vmul.f32 0.0078125, %v2942_v19 }
 0xc94   :  { %7128 = vrsqrt.f32 %v2951_v35  ;;  %v2952_v16 = vadd.f32 1e-05, %v2948_v12 }
 0xc96   :  { %7130 = vrsqrt.f32 %v2952_v16 }
 0xc9e   :  { %v7129_v60 = vpop.eup %7128 }
 0xc9f   :  { %v2959_v57 = vmul.f32 %v7129_v60, %v8336_v7 }
 0xca0   :  { %v7131_v9 = vpop.eup %7130  ;;  %v2944_v10 = vpop.xlane.xlu0 %2943 }
 0xca1   :  { %v2969_v15 = vmul.f32 %v5831_v26, %v2959_v57  ;;  %v2960_v11 = vmul.f32 %v7131_v9, %v8339_v18  ;;  %v2949_v22 = vmul.f32 0.0078125, %v2944_v10 }
 0xca2   :  { %v2946_v30 = vpop.xlane.xlu1 %2945 }
 0xca3   :  { %v2970_v20 = vmul.f32 %v5831_v26, %v2960_v11  ;;  %v2953_v32 = vadd.f32 1e-05, %v2949_v22  ;;  %v2950_v27 = vmul.f32 0.0078125, %v2946_v30  ;;  %v2979_v62 = vadd.f32 %v5832_v13, %v2969_v15 }
 0xca5   :  { %7132 = vrsqrt.f32 %v2953_v32  ;;  %v2954_v33 = vadd.f32 1e-05, %v2950_v27  ;;  %v2980_v6 = vadd.f32 %v5832_v13, %v2970_v20 }
 0xca7   :  { %7134 = vrsqrt.f32 %v2954_v33  ;;  %v2983_v7 = vpack.c.bf16 %v2980_v6, %v2979_v62 }
 0xca9   :  { %3197 = vmatmul.mubr.bf16.vlgmr.msra.gmra.mrb[56].mxu1 %v2983_v7  ;;  %6385 = vmatprep.mubr.bf16.mxu0 %v2983_v7 }
 0xcaa   :  { %3206 = vmatprep.mubr.bf16.mxu1 %v7517_v58 }
 0xcaf   :  { %v7133_v18 = vpop.eup %7132 }
 0xcb0   :  { %v2961_v34 = vmul.f32 %v7133_v18, %v8346_v8  ;;  %v5833_v8 = vld [vmem:[%s8886_s7 + $0x3] sm:$0x7] }
 0xcb1   :  { %v7135_v45 = vpop.eup %7134  ;;  %v3024_v4 = vrot.slane %v5833_v8, %v7819_v39  ;;  %v3028_v46 = vrot.slane %v5833_v8, %v7825_v41  ;;  %v3032_v2 = vrot.slane %v5833_v8, %v7829_v43 }
 0xcb2   :  { %v2962_v31 = vmul.f32 %v7135_v45, %v8349_v47  ;;  %v2971_v55 = vmul.f32 %v5831_v26, %v2961_v34 }
 0xcb4   :  { %v2972_v51 = vmul.f32 %v5831_v26, %v2962_v31  ;;  %v2981_v44 = vadd.f32 %v5832_v13, %v2971_v55 }
 0xcb6   :  { %v2982_v63 = vadd.f32 %v5832_v13, %v2972_v51 }
 0xcb8   :  { %v2984_v17 = vpack.c.bf16 %v2982_v63, %v2981_v44 }
 0xcba   :  { %3207 = vmatmul.mubr.bf16.gmra.mrb[60].mxu1 %v2984_v17  ;;  %6386 = vmatmul.mubr.bf16.vlgmr.msra.gmra.mrb[60].mxu0 %v2984_v17 }
 0xcbb   :  { %6391 = vmatprep.mubr.msk.bf16.mxu1 %vm7519_vm1, %v7518_v36  ;;  %6409 = vmatprep.mubr.msk.bf16.mxu0 %vm7519_vm1, %v7518_v36 }
 0xd7c   :  { %v3198_v47 = vpop.f32.mrb[56].mxu1 }
 0xd7d   :  { %v3200_v29 = vpop.f32.mrb[57].mxu1  ;;  %v3199_v50 = vadd.f32 %v3198_v47, %v3024_v4 }
 0xd7e   :  { %v3202_v14 = vpop.f32.mrb[58].mxu1  ;;  %v3201_v28 = vadd.f32 %v3200_v29, %v3028_v46 }
 0xd7f   :  { %v3203_v59 = vadd.f32 %v3202_v14, %v3024_v4  ;;  %v3204_v24 = vpop.f32.mrb[59].mxu1 }
 0xd80   :  { %v3205_v40 = vadd.f32 %v3204_v24, %v3028_v46 }
 0xd81   :  { %v3306_v23 = vpack.c.bf16 %v3203_v59, %v3199_v50  ;;  %v6706_v0 = vpack.i.bf16 %v3203_v59, %v3199_v50 }
 0xd82   :  { %v6676_v1 = vpack.i.bf16 %v3205_v40, %v3201_v28  ;;  %v3354_v48 = vpack.c.bf16 %v3205_v40, %v3201_v28 }
 0xd84   :  { %6677 = vrot.lane.b32.xlu0 %v6676_v1, %s7520_s23  ;;  %v3414_v49 = vsel %vm226_vm0, %v3354_v48, 0 }
 0xd85   :  { %6390 = vmatpush3.bf16.xpose.msra.mxu1 %v3414_v49 }
 0xd86   :  { %6395 = vmatprep.subr.bf16.mxu1 %v7518_v36 }
 0xd88   :  { %6697 = vrot.lane.b32.xlu0 %v6676_v1, %s8915_s29 }
 0xd8c   :  { %6707 = vrot.lane.b32.xlu0 %v6706_v0, %s8915_s29  ;;  %6392 = vmatmul.mubr.msk.bf16.vlgmr.msra.gmra.mrb[64].mxu1 %vm226_vm0, %v3306_v23 }
 0xd8d   :  { %v3208_v56 = vpop.f32.mrb[60].mxu1  ;;  %v6387_v52 = vpop.f32.mrb[60].mxu0  ;;  %6397 = vmatprep.mubr.msk.bf16.mxu1 %vm7519_vm1, %v7518_v36 }
 0xd8e   :  { %v3210_v53 = vpop.f32.mrb[61].mxu1  ;;  %v3251_v42 = vpop.f32.mrb[61].mxu0  ;;  %v3209_v35 = vadd.f32 %v3208_v56, %v3024_v4  ;;  %v8383_v12 = vadd.f32 %v6387_v52, %v3032_v2 }
 0xd8f   :  { %v3212_v54 = vpop.f32.mrb[62].mxu1  ;;  %v6388_v19 = vpop.f32.mrb[62].mxu0  ;;  %v3211_v9 = vadd.f32 %v3210_v53, %v3028_v46  ;;  %v8388_v10 = vadd.f32 %v3251_v42, %v3032_v2 }
 0xd90   :  { %v3213_v16 = vadd.f32 %v3212_v54, %v3024_v4  ;;  %v8385_v60 = vadd.f32 %v6388_v19, %v3032_v2  ;;  %v3214_v26 = vpop.f32.mrb[63].mxu1  ;;  %v3254_v57 = vpop.f32.mrb[63].mxu0  ;;  %6717 = vrot.lane.b32.xlu0 %v6676_v1, %s7521_s18 }
 0xd91   :  { %v3215_v15 = vadd.f32 %v3214_v26, %v3028_v46  ;;  %v8390_v11 = vadd.f32 %v3254_v57, %v3032_v2 }
 0xd92   :  { %v3307_v22 = vpack.c.bf16 %v3213_v16, %v3209_v35  ;;  %v6691_v30 = vpack.i.bf16 %v3213_v16, %v3209_v35  ;;  %v3403_v27 = vpack.c.bf16 %v8385_v60, %v8383_v12  ;;  %v8399_v33 = vpack.i.bf16 %v8385_v60, %v8383_v12 }
 0xd93   :  { %v6681_v13 = vpack.i.bf16 %v3215_v15, %v3211_v9  ;;  %v3355_v20 = vpack.c.bf16 %v3215_v15, %v3211_v9  ;;  %v3402_v32 = vpack.c.bf16 %v8390_v11, %v8388_v10  ;;  %v8403_v62 = vpack.i.bf16 %v8390_v11, %v8388_v10 }
 0xd94   :  { %6727 = vrot.lane.b32.xlu0 %v6706_v0, %s7521_s18 }
 0xd95   :  { %6682 = vrot.lane.b32.xlu1 %v6681_v13, %s7520_s23  ;;  %v3461_v6 = vsel %vm226_vm0, %v3355_v20, 0 }
 0xd96   :  { %6396 = vmatpush3.bf16.xpose.msra.mxu1 %v3461_v6 }
 0xd97   :  { %6401 = vmatprep.subr.bf16.mxu1 %v7518_v36 }
 0xd99   :  { %6687 = vrot.lane.b32.xlu1 %v6706_v0, %s7520_s23 }
 0xd9d   :  { %6692 = vrot.lane.b32.xlu1 %v6691_v30, %s7520_s23  ;;  %6398 = vmatmul.mubr.msk.bf16.vlgmr.msra.gmra.mrb[68].mxu1 %vm226_vm0, %v3307_v22 }
 0xd9e   :  { %6403 = vmatprep.mubr.msk.bf16.mxu1 %vm7519_vm1, %v7518_v36 }
 0xda1   :  { %6702 = vrot.lane.b32.xlu1 %v6681_v13, %s8915_s29 }
 0xda5   :  { %6712 = vrot.lane.b32.xlu1 %v6691_v30, %s8915_s29 }
 0xda9   :  { %6722 = vrot.lane.b32.xlu1 %v6681_v13, %s7521_s18 }
 0xdad   :  { %6732 = vrot.lane.b32.xlu1 %v6691_v30, %s7521_s18 }
 0xdf6   :  { %v6678_v7 = vpop.permute.xlu0 %6677 }
 0xdf7   :  { %v6680_v18 = vunpack.i.h.bf16 %v6678_v7  ;;  %v6679_v34 = vunpack.i.l.bf16 %v6678_v7 }
 0xdf9   :  { %v3356_v45 = vpack.c.bf16 %v6680_v18, %v6679_v34 }
 0xdfa   :  { %v6698_v55 = vpop.permute.xlu0 %6697 }
 0xdfb   :  { %v3508_v31 = vsel %vm226_vm0, %v3356_v45, 0  ;;  %v6700_v51 = vunpack.i.h.bf16 %v6698_v55  ;;  %v6699_v44 = vunpack.i.l.bf16 %v6698_v55 }
 0xdfc   :  { %6402 = vmatpush3.bf16.xpose.msra.mxu1 %v3508_v31 }
 0xdfd   :  { %6413 = vmatprep.subr.bf16.mxu1 %v7518_v36  ;;  %v3358_v46 = vpack.c.bf16 %v6700_v51, %v6699_v44 }
 0xdfe   :  { %v6708_v17 = vpop.permute.xlu0 %6707 }
 0xdff   :  { %v3602_v23 = vsel %vm226_vm0, %v3358_v46, 0  ;;  %v6710_v2 = vunpack.i.h.bf16 %v6708_v17  ;;  %v6709_v56 = vunpack.i.l.bf16 %v6708_v17 }
 0xe01   :  { %v3310_v35 = vpack.c.bf16 %v6710_v2, %v6709_v56 }
 0xe02   :  { %v6718_v24 = vpop.permute.xlu0 %6717 }
 0xe03   :  { %v6720_v0 = vunpack.i.h.bf16 %v6718_v24  ;;  %v6719_v1 = vunpack.i.l.bf16 %v6718_v24 }
 0xe05   :  { %v3360_v42 = vpack.c.bf16 %v6720_v0, %v6719_v1 }
 0xe06   :  { %v6728_v26 = vpop.permute.xlu0 %6727 }
 0xe07   :  { %v6683_v63 = vpop.permute.xlu1 %6682  ;;  %v3696_v9 = vsel %vm226_vm0, %v3360_v42, 0  ;;  %v6730_v22 = vunpack.i.h.bf16 %v6728_v26  ;;  %v6729_v30 = vunpack.i.l.bf16 %v6728_v26 }
 0xe08   :  { %v6685_v8 = vunpack.i.h.bf16 %v6683_v63  ;;  %v6684_v4 = vunpack.i.l.bf16 %v6683_v63 }
 0xe09   :  { %v3312_v34 = vpack.c.bf16 %v6730_v22, %v6729_v30 }
 0xe0a   :  { %v3357_v47 = vpack.c.bf16 %v6685_v8, %v6684_v4 }
 0xe0b   :  { %v6688_v29 = vpop.permute.xlu1 %6687 }
 0xe0c   :  { %v6690_v14 = vunpack.i.h.bf16 %v6688_v29  ;;  %v6689_v50 = vunpack.i.l.bf16 %v6688_v29  ;;  %v3555_v59 = vsel %vm226_vm0, %v3357_v47, 0 }
 0xe0d   :  { %6408 = vmatpush3.bf16.xpose.msra.mxu0 %v3555_v59 }
 0xe0e   :  { %v3308_v28 = vpack.c.bf16 %v6690_v14, %v6689_v50  ;;  %6419 = vmatprep.subr.bf16.mxu0 %v7518_v36 }
 0xe0f   :  { %v6693_v40 = vpop.permute.xlu1 %6692 }
 0xe10   :  { %v6695_v48 = vunpack.i.h.bf16 %v6693_v40  ;;  %v6694_v49 = vunpack.i.l.bf16 %v6693_v40  ;;  %6404 = vmatmul.mubr.msk.bf16.vlgmr.msra.gmra.mrb[72].mxu1 %vm226_vm0, %v3308_v28 }
 0xe11   :  { %6414 = vmatpush3.bf16.xpose.msra.mxu1 %v3602_v23  ;;  %6415 = vmatprep.mubr.msk.bf16.mxu1 %vm7519_vm1, %v7518_v36 }
 0xe12   :  { %v3309_v52 = vpack.c.bf16 %v6695_v48, %v6694_v49  ;;  %6425 = vmatprep.subr.bf16.mxu1 %v7518_v36 }
 0xe13   :  { %v6703_v53 = vpop.permute.xlu1 %6702 }
 0xe14   :  { %v6705_v54 = vunpack.i.h.bf16 %v6703_v53  ;;  %v6704_v19 = vunpack.i.l.bf16 %v6703_v53  ;;  %6410 = vmatmul.mubr.msk.bf16.vlgmr.msra.gmra.mrb[64].mxu0 %vm226_vm0, %v3309_v52 }
 0xe15   :  { %6421 = vmatprep.mubr.msk.bf16.mxu0 %vm7519_vm1, %v7518_v36 }
 0xe16   :  { %v3359_v16 = vpack.c.bf16 %v6705_v54, %v6704_v19 }
 0xe17   :  { %v6713_v57 = vpop.permute.xlu1 %6712 }
 0xe18   :  { %6416 = vmatmul.mubr.msk.bf16.vlgmr.msra.gmra.mrb[76].mxu1 %vm226_vm0, %v3310_v35  ;;  %v3649_v15 = vsel %vm226_vm0, %v3359_v16, 0  ;;  %v6715_v13 = vunpack.i.h.bf16 %v6713_v57  ;;  %v6714_v20 = vunpack.i.l.bf16 %v6713_v57 }
 0xe19   :  { %6426 = vmatpush3.bf16.xpose.msra.mxu1 %v3696_v9  ;;  %6420 = vmatpush3.bf16.xpose.msra.mxu0 %v3649_v15 }
 0xe1a   :  { %6427 = vmatprep.mubr.msk.bf16.mxu1 %vm7519_vm1, %v7518_v36  ;;  %6437 = vmatprep.subr.bf16.mxu1 %v7518_v36  ;;  %v3311_v45 = vpack.c.bf16 %v6715_v13, %v6714_v20 }
 0xe1b   :  { %v6723_v6 = vpop.permute.xlu1 %6722  ;;  %6431 = vmatprep.subr.bf16.mxu0 %v7518_v36 }
 0xe1c   :  { %v6725_v7 = vunpack.i.h.bf16 %v6723_v6  ;;  %v6724_v18 = vunpack.i.l.bf16 %v6723_v6 }
 0xe1e   :  { %v3361_v31 = vpack.c.bf16 %v6725_v7, %v6724_v18 }
 0xe1f   :  { %v6733_v55 = vpop.permute.xlu1 %6732 }
 0xe20   :  { %6422 = vmatmul.mubr.msk.bf16.vlgmr.msra.gmra.mrb[68].mxu0 %vm226_vm0, %v3311_v45  ;;  %6428 = vmatmul.mubr.msk.bf16.vlgmr.msra.gmra.mrb[80].mxu1 %vm226_vm0, %v3312_v34  ;;  %v3743_v51 = vsel %vm226_vm0, %v3361_v31, 0  ;;  %v6735_v44 = vunpack.i.h.bf16 %v6733_v55  ;;  %v6734_v63 = vunpack.i.l.bf16 %v6733_v55 }
 0xe21   :  { %6438 = vmatpush3.bf16.msra.mxu1 %v3402_v32  ;;  %6432 = vmatpush3.bf16.xpose.msra.mxu0 %v3743_v51 }
 0xe22   :  { %6433 = vmatprep.mubr.msk.bf16.mxu0 %vm7519_vm1, %v7518_v36  ;;  %6443 = vmatprep.subr.bf16.mxu0 %v7518_v36  ;;  %v3313_v17 = vpack.c.bf16 %v6735_v44, %v6734_v63 }
 0xe23   :  { %6439 = vmatprep.mubr.msk.bf16.mxu1 %vm7519_vm1, %v7518_v36  ;;  %6449 = vmatprep.subr.bf16.mxu1 %v7518_v36 }
 0xe28   :  { %6434 = vmatmul.mubr.msk.bf16.vlgmr.msra.gmra.mrb[72].mxu0 %vm226_vm0, %v3313_v17 }
 0xe29   :  { %6444 = vmatpush3.bf16.msra.mxu0 %v3403_v27  ;;  %6445 = vmatprep.mubr.msk.bf16.mxu0 %vm7519_vm1, %v7518_v36 }
 0xe2a   :  { %6455 = vmatprep.subr.bf16.mxu0 %v7518_v36 }
 0xe5f   :  { %v8455_v10 = vpop.f32.mrb[64].mxu1 }
 0xe60   :  { %v6393_v11 = vpop.f32.mrb[65].mxu1  ;;  %v3786_v32 = vsel %vm1154_vm2, %v8455_v10, -inf }
 0xe61   :  { %3787 = vmax.xlane.f32.xlu0 %v3786_v32  ;;  %v8459_v8 = vpop.f32.mrb[66].mxu1 }
 0xe62   :  { %v6394_v4 = vpop.f32.mrb[67].mxu1  ;;  %v3789_v47 = vsel %vm1154_vm2, %v8459_v8, -inf }
 0xe63   :  { %3790 = vmax.xlane.f32.xlu1 %v3789_v47 }
 0xe70   :  { %v8463_v12 = vpop.f32.mrb[68].mxu1 }
 0xe71   :  { %v6399_v60 = vpop.f32.mrb[69].mxu1  ;;  %v3792_v27 = vsel %vm1154_vm2, %v8463_v12, -inf }
 0xe72   :  { %3793 = vmax.xlane.f32.xlu0 %v3792_v27  ;;  %v8467_v46 = vpop.f32.mrb[70].mxu1 }
 0xe73   :  { %v6400_v29 = vpop.f32.mrb[71].mxu1  ;;  %v3795_v14 = vsel %vm1154_vm2, %v8467_v46, -inf }
 0xe76   :  { %3796 = vmax.xlane.f32.xlu0 %v3795_v14 }
 0xee3   :  { %v8471_v50 = vpop.f32.mrb[72].mxu1 }
 0xee4   :  { %v6405_v59 = vpop.f32.mrb[73].mxu1  ;;  %v3798_v24 = vsel %vm1154_vm2, %v8471_v50, -inf }
 0xee5   :  { %3799 = vmax.xlane.f32.xlu0 %v3798_v24  ;;  %v8475_v28 = vpop.f32.mrb[74].mxu1 }
 0xee6   :  { %v6406_v40 = vpop.f32.mrb[75].mxu1  ;;  %v3801_v23 = vsel %vm1154_vm2, %v8475_v28, -inf }
 0xee7   :  { %v8479_v0 = vpop.f32.mrb[64].mxu0  ;;  %3802 = vmax.xlane.f32.xlu1 %v3801_v23 }
 0xee8   :  { %v6411_v1 = vpop.f32.mrb[65].mxu0  ;;  %v3804_v48 = vsel %vm1154_vm2, %v8479_v0, -inf }
 0xee9   :  { %v8483_v49 = vpop.f32.mrb[66].mxu0  ;;  %3805 = vmax.xlane.f32.xlu0 %v3804_v48 }
 0xeea   :  { %v6412_v2 = vpop.f32.mrb[67].mxu0  ;;  %v3807_v56 = vsel %vm1154_vm2, %v8483_v49, -inf }
 0xeeb   :  { %3808 = vmax.xlane.f32.xlu1 %v3807_v56  ;;  %v8487_v52 = vpop.f32.mrb[76].mxu1 }
 0xeec   :  { %v6417_v53 = vpop.f32.mrb[77].mxu1  ;;  %v3810_v42 = vsel %vm1154_vm2, %v8487_v52, -inf }
 0xeed   :  { %3811 = vmax.xlane.f32.xlu0 %v3810_v42  ;;  %v8491_v54 = vpop.f32.mrb[78].mxu1 }
 0xeee   :  { %v6418_v19 = vpop.f32.mrb[79].mxu1  ;;  %v3813_v35 = vsel %vm1154_vm2, %v8491_v54, -inf  ;;  %v3788_v44 = vpop.xlane.xlu0 %3787 }
 0xeef   :  { %3814 = vmax.xlane.f32.xlu1 %v3813_v35  ;;  %v3834_v11 = vsub.f32 %v8455_v10, %v3788_v44 }
 0xef0   :  { %v3791_v17 = vpop.xlane.xlu1 %3790 }
 0xef1   :  { %v3835_v32 = vsub.f32 %v8459_v8, %v3791_v17  ;;  %v3850_v47 = vmul.f32 1.442695, %v3834_v11 }
 0xef3   :  { %v8495_v16 = vpop.f32.mrb[68].mxu0  ;;  %v8497_v26 = vpop.f32.mrb[80].mxu1  ;;  %v3852_v27 = vmul.f32 1.442695, %v3835_v32  ;;  %7136 = vpow2.f32 %v3850_v47 }
 0xef4   :  { %v6423_v57 = vpop.f32.mrb[69].mxu0  ;;  %v6429_v9 = vpop.f32.mrb[81].mxu1  ;;  %v3816_v15 = vsel %vm1154_vm2, %v8495_v16, -inf  ;;  %v3822_v7 = vsel %vm1154_vm2, %v8497_v26, -inf }
 0xef5   :  { %v8501_v22 = vpop.f32.mrb[70].mxu0  ;;  %3817 = vmax.xlane.f32.xlu0 %v3816_v15  ;;  %v8503_v30 = vpop.f32.mrb[82].mxu1  ;;  %7138 = vpow2.f32 %v3852_v27 }
 0xef6   :  { %v6424_v13 = vpop.f32.mrb[71].mxu0  ;;  %v6430_v20 = vpop.f32.mrb[83].mxu1  ;;  %v3819_v6 = vsel %vm1154_vm2, %v8501_v22, -inf  ;;  %v3825_v18 = vsel %vm1154_vm2, %v8503_v30, -inf }
 0xef7   :  { %3820 = vmax.xlane.f32.xlu1 %v3819_v6 }
 0xef9   :  { %3823 = vmax.xlane.f32.xlu0 %v3822_v7 }
 0xefb   :  { %v8511_v34 = vpop.f32.mrb[72].mxu0  ;;  %3826 = vmax.xlane.f32.xlu1 %v3825_v18 }
 0xefc   :  { %v6435_v45 = vpop.f32.mrb[73].mxu0  ;;  %v3828_v31 = vsel %vm1154_vm2, %v8511_v34, -inf }
 0xefd   :  { %v8515_v55 = vpop.f32.mrb[74].mxu0  ;;  %3829 = vmax.xlane.f32.xlu0 %v3828_v31  ;;  %v8525_v24 = vpop.eup %7136 }
 0xefe   :  { %v6436_v51 = vpop.f32.mrb[75].mxu0  ;;  %v3831_v10 = vsel %vm1154_vm2, %v8515_v55, -inf  ;;  %v3882_v8 = vsel %vm1154_vm2, %v8525_v24, 0.0 }
 0xeff   :  { %v3794_v63 = vpop.xlane.xlu0 %3793  ;;  %v8529_v40 = vpop.eup %7138 }
 0xf00   :  { %v3836_v60 = vsub.f32 %v8463_v12, %v3794_v63 }
 0xf02   :  { %v3854_v14 = vmul.f32 1.442695, %v3836_v60 }
 0xf03   :  { %v3797_v4 = vpop.xlane.xlu0 %3796 }
 0xf04   :  { %v3837_v29 = vsub.f32 %v8467_v46, %v3797_v4  ;;  %7140 = vpow2.f32 %v3854_v14  ;;  %v3885_v46 = vsel %vm1154_vm2, %v8529_v40, 0.0 }
 0xf06   :  { %v3856_v59 = vmul.f32 1.442695, %v3837_v29 }
 0xf08   :  { %7142 = vpow2.f32 %v3856_v59 }
 0xf0c   :  { %6742 = vrot.lane.b32.xlu1 %v8399_v33, %s7520_s23 }
 0xf0e   :  { %v8533_v12 = vpop.eup %7140 }
 0xf0f   :  { %v3888_v1 = vsel %vm1154_vm2, %v8533_v12, 0.0 }
 0xf12   :  { %v8537_v23 = vpop.eup %7142 }
 0xf13   :  { %6737 = vrot.lane.b32.xlu0 %v8403_v62, %s7520_s23  ;;  %v3891_v48 = vsel %vm1154_vm2, %v8537_v23, 0.0  ;;  %s7462_s23 = scalar_lea.vmem %s5686_s6, 32 }
 0xf14   :  { %p7463_p10 = scmp.ne.s32.totalorder %s5686_s6, %s7462_s23  ;;  %p7468_p12 = scmp.lt.s32.totalorder %s7462_s23, %s7462_s23 }
 0xf16   :  { %p7469_p13 = por %p7468_p12, %p7467_p11 }
 0xf18   :  { %p7470_p0 = pnand %p7469_p13, %p7463_p10 }
 0xf30   :  { %3832 = vmax.xlane.f32.xlu1 %v3831_v10 }
 0xf32   :  { %3883 = vadd.xlane.f32.xlu0 %v3882_v8 }
 0xf34   :  { %3886 = vadd.xlane.f32.xlu1 %v3885_v46 }
 0xf36   :  { %3889 = vadd.xlane.f32.xlu0 %v3888_v1 }
 0xf38   :  { %3892 = vadd.xlane.f32.xlu1 %v3891_v48 }
 0xf72   :  { %v3800_v2 = vpop.xlane.xlu0 %3799 }
 0xf73   :  { %v3838_v56 = vsub.f32 %v8471_v50, %v3800_v2 }
 0xf74   :  { %v3803_v53 = vpop.xlane.xlu1 %3802 }
 0xf75   :  { %v3858_v42 = vmul.f32 1.442695, %v3838_v56  ;;  %v3839_v19 = vsub.f32 %v8475_v28, %v3803_v53 }
 0xf76   :  { %v3806_v35 = vpop.xlane.xlu0 %3805 }
 0xf77   :  { %7144 = vpow2.f32 %v3858_v42  ;;  %v3860_v57 = vmul.f32 1.442695, %v3839_v19  ;;  %v3840_v9 = vsub.f32 %v8479_v0, %v3806_v35 }
 0xf78   :  { %v3809_v18 = vpop.xlane.xlu1 %3808 }
 0xf79   :  { %7146 = vpow2.f32 %v3860_v57  ;;  %v3862_v15 = vmul.f32 1.442695, %v3840_v9  ;;  %v3841_v31 = vsub.f32 %v8483_v49, %v3809_v18 }
 0xf7a   :  { %v3812_v7 = vpop.xlane.xlu0 %3811 }
 0xf7b   :  { %7148 = vpow2.f32 %v3862_v15  ;;  %v3842_v63 = vsub.f32 %v8487_v52, %v3812_v7  ;;  %v3864_v17 = vmul.f32 1.442695, %v3841_v31 }
 0xf7c   :  { %v3815_v51 = vpop.xlane.xlu1 %3814 }
 0xf7d   :  { %v3843_v11 = vsub.f32 %v8491_v54, %v3815_v51  ;;  %v3866_v32 = vmul.f32 1.442695, %v3842_v63  ;;  %7150 = vpow2.f32 %v3864_v17 }
 0xf7f   :  { %v3868_v27 = vmul.f32 1.442695, %v3843_v11  ;;  %7152 = vpow2.f32 %v3866_v32 }
 0xf81   :  { %v8546_v13 = vpop.eup %7144  ;;  %7154 = vpow2.f32 %v3868_v27 }
 0xf82   :  { %v3894_v20 = vsel %vm1154_vm2, %v8546_v13, 0.0  ;;  %v3818_v45 = vpop.xlane.xlu0 %3817 }
 0xf83   :  { %v8550_v6 = vpop.eup %7146  ;;  %3895 = vadd.xlane.f32.xlu0 %v3894_v20  ;;  %v3844_v4 = vsub.f32 %v8495_v16, %v3818_v45 }
 0xf84   :  { %v3897_v50 = vsel %vm1154_vm2, %v8550_v6, 0.0  ;;  %v3821_v47 = vpop.xlane.xlu1 %3820 }
 0xf85   :  { %v8554_v28 = vpop.eup %7148  ;;  %3898 = vadd.xlane.f32.xlu1 %v3897_v50  ;;  %v3870_v14 = vmul.f32 1.442695, %v3844_v4  ;;  %v3845_v59 = vsub.f32 %v8501_v22, %v3821_v47 }
 0xf86   :  { %v3900_v0 = vsel %vm1154_vm2, %v8554_v28, 0.0  ;;  %v3824_v44 = vpop.xlane.xlu0 %3823 }
 0xf87   :  { %3901 = vadd.xlane.f32.xlu0 %v3900_v0  ;;  %v3846_v29 = vsub.f32 %v8497_v26, %v3824_v44  ;;  %7156 = vpow2.f32 %v3870_v14  ;;  %v3872_v8 = vmul.f32 1.442695, %v3845_v59  ;;  %v8570_v46 = vpop.eup %7150 }
 0xf88   :  { %v3827_v10 = vpop.xlane.xlu1 %3826 }
 0xf89   :  { %v3874_v52 = vmul.f32 1.442695, %v3846_v29  ;;  %v3847_v16 = vsub.f32 %v8503_v30, %v3827_v10  ;;  %v8572_v1 = vpop.eup %7152 }
 0xf8a   :  { %v3830_v60 = vpop.xlane.xlu0 %3829  ;;  %v3906_v56 = vsel %vm1154_vm2, %v8572_v1, 0.0 }
 0xf8b   :  { %v3848_v49 = vsub.f32 %v8511_v34, %v3830_v60  ;;  %7158 = vpow2.f32 %v3874_v52  ;;  %v3876_v26 = vmul.f32 1.442695, %v3847_v16  ;;  %v3903_v34 = vsel %vm1154_vm2, %v8570_v46, 0.0  ;;  %v8576_v22 = vpop.eup %7154 }
 0xf8c   :  { %v6743_v48 = vpop.permute.xlu1 %6742  ;;  %v3909_v42 = vsel %vm1154_vm2, %v8576_v22, 0.0 }
 0xf8d   :  { %v3878_v54 = vmul.f32 1.442695, %v3848_v49  ;;  %v6745_v49 = vunpack.i.h.bf16 %v6743_v48  ;;  %v6744_v59 = vunpack.i.l.bf16 %v6743_v48 }
 0xf8e   :  { %v6738_v2 = vpop.permute.xlu0 %6737 }
 0xf8f   :  { %7160 = vpow2.f32 %v3878_v54  ;;  %v6740_v32 = vunpack.i.h.bf16 %v6738_v2  ;;  %v6739_v4 = vunpack.i.l.bf16 %v6738_v2 }
 0xf90   :  { %7162 = vpow2.f32 %v3872_v8 }
 0xf91   :  { %v8580_v53 = vpop.eup %7156  ;;  %7164 = vpow2.f32 %v3876_v26  ;;  %v3404_v10 = vpack.c.bf16 %v6740_v32, %v6739_v4 }
 0xf92   :  { %v3912_v9 = vsel %vm1154_vm2, %v8580_v53, 0.0 }
 0xf95   :  { %v8584_v19 = vpop.eup %7158 }
 0xf96   :  { %6752 = vrot.lane.b32.xlu1 %v8399_v33, %s8915_s29  ;;  %v3918_v0 = vsel %vm1154_vm2, %v8584_v19, 0.0 }
 0xf99   :  { %v8589_v15 = vpop.eup %7160 }
 0xf9a   :  { %v8593_v7 = vpop.eup %7162  ;;  %v3924_v18 = vsel %vm1154_vm2, %v8589_v15, 0.0 }
 0xf9b   :  { %v3915_v31 = vsel %vm1154_vm2, %v8593_v7, 0.0  ;;  %v8599_v51 = vpop.eup %7164 }
 0xf9c   :  { %v3921_v44 = vsel %vm1154_vm2, %v8599_v51, 0.0 }
 0xf9d   :  { %6747 = vrot.lane.b32.xlu0 %v8403_v62, %s8915_s29 }
 0xfba   :  { %3904 = vadd.xlane.f32.xlu1 %v3903_v34 }
 0xfbc   :  { %3907 = vadd.xlane.f32.xlu0 %v3906_v56 }
 0xfbd   :  { %v3833_v30 = vpop.xlane.xlu1 %3832 }
 0xfbe   :  { %v3849_v35 = vsub.f32 %v8515_v55, %v3833_v30  ;;  %3910 = vadd.xlane.f32.xlu1 %v3909_v42 }
 0xfbf   :  { %v3884_v57 = vpop.xlane.xlu0 %3883 }
 0xfc0   :  { %v3880_v20 = vmul.f32 1.442695, %v3849_v35  ;;  %3913 = vadd.xlane.f32.xlu0 %v3912_v9  ;;  %7166 = vrcp.f32 %v3884_v57 }
 0xfc1   :  { %v3887_v50 = vpop.xlane.xlu1 %3886 }
 0xfc2   :  { %7168 = vpow2.f32 %v3880_v20  ;;  %3919 = vadd.xlane.f32.xlu1 %v3918_v0 }
 0xfc3   :  { %7170 = vrcp.f32 %v3887_v50  ;;  %v3890_v55 = vpop.xlane.xlu0 %3889 }
 0xfc4   :  { %7172 = vrcp.f32 %v3890_v55  ;;  %3925 = vadd.xlane.f32.xlu0 %v3924_v18 }
 0xfc5   :  { %v3893_v45 = vpop.xlane.xlu1 %3892 }
 0xfc6   :  { %7174 = vrcp.f32 %v3893_v45  ;;  %3916 = vadd.xlane.f32.xlu1 %v3915_v31 }
 0xfca   :  { %3922 = vadd.xlane.f32.xlu1 %v3921_v44  ;;  %v7167_v63 = vpop.eup %7166 }
 0xfcb   :  { %v3946_v27 = vmul.f32 %v7167_v63, %v8525_v24  ;;  %v3405_v24 = vpack.c.bf16 %v6745_v49, %v6744_v59 }
 0xfcc   :  { %v8603_v17 = vpop.eup %7168 }
 0xfcd   :  { %v7171_v11 = vpop.eup %7170  ;;  %v3927_v47 = vsel %vm1154_vm2, %v8603_v17, 0.0 }
 0xfce   :  { %v7173_v60 = vpop.eup %7172  ;;  %v3947_v29 = vmul.f32 %v7171_v11, %v8529_v40  ;;  %3928 = vadd.xlane.f32.xlu1 %v3927_v47 }
 0xfcf   :  { %v3948_v54 = vmul.f32 %v7173_v60, %v8533_v12 }
 0xfd0   :  { %v7175_v14 = vpop.eup %7174  ;;  %v3962_v52 = vpack.c.bf16 %v3947_v29, %v3946_v27 }
 0xfd1   :  { %v3949_v8 = vmul.f32 %v7175_v14, %v8537_v23 }
 0xfd2   :  { %6440 = vmatmul.mubr.msk.bf16.vlgmr.msra.gmra.mrb[84].mxu1 %vm1154_vm2, %v3962_v52  ;;  %v6920_v52 = vld [vmem:[#allocation13 + $0x40] sm:$0xff]  }
 0xfd3   :  { %6450 = vmatpush3.bf16.msra.mxu1 %v3404_v10  ;;  %v3963_v16 = vpack.c.bf16 %v3949_v8, %v3948_v54  ;;  %6451 = vmatprep.mubr.msk.bf16.mxu1 %vm7519_vm1, %v7518_v36 }
 0xfd4   :  { %6461 = vmatprep.subr.bf16.mxu1 %v7518_v36 }
 0xfd5   :  { %6446 = vmatmul.mubr.msk.bf16.vlgmr.msra.gmra.mrb[76].mxu0 %vm1154_vm2, %v3963_v16 }
 0xfd6   :  { %6456 = vmatpush3.bf16.msra.mxu0 %v3405_v24  ;;  %6457 = vmatprep.mubr.msk.bf16.mxu0 %vm7519_vm1, %v7518_v36 }
 0xfd7   :  { %6467 = vmatprep.subr.bf16.mxu0 %v7518_v36 }
 0xfda   :  { %6757 = vrot.lane.b32.xlu0 %v8403_v62, %s7521_s18 }
 0xfdf   :  { %6762 = vrot.lane.b32.xlu1 %v8399_v33, %s7521_s18 }
0x1010   :  { %v3896_v40 = vpop.xlane.xlu0 %3895 }
0x1011   :  { %7176 = vrcp.f32 %v3896_v40 }
0x1012   :  { %v3899_v12 = vpop.xlane.xlu1 %3898 }
0x1013   :  { %7178 = vrcp.f32 %v3899_v12 }
0x1014   :  { %v3902_v23 = vpop.xlane.xlu0 %3901 }
0x1015   :  { %7180 = vrcp.f32 %v3902_v23 }
0x1016   :  { %v6753_v33 = vpop.permute.xlu1 %6752 }
0x1017   :  { %v6755_v18 = vunpack.i.h.bf16 %v6753_v33  ;;  %v6754_v45 = vunpack.i.l.bf16 %v6753_v33 }
0x1018   :  { %v6748_v26 = vpop.permute.xlu0 %6747 }
0x1019   :  { %v6750_v2 = vunpack.i.h.bf16 %v6748_v26  ;;  %v6749_v56 = vunpack.i.l.bf16 %v6748_v26  ;;  %v3407_v60 = vpack.c.bf16 %v6755_v18, %v6754_v45 }
0x101b   :  { %v7177_v48 = vpop.eup %7176  ;;  %v3406_v57 = vpack.c.bf16 %v6750_v2, %v6749_v56 }
0x101c   :  { %v3950_v30 = vmul.f32 %v7177_v48, %v8546_v13 }
0x101d   :  { %v7179_v34 = vpop.eup %7178 }
0x101e   :  { %v3951_v42 = vmul.f32 %v7179_v34, %v8550_v6 }
0x101f   :  { %v7181_v50 = vpop.eup %7180 }
0x1020   :  { %v3964_v35 = vpack.c.bf16 %v3951_v42, %v3950_v30  ;;  %v3952_v31 = vmul.f32 %v7181_v50, %v8554_v28 }
0x1022   :  { %6452 = vmatmul.mubr.msk.bf16.vlgmr.msra.gmra.mrb[88].mxu1 %vm1154_vm2, %v3964_v35 }
0x1023   :  { %6462 = vmatpush3.bf16.msra.mxu1 %v3406_v57  ;;  %6463 = vmatprep.mubr.msk.bf16.mxu1 %vm7519_vm1, %v7518_v36 }
0x1024   :  { %6473 = vmatprep.subr.bf16.mxu1 %v7518_v36 }
0x1047   :  { %v3905_v62 = vpop.xlane.xlu1 %3904 }
0x1048   :  { %7182 = vrcp.f32 %v3905_v62 }
0x1049   :  { %v3908_v9 = vpop.xlane.xlu0 %3907 }
0x104a   :  { %7184 = vrcp.f32 %v3908_v9 }
0x104b   :  { %v3911_v20 = vpop.xlane.xlu1 %3910 }
0x104c   :  { %7186 = vrcp.f32 %v3911_v20 }
0x104d   :  { %v3914_v13 = vpop.xlane.xlu0 %3913 }
0x104e   :  { %7188 = vrcp.f32 %v3914_v13 }
0x104f   :  { %v3920_v6 = vpop.xlane.xlu1 %3919 }
0x1051   :  { %v3926_v0 = vpop.xlane.xlu0 %3925 }
0x1052   :  { %v7183_v55 = vpop.eup %7182 }
0x1053   :  { %v3953_v44 = vmul.f32 %v7183_v55, %v8570_v46  ;;  %v3917_v63 = vpop.xlane.xlu1 %3916  ;;  %v6924_v55 = vld [vmem:[#allocation13 + $0x60] sm:$0xff]  }
0x1054   :  { %v7185_v11 = vpop.eup %7184  ;;  %7190 = vrcp.f32 %v3917_v63 }
0x1055   :  { %v6758_v32 = vpop.permute.xlu0 %6757  ;;  %v3965_v4 = vpack.c.bf16 %v3953_v44, %v3952_v31  ;;  %7192 = vrcp.f32 %v3920_v6  ;;  %v3954_v14 = vmul.f32 %v7185_v11, %v8572_v1 }
0x1056   :  { %v7187_v47 = vpop.eup %7186  ;;  %v6760_v27 = vunpack.i.h.bf16 %v6758_v32  ;;  %v6759_v29 = vunpack.i.l.bf16 %v6758_v32 }
0x1057   :  { %v3955_v49 = vmul.f32 %v7187_v47, %v8576_v22  ;;  %v3923_v59 = vpop.xlane.xlu1 %3922  ;;  %6458 = vmatmul.mubr.msk.bf16.vlgmr.msra.gmra.mrb[80].mxu0 %vm1154_vm2, %v3965_v4 }
0x1058   :  { %v3408_v28 = vpack.c.bf16 %v6760_v27, %v6759_v29  ;;  %7194 = vrcp.f32 %v3923_v59  ;;  %6468 = vmatpush3.bf16.msra.mxu0 %v3407_v60  ;;  %6469 = vmatprep.mubr.msk.bf16.mxu0 %vm7519_vm1, %v7518_v36  ;;  %v7189_v1 = vpop.eup %7188  ;;  %v6925_v27 = vld [vmem:[#allocation13 + $0x68] sm:$0xff]  }
0x1059   :  { %v3966_v46 = vpack.c.bf16 %v3955_v49, %v3954_v14  ;;  %6479 = vmatprep.subr.bf16.mxu0 %v7518_v36  ;;  %7196 = vrcp.f32 %v3926_v0  ;;  %v3956_v54 = vmul.f32 %v7189_v1, %v8580_v53  ;;  %v6923_v0 = vld [vmem:[#allocation13 + $0x58] sm:$0xff]  }
0x105b   :  { %6464 = vmatmul.mubr.msk.bf16.vlgmr.msra.gmra.mrb[92].mxu1 %vm1154_vm2, %v3966_v46  ;;  %v3929_v10 = vpop.xlane.xlu1 %3928  ;;  %v6926_v46 = vld [vmem:[#allocation13 + $0x70] sm:$0xff]  }
0x105c   :  { %6474 = vmatpush3.bf16.msra.mxu1 %v3408_v28  ;;  %7198 = vrcp.f32 %v3929_v10  ;;  %6475 = vmatprep.mubr.msk.bf16.mxu1 %vm7519_vm1, %v7518_v36 }
0x105d   :  { %6485 = vmatprep.subr.bf16.mxu1 %v6920_v52 }
0x105e   :  { %v7191_v22 = vpop.eup %7190 }
0x105f   :  { %v3957_v8 = vmul.f32 %v7191_v22, %v8593_v7  ;;  %v6763_v16 = vpop.permute.xlu1 %6762  ;;  %v7193_v24 = vpop.eup %7192  ;;  %v6921_v7 = vld [vmem:[#allocation13 + $0x48] sm:$0xff]  }
0x1060   :  { %v6765_v40 = vunpack.i.h.bf16 %v6763_v16  ;;  %v6764_v12 = vunpack.i.l.bf16 %v6763_v16  ;;  %v3958_v34 = vmul.f32 %v7193_v24, %v8584_v19 }
0x1061   :  { %v3967_v23 = vpack.c.bf16 %v3957_v8, %v3956_v54  ;;  %v6927_v8 = vld [vmem:[#allocation13 + $0x78] sm:$0xff]  }
0x1062   :  { %v7195_v26 = vpop.eup %7194  ;;  %v3409_v48 = vpack.c.bf16 %v6765_v40, %v6764_v12 }
0x1063   :  { %v3959_v2 = vmul.f32 %v7195_v26, %v8599_v51  ;;  %6470 = vmatmul.mubr.msk.bf16.vlgmr.msra.gmra.mrb[84].mxu0 %vm1154_vm2, %v3967_v23  ;;  %v7197_v56 = vpop.eup %7196  ;;  %v6922_v51 = vld [vmem:[#allocation13 + $0x50] sm:$0xff]  }
0x1064   :  { %6480 = vmatpush3.bf16.msra.mxu0 %v3409_v48  ;;  %6481 = vmatprep.mubr.msk.bf16.mxu0 %vm7519_vm1, %v7518_v36  ;;  %v3960_v42 = vmul.f32 %v7197_v56, %v8589_v15 }
0x1065   :  { %v3968_v53 = vpack.c.bf16 %v3959_v2, %v3958_v34 }
0x1066   :  { %v7199_v30 = vpop.eup %7198 }
0x1067   :  { %v3961_v35 = vmul.f32 %v7199_v30, %v8603_v17  ;;  %6476 = vmatmul.mubr.msk.bf16.vlgmr.msra.gmra.mrb[96].mxu1 %vm1154_vm2, %v3968_v53 }
0x1068   :  { %6486 = vmatpush3.bf16.msra.mxu1 %v6920_v52 }
0x1069   :  { %v3969_v19 = vpack.c.bf16 %v3961_v35, %v3960_v42  ;;  %6487 = vmatprep.subr.bf16.mxu1 %v6921_v7 }
0x106b   :  { %6482 = vmatmul.mubr.msk.bf16.vlgmr.msra.gmra.mrb[88].mxu0 %vm1154_vm2, %v3969_v19 }
0x106c   :  { %6488 = vmatpush3.bf16.msra.mxu1 %v6921_v7  ;;  %4961 = vmatprep.mubr.bf16.mxu0 %v7517_v58  ;;  %v5891_v7 = vld [vmem:[%s8888_s9 + $0x1] ss:$0 sm:$0xff] }
0x106d   :  { %6493 = vmatprep.subr.bf16.mxu1 %v6922_v51 }
0x10a5   :  { %v4007_v57 = vpop.f32.mrb[84].mxu1 }
0x10a6   :  { %v6441_v33 = vpop.f32.mrb[85].mxu1 }
0x10a7   :  { %v4010_v62 = vpop.f32.mrb[86].mxu1 }
0x10a8   :  { %v4322_v9 = vpack.c.bf16 %v4010_v62, %v4007_v57  ;;  %v6442_v20 = vpop.f32.mrb[87].mxu1  ;;  %v4051_v15 = vpop.f32.mrb[76].mxu0 }
0x10a9   :  { %v6447_v13 = vpop.f32.mrb[77].mxu0 }
0x10aa   :  { %6489 = vmatprep.mubr.msk.bf16.mxu1 %vm226_vm0, %v4322_v9  ;;  %v4054_v17 = vpop.f32.mrb[78].mxu0  ;;  %v6930_v13 = vld [vmem:[#allocation14 + $0x104] ss:$16 sps:$4 sm:$0xff]  }
0x10ab   :  { %v4323_v6 = vpack.c.bf16 %v4054_v17, %v4051_v15  ;;  %v6448_v50 = vpop.f32.mrb[79].mxu0  ;;  %v6931_v17 = vld [vmem:[#allocation14 + $0x108] ss:$16 sps:$4 sm:$0xff]   ;;  %4929 = vmatprep.subr.bf16.mxu0 %v6930_v13 }
0x10ac   :  { %v6934_v50 = vld [vmem:[#allocation14 + $0x120] ss:$16 sps:$4 sm:$0xff]  }
0x10ad   :  { %6490 = vmatmul.mubr.msk.bf16.vlgmr.msra.gmra.mrb[100].mxu1 %vm226_vm0, %v4323_v6  ;;  %v6936_v6 = vld [vmem:[#allocation14 + $0x124] ss:$16 sps:$4 sm:$0xff]  }
0x10ae   :  { %6494 = vmatpush3.bf16.msra.mxu1 %v6922_v51 }
0x10af   :  { %6495 = vmatprep.subr.bf16.mxu1 %v6923_v0 }
0x10b2   :  { %6496 = vmatpush3.bf16.msra.mxu1 %v6923_v0 }
0x10b3   :  { %6501 = vmatprep.subr.bf16.mxu1 %v6924_v55 }
0x10f5   :  { %v4095_v18 = vpop.f32.mrb[88].mxu1 }
0x10f6   :  { %v6453_v45 = vpop.f32.mrb[89].mxu1 }
0x10f7   :  { %v4098_v31 = vpop.f32.mrb[90].mxu1 }
0x10f8   :  { %v4324_v44 = vpack.c.bf16 %v4098_v31, %v4095_v18  ;;  %v6454_v63 = vpop.f32.mrb[91].mxu1 }
0x10fa   :  { %6497 = vmatprep.mubr.msk.bf16.mxu1 %vm226_vm0, %v4324_v44 }
0x112a   :  { %v4139_v11 = vpop.f32.mrb[80].mxu0 }
0x112b   :  { %v6459_v32 = vpop.f32.mrb[81].mxu0 }
0x112c   :  { %v4142_v4 = vpop.f32.mrb[82].mxu0 }
0x112d   :  { %v4325_v47 = vpack.c.bf16 %v4142_v4, %v4139_v11  ;;  %v6460_v60 = vpop.f32.mrb[83].mxu0 }
0x112e   :  { %v4183_v29 = vpop.f32.mrb[92].mxu1 }
0x112f   :  { %v6465_v14 = vpop.f32.mrb[93].mxu1  ;;  %6498 = vmatmul.mubr.msk.bf16.vlgmr.msra.gmra.mrb[100].mxu1 %vm226_vm0, %v4325_v47 }
0x1130   :  { %6502 = vmatpush3.bf16.msra.mxu1 %v6924_v55  ;;  %v4186_v49 = vpop.f32.mrb[94].mxu1 }
0x1131   :  { %v4326_v59 = vpack.c.bf16 %v4186_v49, %v4183_v29  ;;  %v6466_v28 = vpop.f32.mrb[95].mxu1  ;;  %6503 = vmatprep.subr.bf16.mxu1 %v6925_v27 }
0x1132   :  { %v6945_v28 = vld [vmem:[#allocation14 + $0x14c] ss:$16 sps:$4 sm:$0xff]  }
0x1133   :  { %6505 = vmatprep.mubr.msk.bf16.mxu1 %vm226_vm0, %v4326_v59  ;;  %v6942_v59 = vld [vmem:[#allocation14 + $0x144] ss:$16 sps:$4 sm:$0xff]  }
0x1134   :  { %6504 = vmatpush3.bf16.msra.mxu1 %v6925_v27 }
0x1135   :  { %6509 = vmatprep.subr.bf16.mxu1 %v6926_v46 }
0x1136   :  { %v4227_v52 = vpop.f32.mrb[84].mxu0 }
0x1137   :  { %v6471_v10 = vpop.f32.mrb[85].mxu0 }
0x1138   :  { %v4230_v1 = vpop.f32.mrb[86].mxu0  ;;  %v6948_v10 = vld [vmem:[#allocation14 + $0x164] ss:$16 sps:$4 sm:$0xff]  }
0x1139   :  { %v4327_v22 = vpack.c.bf16 %v4230_v1, %v4227_v52  ;;  %v6472_v54 = vpop.f32.mrb[87].mxu0  ;;  %v6943_v52 = vld [vmem:[#allocation14 + $0x148] ss:$16 sps:$4 sm:$0xff]   ;;  %v6951_v1 = vld [vmem:[#allocation14 + $0x16c] ss:$16 sps:$4 sm:$0xff]  }
0x113a   :  { %v4271_v16 = vpop.f32.mrb[96].mxu1  ;;  %v6949_v54 = vld [vmem:[#allocation14 + $0x168] ss:$16 sps:$4 sm:$0xff]  }
0x113b   :  { %v6477_v24 = vpop.f32.mrb[97].mxu1  ;;  %6506 = vmatmul.mubr.msk.bf16.vlgmr.msra.gmra.mrb[100].mxu1 %vm226_vm0, %v4327_v22  ;;  %v6946_v22 = vld [vmem:[#allocation14 + $0x160] ss:$16 sps:$4 sm:$0xff]  }
0x113c   :  { %6510 = vmatpush3.bf16.msra.mxu1 %v6926_v46  ;;  %v4274_v40 = vpop.f32.mrb[98].mxu1  ;;  %v6940_v46 = vld [vmem:[#allocation14 + $0x140] ss:$16 sps:$4 sm:$0xff]  }
0x113d   :  { %v4328_v12 = vpack.c.bf16 %v4274_v40, %v4271_v16  ;;  %v6478_v23 = vpop.f32.mrb[99].mxu1  ;;  %6511 = vmatprep.subr.bf16.mxu1 %v6927_v8  ;;  %v6957_v16 = vld [vmem:[#allocation14 + $0x18c] ss:$16 sps:$4 sm:$0xff]   ;;  %v6952_v24 = vld [vmem:[#allocation14 + $0x180] ss:$16 sps:$4 sm:$0xff]  }
0x113e   :  { %v4315_v26 = vpop.f32.mrb[88].mxu0  ;;  %v6955_v40 = vld [vmem:[#allocation14 + $0x188] ss:$16 sps:$4 sm:$0xff]   ;;  %v6963_v23 = vld [vmem:[#allocation14 + $0x1ac] ss:$16 sps:$4 sm:$0xff]  }
0x113f   :  { %v6483_v48 = vpop.f32.mrb[89].mxu0  ;;  %6513 = vmatprep.mubr.msk.bf16.mxu1 %vm226_vm0, %v4328_v12  ;;  %v6960_v12 = vld [vmem:[#allocation14 + $0x1a4] ss:$16 sps:$4 sm:$0xff]  }
0x1140   :  { %v4318_v34 = vpop.f32.mrb[90].mxu0  ;;  %6512 = vmatpush3.bf16.msra.mxu1 %v6927_v8  ;;  %v6954_v8 = vld [vmem:[#allocation14 + $0x184] ss:$16 sps:$4 sm:$0xff]   ;;  %v6961_v48 = vld [vmem:[#allocation14 + $0x1a8] ss:$16 sps:$4 sm:$0xff]  }
0x1141   :  { %v4329_v2 = vpack.c.bf16 %v4318_v34, %v4315_v26  ;;  %v6484_v56 = vpop.f32.mrb[91].mxu0  ;;  %v6958_v26 = vld [vmem:[#allocation14 + $0x1a0] ss:$16 sps:$4 sm:$0xff]   ;;  %v6966_v34 = vld [vmem:[#allocation14 + $0x1c4] ss:$16 sps:$4 sm:$0xff]  }
0x1142   :  { %v6967_v56 = vld [vmem:[#allocation14 + $0x1c8] ss:$16 sps:$4 sm:$0xff]  }
0x1147   :  { %6514 = vmatmul.mubr.msk.bf16.vlgmr.msra.gmra.mrb[100].mxu1 %vm226_vm0, %v4329_v2  ;;  %v6964_v2 = vld [vmem:[#allocation14 + $0x1c0] ss:$16 sps:$4 sm:$0xff]  }
0x1148   :  { %5014 = vmatprep.mubr.bf16.mxu1 %v7517_v58 }
0x121a   :  { %v6515_v53 = vpop.f32.mrb[100].mxu1 }
0x121b   :  { %v4600_v30 = vpop.f32.mrb[101].mxu1  ;;  %v4629_v51 = vadd.f32 %v6515_v53, %v8328_v61  ;;  %v6933_v61 = vld [vmem:[#allocation14 + $0x10c] ss:$16 sps:$4 sm:$0xff]  }
0x121c   :  { %v4627_v42 = vadd.f32 %v4600_v30, %v8320_v5  ;;  %v6516_v35 = vpop.f32.mrb[102].mxu1  ;;  %v6928_v5 = vld [vmem:[#allocation14 + $0x100] ss:$16 sps:$4 sm:$0xff]   ;;  %4982 = vmatprep.subr.bf16.mxu1 %v6933_v61  ;;  %v6969_v53 = vld [vmem:[#allocation14 + $0x1cc] ss:$16 sps:$4 sm:$0xff]  }
0x121d   :  { %v4603_v19 = vpop.f32.mrb[103].mxu1  ;;  %v4641_v9 = vadd.f32 %v5891_v7, %v4629_v51  ;;  %v4630_v20 = vadd.f32 %v6516_v35, %v8332_v3  ;;  %4930 = vmatpush1.bf16.msra.mxu0 %v6928_v5  ;;  %4983 = vmatpush1.bf16.msra.mxu1 %v6931_v17  ;;  %v6937_v3 = vld [vmem:[#allocation14 + $0x128] ss:$16 sps:$4 sm:$0xff]   ;;  %v6975_v30 = vld [vmem:[#allocation14 + $0x1ec] ss:$16 sps:$4 sm:$0xff]  }
0x121e   :  { %v4639_v57 = vadd.f32 %v5891_v7, %v4627_v42  ;;  %v4628_v33 = vadd.f32 %v4603_v19, %v8324_v25  ;;  %v6939_v25 = vld [vmem:[#allocation14 + $0x12c] ss:$16 sps:$4 sm:$0xff]   ;;  %4931 = vmatprep.subr.bf16.mxu0 %v6936_v6  ;;  %v6970_v42 = vld [vmem:[#allocation14 + $0x1e0] ss:$16 sps:$4 sm:$0xff]   ;;  %v6973_v35 = vld [vmem:[#allocation14 + $0x1e8] ss:$16 sps:$4 sm:$0xff]  }
0x121f   :  { %v8671_v15 = vadd.f32 %v5891_v7, %v4630_v20  ;;  %4984 = vmatprep.subr.bf16.mxu1 %v6939_v25 }
0x1220   :  { %v8667_v62 = vadd.f32 %v5891_v7, %v4628_v33  ;;  %4647 = vadd.xlane.f32.xlu0 %v4639_v57  ;;  %v6972_v7 = vld [vmem:[#allocation14 + $0x1e4] ss:$16 sps:$4 sm:$0xff]  }
0x1221   :  { %4932 = vmatpush1.bf16.msra.mxu0 %v6934_v50  ;;  %4985 = vmatpush1.bf16.msra.mxu1 %v6937_v3  ;;  %v5894_v3 = vld [vmem:[%s8889_s10 + $0x1] ss:$0 sm:$0xff] }
0x1222   :  { %4649 = vadd.xlane.f32.xlu1 %v8667_v62  ;;  %4933 = vmatprep.subr.bf16.mxu0 %v6942_v59 }
0x1223   :  { %4986 = vmatprep.subr.bf16.mxu1 %v6945_v28 }
0x1224   :  { %4651 = vadd.xlane.f32.xlu0 %v4641_v9 }
0x1225   :  { %4934 = vmatpush1.bf16.msra.mxu0 %v6940_v46  ;;  %4987 = vmatpush1.bf16.msra.mxu1 %v6943_v52 }
0x1226   :  { %4935 = vmatprep.subr.bf16.mxu0 %v6948_v10  ;;  %4988 = vmatprep.subr.bf16.mxu1 %v6951_v1  ;;  %v6976_v10 = vld [vmem:[#allocation16 + $0x140] sm:$0xff]  }
0x1227   :  { %v6977_v1 = vld [vmem:[#allocation16 + $0x1c0] sm:$0xff]  }
0x1228   :  { %4653 = vadd.xlane.f32.xlu0 %v8671_v15 }
0x1229   :  { %4936 = vmatpush1.bf16.msra.mxu0 %v6946_v22  ;;  %4989 = vmatpush1.bf16.msra.mxu1 %v6949_v54  ;;  %v6979_v22 = vld [vmem:[#allocation16 + $0x180] sm:$0xff]   ;;  %v6981_v54 = vld [vmem:[#allocation16 + $0x1c8] sm:$0xff]  }
0x122a   :  { %4937 = vmatprep.subr.bf16.mxu0 %v6954_v8  ;;  %4990 = vmatprep.subr.bf16.mxu1 %v6957_v16  ;;  %v6982_v8 = vld [vmem:[#allocation16 + $0x108] sm:$0xff]  }
0x122b   :  { %v6983_v16 = vld [vmem:[#allocation16 + $0x188] sm:$0xff]  }
0x122d   :  { %4938 = vmatpush1.bf16.msra.mxu0 %v6952_v24  ;;  %4991 = vmatpush1.bf16.msra.mxu1 %v6955_v40  ;;  %v6985_v24 = vld [vmem:[#allocation16 + $0x1d0] sm:$0xff]  }
0x122e   :  { %4939 = vmatprep.subr.bf16.mxu0 %v6960_v12  ;;  %4992 = vmatprep.subr.bf16.mxu1 %v6963_v23  ;;  %v6986_v40 = vld [vmem:[#allocation16 + $0x110] sm:$0xff]   ;;  %v6988_v23 = vld [vmem:[#allocation16 + $0x158] sm:$0xff]  }
0x122f   :  { %v6987_v12 = vld [vmem:[#allocation16 + $0x190] sm:$0xff]  }
0x1231   :  { %4940 = vmatpush1.bf16.msra.mxu0 %v6958_v26  ;;  %4993 = vmatpush1.bf16.msra.mxu1 %v6961_v48  ;;  %v6989_v26 = vld [vmem:[#allocation16 + $0x1d8] sm:$0xff]  }
0x1232   :  { %4941 = vmatprep.subr.bf16.mxu0 %v6966_v34  ;;  %4994 = vmatprep.subr.bf16.mxu1 %v6969_v53  ;;  %v6990_v48 = vld [vmem:[#allocation16 + $0x118] sm:$0xff]   ;;  %v6994_v53 = vld [vmem:[#allocation16 + $0x120] sm:$0xff]  }
0x1233   :  { %v6991_v34 = vld [vmem:[#allocation16 + $0x198] sm:$0xff]  }
0x1235   :  { %4942 = vmatpush1.bf16.msra.mxu0 %v6964_v2  ;;  %4995 = vmatpush1.bf16.msra.mxu1 %v6967_v56  ;;  %v6992_v2 = vld [vmem:[#allocation16 + $0x160] sm:$0xff]  }
0x1236   :  { %4943 = vmatprep.subr.bf16.mxu0 %v6972_v7  ;;  %4996 = vmatprep.subr.bf16.mxu1 %v6975_v30  ;;  %v6993_v56 = vld [vmem:[#allocation16 + $0x1e0] sm:$0xff]   ;;  %v6996_v30 = vld [vmem:[#allocation16 + $0x168] sm:$0xff]  }
0x1237   :  { %v6995_v7 = vld [vmem:[#allocation16 + $0x1a0] sm:$0xff]  }
0x1239   :  { %4944 = vmatpush1.bf16.msra.mxu0 %v6970_v42  ;;  %4997 = vmatpush1.bf16.msra.mxu1 %v6973_v35  ;;  %v6997_v42 = vld [vmem:[#allocation16 + $0x1e8] sm:$0xff]  }
0x123a   :  { %6148 = vmatprep.subr.bf16.mxu0 %v6976_v10  ;;  %6176 = vmatprep.subr.bf16.mxu1 %v6977_v1  ;;  %v6998_v35 = vld [vmem:[#allocation16 + $0x128] sm:$0xff]  }
0x12ad   :  { %v4648_v0 = vpop.xlane.xlu0 %4647 }
0x12ae   :  { %v4655_v55 = vmul.f32 0.0078125, %v4648_v0 }
0x12af   :  { %v4650_v18 = vpop.xlane.xlu1 %4649 }
0x12b0   :  { %v8674_v45 = vsub.f32 %v4639_v57, %v4655_v55  ;;  %v4656_v31 = vmul.f32 0.0078125, %v4650_v18 }
0x12b1   :  { %v4652_v44 = vpop.xlane.xlu0 %4651 }
0x12b2   :  { %v8677_v63 = vsub.f32 %v8667_v62, %v4656_v31  ;;  %v4657_v11 = vmul.f32 0.0078125, %v4652_v44  ;;  %v4663_v32 = vmul.f32 %v8674_v45, %v8674_v45 }
0x12b4   :  { %v8681_v4 = vsub.f32 %v4641_v9, %v4657_v11  ;;  %4667 = vadd.xlane.f32.xlu0 %v4663_v32  ;;  %v4664_v47 = vmul.f32 %v8677_v63, %v8677_v63  ;;  %v5895_v11 = vld [vmem:[%s8890_s11 + $0x1] ss:$0 sm:$0xff] }
0x12b5   :  { %v4654_v60 = vpop.xlane.xlu0 %4653 }
0x12b6   :  { %v4658_v27 = vmul.f32 0.0078125, %v4654_v60  ;;  %4669 = vadd.xlane.f32.xlu1 %v4664_v47  ;;  %v4665_v29 = vmul.f32 %v8681_v4, %v8681_v4 }
0x12b8   :  { %v8688_v14 = vsub.f32 %v8671_v15, %v4658_v27  ;;  %4671 = vadd.xlane.f32.xlu0 %v4665_v29 }
0x12ba   :  { %v4666_v49 = vmul.f32 %v8688_v14, %v8688_v14 }
0x12bc   :  { %4673 = vadd.xlane.f32.xlu1 %v4666_v49 }
0x1341   :  { %v4668_v19 = vpop.xlane.xlu0 %4667 }
0x1342   :  { %v4675_v51 = vmul.f32 0.0078125, %v4668_v19  ;;  %v6999_v19 = vld [vmem:[#allocation16 + $0x1a8] sm:$0xff]  }
0x1343   :  { %v4670_v57 = vpop.xlane.xlu1 %4669 }
0x1344   :  { %v4679_v33 = vadd.f32 1e-05, %v4675_v51  ;;  %v4676_v9 = vmul.f32 0.0078125, %v4670_v57  ;;  %v7000_v51 = vld [vmem:[#allocation16 + $0x170] sm:$0xff]  }
0x1345   :  { %v4672_v20 = vpop.xlane.xlu0 %4671  ;;  %v7001_v57 = vld [vmem:[#allocation16 + $0x1f0] sm:$0xff]  }
0x1346   :  { %7200 = vrsqrt.f32 %v4679_v33  ;;  %v4680_v5 = vadd.f32 1e-05, %v4676_v9  ;;  %v4677_v13 = vmul.f32 0.0078125, %v4672_v20  ;;  %v7002_v33 = vld [vmem:[#allocation16 + $0x130] sm:$0xff]   ;;  %v7004_v20 = vld [vmem:[#allocation16 + $0x178] sm:$0xff]  }
0x1347   :  { %v7003_v9 = vld [vmem:[#allocation16 + $0x1b0] sm:$0xff]  }
0x1348   :  { %7202 = vrsqrt.f32 %v4680_v5  ;;  %v4681_v17 = vadd.f32 1e-05, %v4677_v13  ;;  %v7005_v5 = vld [vmem:[#allocation16 + $0x1f8] sm:$0xff]  }
0x1349   :  { %v4674_v61 = vpop.xlane.xlu1 %4673  ;;  %v7006_v13 = vld [vmem:[#allocation16 + $0x138] sm:$0xff]  }
0x134a   :  { %7204 = vrsqrt.f32 %v4681_v17  ;;  %v4678_v6 = vmul.f32 0.0078125, %v4674_v61  ;;  %v7007_v17 = vld [vmem:[#allocation16 + $0x1b8] sm:$0xff]   ;;  %v5896_v61 = vld [vmem:[%s8892_s13 + $0x4] sm:$0xf] }
0x134c   :  { %v4682_v25 = vadd.f32 1e-05, %v4678_v6  ;;  %v8709_v6 = vrot.slane %v5896_v61, %v7819_v39 }
0x134e   :  { %7206 = vrsqrt.f32 %v4682_v25  ;;  %v8712_v25 = vrot.slane %v5896_v61, %v7829_v43 }
0x1350   :  { %v7201_v50 = vpop.eup %7200 }
0x1351   :  { %v4687_v0 = vmul.f32 %v7201_v50, %v8674_v45  ;;  %v8715_v50 = vrot.slane %v5896_v61, %v7825_v41 }
0x1352   :  { %v7203_v55 = vpop.eup %7202 }
0x1353   :  { %v4688_v18 = vmul.f32 %v7203_v55, %v8677_v63  ;;  %v4697_v31 = vmul.f32 %v5894_v3, %v4687_v0 }
0x1354   :  { %v7205_v44 = vpop.eup %7204 }
0x1355   :  { %v4698_v32 = vmul.f32 %v5894_v3, %v4688_v18  ;;  %v4707_v47 = vadd.f32 %v5895_v11, %v4697_v31  ;;  %v4689_v27 = vmul.f32 %v7205_v44, %v8681_v4  ;;  %v6978_v4 = vld [vmem:[#allocation16 + $0x100] sm:$0xff]  }
0x1357   :  { %v4708_v60 = vadd.f32 %v5895_v11, %v4698_v32  ;;  %v4699_v45 = vmul.f32 %v5894_v3, %v4689_v27 }
0x1358   :  { %v7207_v29 = vpop.eup %7206 }
0x1359   :  { %v4711_v49 = vpack.c.bf16 %v4708_v60, %v4707_v47  ;;  %v4690_v59 = vmul.f32 %v7207_v29, %v8688_v14  ;;  %v4709_v46 = vadd.f32 %v5895_v11, %v4699_v45  ;;  %v6980_v14 = vld [vmem:[#allocation16 + $0x148] sm:$0xff]  }
0x135b   :  { %4962 = vmatmul.mubr.bf16.vlgmr.msra.gmra.mrb[92].mxu0 %v4711_v49  ;;  %5015 = vmatmul.mubr.bf16.vlgmr.msra.gmra.mrb[104].mxu1 %v4711_v49  ;;  %v4700_v28 = vmul.f32 %v5894_v3, %v4690_v59  ;;  %v8719_v3 = vrot.slane %v5896_v61, %v2126_v21 }
0x135c   :  { %4971 = vmatprep.mubr.bf16.mxu0 %v7517_v58  ;;  %5024 = vmatprep.mubr.bf16.mxu1 %v7517_v58  ;;  %v6984_v58 = vld [vmem:[#allocation16 + $0x150] sm:$0xff]  }
0x135d   :  { %v4710_v63 = vadd.f32 %v5895_v11, %v4700_v28  ;;  %6149 = vmatpush3.bf16.msra.mxu0 %v6978_v4  ;;  %6177 = vmatpush3.bf16.msra.mxu1 %v6979_v22 }
0x135e   :  { %6150 = vmatprep.subr.bf16.mxu0 %v6980_v14  ;;  %6178 = vmatprep.subr.bf16.mxu1 %v6981_v54 }
0x135f   :  { %v4712_v52 = vpack.c.bf16 %v4710_v63, %v4709_v46 }
0x1361   :  { %6151 = vmatpush3.bf16.msra.mxu0 %v6982_v8  ;;  %6179 = vmatpush3.bf16.msra.mxu1 %v6983_v16 }
0x1362   :  { %6152 = vmatprep.subr.bf16.mxu0 %v6984_v58  ;;  %6180 = vmatprep.subr.bf16.mxu1 %v6985_v24 }
0x1363   :  { %4972 = vmatmul.mubr.bf16.gmra.mrb[96].mxu0 %v4712_v52  ;;  %5025 = vmatmul.mubr.bf16.gmra.mrb[108].mxu1 %v4712_v52 }
0x1365   :  { %6153 = vmatpush3.bf16.msra.mxu0 %v6986_v40  ;;  %6181 = vmatpush3.bf16.msra.mxu1 %v6987_v12 }
0x1366   :  { %6154 = vmatprep.subr.bf16.mxu0 %v6988_v23  ;;  %6182 = vmatprep.subr.bf16.mxu1 %v6989_v26 }
0x1369   :  { %6155 = vmatpush3.bf16.msra.mxu0 %v6990_v48  ;;  %6183 = vmatpush3.bf16.msra.mxu1 %v6991_v34 }
0x136a   :  { %6156 = vmatprep.subr.bf16.mxu0 %v6992_v2  ;;  %6184 = vmatprep.subr.bf16.mxu1 %v6993_v56 }
0x136d   :  { %6157 = vmatpush3.bf16.msra.mxu0 %v6994_v53  ;;  %6185 = vmatpush3.bf16.msra.mxu1 %v6995_v7 }
0x136e   :  { %6158 = vmatprep.subr.bf16.mxu0 %v6996_v30  ;;  %6186 = vmatprep.subr.bf16.mxu1 %v6997_v42 }
0x1371   :  { %6159 = vmatpush3.bf16.msra.mxu0 %v6998_v35  ;;  %6187 = vmatpush3.bf16.msra.mxu1 %v6999_v19 }
0x1372   :  { %6160 = vmatprep.subr.bf16.mxu0 %v7000_v51  ;;  %6188 = vmatprep.subr.bf16.mxu1 %v7001_v57 }
0x1375   :  { %6161 = vmatpush3.bf16.msra.mxu0 %v7002_v33  ;;  %6189 = vmatpush3.bf16.msra.mxu1 %v7003_v9 }
0x1376   :  { %6162 = vmatprep.subr.bf16.mxu0 %v7004_v20  ;;  %6190 = vmatprep.subr.bf16.mxu1 %v7005_v5 }
0x1379   :  { %6163 = vmatpush3.bf16.msra.mxu0 %v7006_v13  ;;  %6191 = vmatpush3.bf16.msra.mxu1 %v7007_v17 }
0x137a   :  { %6517 = vmatprep.subr.bf16.mxu0 %v7518_v36 }
0x142e   :  { %v4963_v0 = vpop.f32.mrb[92].mxu0  ;;  %v5016_v55 = vpop.f32.mrb[104].mxu1 }
0x142f   :  { %v8722_v18 = vadd.f32 %v4963_v0, %v8709_v6  ;;  %v8725_v31 = vadd.f32 %v5016_v55, %v8712_v25  ;;  %v4965_v39 = vpop.f32.mrb[93].mxu0  ;;  %v5018_v44 = vpop.f32.mrb[105].mxu1 }
0x1430   :  { %v8728_v43 = vadd.f32 %v4965_v39, %v8715_v50  ;;  %v8731_v41 = vadd.f32 %v5018_v44, %v8719_v3  ;;  %v4967_v11 = vpop.f32.mrb[94].mxu0  ;;  %v5020_v38 = vpop.f32.mrb[106].mxu1 }
0x1431   :  { %v5035_v21 = vmul.f32 %v8722_v18, %v8722_v18  ;;  %v5037_v32 = vmul.f32 %v8725_v31, %v8725_v31  ;;  %v8738_v47 = vadd.f32 %v4967_v11, %v8709_v6  ;;  %v8741_v60 = vadd.f32 %v5020_v38, %v8712_v25  ;;  %v4969_v27 = vpop.f32.mrb[95].mxu0  ;;  %v5022_v29 = vpop.f32.mrb[107].mxu1 }
0x1432   :  { %v5036_v49 = vmul.f32 %v8728_v43, %v8728_v43  ;;  %v5038_v59 = vmul.f32 %v8731_v41, %v8731_v41  ;;  %v8748_v45 = vadd.f32 %v4969_v27, %v8715_v50  ;;  %v8751_v28 = vadd.f32 %v5022_v29, %v8719_v3 }
0x1433   :  { %v5051_v63 = vmul.f32 %v5035_v21, %v8722_v18  ;;  %v5053_v46 = vmul.f32 %v5037_v32, %v8725_v31  ;;  %v5039_v52 = vmul.f32 %v8738_v47, %v8738_v47  ;;  %v5041_v10 = vmul.f32 %v8741_v60, %v8741_v60 }
0x1434   :  { %v5052_v1 = vmul.f32 %v5036_v49, %v8728_v43  ;;  %v5054_v4 = vmul.f32 %v5038_v59, %v8731_v41  ;;  %v5040_v22 = vmul.f32 %v8748_v45, %v8748_v45  ;;  %v5042_v14 = vmul.f32 %v8751_v28, %v8751_v28 }
0x1435   :  { %v5067_v54 = vmul.f32 0.044715, %v5051_v63  ;;  %v5069_v8 = vmul.f32 0.044715, %v5053_v46  ;;  %v5055_v16 = vmul.f32 %v5039_v52, %v8738_v47  ;;  %v5057_v58 = vmul.f32 %v5041_v10, %v8741_v60 }
0x1436   :  { %v5068_v24 = vmul.f32 0.044715, %v5052_v1  ;;  %v5070_v40 = vmul.f32 0.044715, %v5054_v4  ;;  %v5056_v12 = vmul.f32 %v5040_v22, %v8748_v45  ;;  %v5058_v23 = vmul.f32 %v5042_v14, %v8751_v28  ;;  %v4973_v26 = vpop.f32.mrb[96].mxu0  ;;  %v5026_v48 = vpop.f32.mrb[108].mxu1 }
0x1437   :  { %v5083_v34 = vadd.f32 %v5067_v54, %v8722_v18  ;;  %v5085_v2 = vadd.f32 %v5069_v8, %v8725_v31  ;;  %v5071_v56 = vmul.f32 0.044715, %v5055_v16  ;;  %v5073_v53 = vmul.f32 0.044715, %v5057_v58  ;;  %v4975_v7 = vpop.f32.mrb[97].mxu0  ;;  %v5028_v30 = vpop.f32.mrb[109].mxu1 }
0x1438   :  { %v5084_v42 = vadd.f32 %v5068_v24, %v8728_v43  ;;  %v5086_v35 = vadd.f32 %v5070_v40, %v8731_v41  ;;  %v5072_v19 = vmul.f32 0.044715, %v5056_v12  ;;  %v5074_v51 = vmul.f32 0.044715, %v5058_v23  ;;  %v4977_v57 = vpop.f32.mrb[98].mxu0  ;;  %v5030_v33 = vpop.f32.mrb[110].mxu1 }
0x1439   :  { %v5099_v9 = vmul.f32 0.7978846, %v5083_v34  ;;  %v5101_v20 = vmul.f32 0.7978846, %v5085_v2  ;;  %v5087_v5 = vadd.f32 %v5071_v56, %v8738_v47  ;;  %v5089_v13 = vadd.f32 %v5073_v53, %v8741_v60  ;;  %v4979_v17 = vpop.f32.mrb[99].mxu0  ;;  %v5032_v61 = vpop.f32.mrb[111].mxu1 }
0x143a   :  { %v5100_v0 = vmul.f32 0.7978846, %v5084_v42  ;;  %v5102_v55 = vmul.f32 0.7978846, %v5086_v35  ;;  %v5088_v39 = vadd.f32 %v5072_v19, %v8748_v45  ;;  %v5090_v44 = vadd.f32 %v5074_v51, %v8751_v28 }
0x143b   :  { %7208 = vtanh.f32 %v5099_v9  ;;  %v5103_v11 = vmul.f32 0.7978846, %v5087_v5  ;;  %v5105_v38 = vmul.f32 0.7978846, %v5089_v13  ;;  %v8778_v21 = vadd.f32 %v4973_v26, %v8709_v6 }
0x143c   :  { %7210 = vtanh.f32 %v5101_v20  ;;  %v5104_v32 = vmul.f32 0.7978846, %v5088_v39  ;;  %v5106_v27 = vmul.f32 0.7978846, %v5090_v44  ;;  %v8781_v29 = vadd.f32 %v5026_v48, %v8712_v25 }
0x143d   :  { %7212 = vtanh.f32 %v5100_v0  ;;  %v5043_v49 = vmul.f32 %v8778_v21, %v8778_v21  ;;  %v8786_v59 = vadd.f32 %v4975_v7, %v8715_v50  ;;  %v8789_v63 = vadd.f32 %v5028_v30, %v8719_v3 }
0x143e   :  { %7214 = vtanh.f32 %v5102_v55  ;;  %v5045_v46 = vmul.f32 %v8781_v29, %v8781_v29  ;;  %v8794_v52 = vadd.f32 %v4977_v57, %v8709_v6  ;;  %v8797_v10 = vadd.f32 %v5030_v33, %v8712_v25 }
0x143f   :  { %7216 = vtanh.f32 %v5103_v11  ;;  %v5059_v1 = vmul.f32 %v5043_v49, %v8778_v21  ;;  %v5044_v4 = vmul.f32 %v8786_v59, %v8786_v59  ;;  %v5046_v22 = vmul.f32 %v8789_v63, %v8789_v63 }
0x1440   :  { %7218 = vtanh.f32 %v5105_v38  ;;  %v5061_v14 = vmul.f32 %v5045_v46, %v8781_v29  ;;  %v5047_v54 = vmul.f32 %v8794_v52, %v8794_v52  ;;  %v5049_v6 = vmul.f32 %v8797_v10, %v8797_v10 }
0x1441   :  { %7220 = vtanh.f32 %v5104_v32  ;;  %v5075_v25 = vmul.f32 0.044715, %v5059_v1  ;;  %v5060_v8 = vmul.f32 %v5044_v4, %v8786_v59  ;;  %v5062_v16 = vmul.f32 %v5046_v22, %v8789_v63 }
0x1442   :  { %7222 = vtanh.f32 %v5106_v27  ;;  %v5077_v58 = vmul.f32 0.044715, %v5061_v14  ;;  %v5063_v24 = vmul.f32 %v5047_v54, %v8794_v52  ;;  %v5065_v40 = vmul.f32 %v5049_v6, %v8797_v10 }
0x1443   :  { %v5091_v12 = vadd.f32 %v5075_v25, %v8778_v21  ;;  %v5076_v23 = vmul.f32 0.044715, %v5060_v8  ;;  %v5078_v26 = vmul.f32 0.044715, %v5062_v16  ;;  %v8815_v48 = vadd.f32 %v4979_v17, %v8715_v50 }
0x1444   :  { %v5093_v34 = vadd.f32 %v5077_v58, %v8781_v29  ;;  %v5079_v2 = vmul.f32 0.044715, %v5063_v24  ;;  %v5081_v56 = vmul.f32 0.044715, %v5065_v40  ;;  %v8819_v53 = vadd.f32 %v5032_v61, %v8719_v3 }
0x1445   :  { %v7209_v7 = vpop.eup %7208  ;;  %v5107_v30 = vmul.f32 0.7978846, %v5091_v12  ;;  %v5092_v42 = vadd.f32 %v5076_v23, %v8786_v59  ;;  %v5094_v35 = vadd.f32 %v5078_v26, %v8789_v63  ;;  %v5048_v19 = vmul.f32 %v8815_v48, %v8815_v48 }
0x1446   :  { %v7211_v51 = vpop.eup %7210  ;;  %v5131_v57 = vadd.f32 1.0, %v7209_v7  ;;  %v5109_v50 = vmul.f32 0.7978846, %v5093_v34  ;;  %v5095_v33 = vadd.f32 %v5079_v2, %v8794_v52  ;;  %v5097_v9 = vadd.f32 %v5081_v56, %v8797_v10 }
0x1447   :  { %v7213_v20 = vpop.eup %7212  ;;  %v5133_v5 = vadd.f32 1.0, %v7211_v51  ;;  %7224 = vtanh.f32 %v5107_v30  ;;  %v5108_v3 = vmul.f32 0.7978846, %v5092_v42  ;;  %v5110_v13 = vmul.f32 0.7978846, %v5094_v35 }
0x1448   :  { %v7215_v17 = vpop.eup %7214  ;;  %v5147_v61 = vmul.f32 0.5, %v5131_v57  ;;  %7226 = vtanh.f32 %v5109_v50  ;;  %v5111_v0 = vmul.f32 0.7978846, %v5095_v33  ;;  %v5113_v55 = vmul.f32 0.7978846, %v5097_v9 }
0x1449   :  { %v7217_v39 = vpop.eup %7216  ;;  %v5149_v44 = vmul.f32 0.5, %v5133_v5  ;;  %7228 = vtanh.f32 %v5108_v3  ;;  %v5064_v11 = vmul.f32 %v5048_v19, %v8815_v48  ;;  %v5050_v38 = vmul.f32 %v8819_v53, %v8819_v53 }
0x144a   :  { %v7219_v32 = vpop.eup %7218  ;;  %v5163_v27 = vmul.f32 %v5147_v61, %v8722_v18  ;;  %v5135_v49 = vadd.f32 1.0, %v7217_v39  ;;  %7230 = vtanh.f32 %v5110_v13  ;;  %v5132_v46 = vadd.f32 1.0, %v7213_v20  ;;  %v7008_v20 = vld [vmem:[#allocation17] sm:$0xff]  }
0x144b   :  { %v7221_v1 = vpop.eup %7220  ;;  %v5165_v4 = vmul.f32 %v5149_v44, %v8725_v31  ;;  %v5137_v22 = vadd.f32 1.0, %v7219_v32  ;;  %7232 = vtanh.f32 %v5111_v0  ;;  %v5080_v14 = vmul.f32 0.044715, %v5064_v11 }
0x144c   :  { %v7223_v54 = vpop.eup %7222  ;;  %v5151_v6 = vmul.f32 0.5, %v5135_v49  ;;  %7234 = vtanh.f32 %v5113_v55  ;;  %v5066_v25 = vmul.f32 %v5050_v38, %v8819_v53  ;;  %v5136_v8 = vadd.f32 1.0, %v7221_v1 }
0x144d   :  { %v5153_v16 = vmul.f32 0.5, %v5137_v22  ;;  %v5096_v58 = vadd.f32 %v5080_v14, %v8815_v48  ;;  %v5148_v24 = vmul.f32 0.5, %v5132_v46  ;;  %v5134_v18 = vadd.f32 1.0, %v7215_v17 }
0x144e   :  { %v5167_v40 = vmul.f32 %v5151_v6, %v8738_v47  ;;  %v5082_v12 = vmul.f32 0.044715, %v5066_v25  ;;  %v5152_v23 = vmul.f32 0.5, %v5136_v8  ;;  %v5138_v26 = vadd.f32 1.0, %v7223_v54 }
0x144f   :  { %v5169_v31 = vmul.f32 %v5153_v16, %v8741_v60  ;;  %v5112_v34 = vmul.f32 0.7978846, %v5096_v58  ;;  %v5164_v2 = vmul.f32 %v5148_v24, %v8728_v43  ;;  %v5150_v56 = vmul.f32 0.5, %v5134_v18 }
0x1450   :  { %v5179_v7 = vpack.c.bf16 %v5167_v40, %v5163_v27  ;;  %v5098_v30 = vadd.f32 %v5082_v12, %v8819_v53  ;;  %v5168_v42 = vmul.f32 %v5152_v23, %v8748_v45  ;;  %v5154_v35 = vmul.f32 0.5, %v5138_v26  ;;  %v7010_v40 = vld [vmem:[#allocation17 + $0x10] sm:$0xff]   ;;  %v7015_v12 = vld [vmem:[#allocation17 + $0x38] sm:$0xff]  }
0x1451   :  { %v7225_v19 = vpop.eup %7224  ;;  %v5181_v51 = vpack.c.bf16 %v5169_v31, %v5165_v4  ;;  %7236 = vtanh.f32 %v5112_v34  ;;  %v5166_v47 = vmul.f32 %v5150_v56, %v8731_v41  ;;  %v7009_v41 = vld [vmem:[#allocation17 + $0x8] sm:$0xff]  }
0x1452   :  { %v7227_v57 = vpop.eup %7226  ;;  %v5114_v50 = vmul.f32 0.7978846, %v5098_v30  ;;  %v5180_v33 = vpack.c.bf16 %v5168_v42, %v5164_v2  ;;  %v5170_v60 = vmul.f32 %v5154_v35, %v8751_v28  ;;  %v5139_v9 = vadd.f32 1.0, %v7225_v19  ;;  %v5930_v56 = vld [vmem:[%s8894_s15 + $0x1] ss:$0 sm:$0xff] }
0x1453   :  { %v7229_v43 = vpop.eup %7228  ;;  %v5141_v5 = vadd.f32 1.0, %v7227_v57 }
0x1454   :  { %v7231_v3 = vpop.eup %7230  ;;  %7238 = vtanh.f32 %v5114_v50  ;;  %5484 = vmatprep.mubr.bf16.mxu0 %v5180_v33  ;;  %v5182_v13 = vpack.c.bf16 %v5170_v60, %v5166_v47  ;;  %v5155_v0 = vmul.f32 0.5, %v5139_v9  ;;  %v5140_v28 = vadd.f32 1.0, %v7229_v43 }
0x1455   :  { %v7233_v45 = vpop.eup %7232  ;;  %5485 = vmatmul.mubr.bf16.vlgmr.msra.gmra.mrb[100].mxu0 %v5179_v7  ;;  %v5157_v39 = vmul.f32 0.5, %v5141_v5  ;;  %v5142_v49 = vadd.f32 1.0, %v7231_v3 }
0x1456   :  { %v7235_v17 = vpop.eup %7234  ;;  %5531 = vmatprep.mubr.bf16.mxu1 %v5182_v13  ;;  %v5143_v61 = vadd.f32 1.0, %v7233_v45  ;;  %6518 = vmatpush3.bf16.msra.mxu0 %v7008_v20  ;;  %v5171_v38 = vmul.f32 %v5155_v0, %v8778_v21  ;;  %v5156_v22 = vmul.f32 0.5, %v5140_v28  ;;  %v5963_v28 = vld [vmem:[%s8916_s3] ss:$0 sm:$0xff] }
0x1457   :  { %5532 = vmatmul.mubr.bf16.vlgmr.msra.gmra.mrb[112].mxu1 %v5181_v51  ;;  %v5145_v55 = vadd.f32 1.0, %v7235_v17  ;;  %6519 = vmatprep.subr.bf16.mxu0 %v7518_v36  ;;  %v5173_v46 = vmul.f32 %v5157_v39, %v8781_v29  ;;  %v5158_v16 = vmul.f32 0.5, %v5142_v49 }
0x1458   :  { %v5159_v44 = vmul.f32 0.5, %v5143_v61  ;;  %v5172_v21 = vmul.f32 %v5156_v22, %v8786_v59  ;;  %v7011_v59 = vld [vmem:[#allocation17 + $0x18] sm:$0xff]  }
0x1459   :  { %v5161_v11 = vmul.f32 0.5, %v5145_v55  ;;  %v5174_v29 = vmul.f32 %v5158_v16, %v8789_v63  ;;  %v7013_v63 = vld [vmem:[#allocation17 + $0x28] sm:$0xff]  }
0x145a   :  { %v5175_v32 = vmul.f32 %v5159_v44, %v8794_v52  ;;  %6520 = vmatpush3.bf16.msra.mxu0 %v7009_v41 }
0x145b   :  { %v7237_v27 = vpop.eup %7236  ;;  %v5177_v1 = vmul.f32 %v5161_v11, %v8797_v10  ;;  %6521 = vmatprep.subr.bf16.mxu0 %v7518_v36 }
0x145c   :  { %v5144_v4 = vadd.f32 1.0, %v7237_v27  ;;  %v5183_v14 = vpack.c.bf16 %v5175_v32, %v5171_v38 }
0x145d   :  { %v5185_v54 = vpack.c.bf16 %v5177_v1, %v5173_v46 }
0x145e   :  { %v7239_v6 = vpop.eup %7238  ;;  %v5160_v25 = vmul.f32 0.5, %v5144_v4  ;;  %6522 = vmatpush3.bf16.msra.mxu0 %v7010_v40 }
0x145f   :  { %v5146_v8 = vadd.f32 1.0, %v7239_v6  ;;  %6523 = vmatprep.subr.bf16.mxu0 %v7518_v36 }
0x1460   :  { %v5176_v52 = vmul.f32 %v5160_v25, %v8815_v48  ;;  %v7012_v48 = vld [vmem:[#allocation17 + $0x20] sm:$0xff]  }
0x1461   :  { %v5162_v58 = vmul.f32 0.5, %v5146_v8 }
0x1462   :  { %v5184_v24 = vpack.c.bf16 %v5176_v52, %v5172_v21  ;;  %6524 = vmatpush3.bf16.msra.mxu0 %v7011_v59 }
0x1463   :  { %v5178_v10 = vmul.f32 %v5162_v58, %v8819_v53  ;;  %6525 = vmatprep.subr.bf16.mxu0 %v7518_v36  ;;  %v7014_v53 = vld [vmem:[#allocation17 + $0x30] sm:$0xff]  }
0x1464   :  { %5491 = vmatprep.mubr.bf16.mxu0 %v5184_v24 }
0x1465   :  { %v5186_v18 = vpack.c.bf16 %v5178_v10, %v5174_v29  ;;  %5492 = vmatmul.mubr.bf16.gmra.mrb[104].mxu0 %v5183_v14 }
0x1466   :  { %6533 = vmatprep.mubr.msk.bf16.mxu0 %vm7519_vm1, %v7518_v36  ;;  %6526 = vmatpush3.bf16.msra.mxu0 %v7012_v48 }
0x1467   :  { %5538 = vmatprep.mubr.bf16.mxu1 %v5186_v18  ;;  %6527 = vmatprep.subr.bf16.mxu0 %v7518_v36 }
0x1468   :  { %5539 = vmatmul.mubr.bf16.gmra.mrb[116].mxu1 %v5185_v54 }
0x146a   :  { %6528 = vmatpush3.bf16.msra.mxu0 %v7013_v63 }
0x146b   :  { %6529 = vmatprep.subr.bf16.mxu0 %v7518_v36 }
0x146e   :  { %6530 = vmatpush3.bf16.msra.mxu0 %v7014_v53 }
0x146f   :  { %6531 = vmatprep.subr.bf16.mxu0 %v7518_v36 }
0x1472   :  { %6532 = vmatpush3.bf16.msra.mxu0 %v7015_v12 }
0x1528   :  { %v6164_v23 = vpop.f32.mrb[100].mxu0 }
0x1529   :  { %v6165_v26 = vpop.f32.mrb[101].mxu0 }
0x152a   :  { %v6192_v31 = vpop.f32.mrb[112].mxu1  ;;  %v6167_v34 = vpop.f32.mrb[102].mxu0 }
0x152b   :  { %v6193_v2 = vpop.f32.mrb[113].mxu1  ;;  %v6168_v7 = vpop.f32.mrb[103].mxu0 }
0x152c   :  { %v6195_v30 = vpop.f32.mrb[114].mxu1  ;;  %v6169_v42 = vadd.f32 %v6168_v7, %v6167_v34 }
0x152d   :  { %v6196_v35 = vpop.f32.mrb[115].mxu1 }
0x152e   :  { %v5489_v19 = vadd.f32 %v6169_v42, %v5930_v56  ;;  %v6197_v51 = vadd.f32 %v6196_v35, %v6195_v30 }
0x1530   :  { %v5536_v47 = vadd.f32 %v6197_v51, %v5489_v19 }
0x1532   :  { %v5546_v45 = vadd.f32 %v5536_v47, %v8667_v62 }
0x1534   :  { %v5549_v0 = vrot.slane %v5546_v45, 7 }
0x1538   :  { %v6170_v57 = vpop.f32.mrb[104].mxu0 }
0x1539   :  { %v6171_v36 = vpop.f32.mrb[105].mxu0 }
0x153a   :  { %v6173_v50 = vpop.f32.mrb[106].mxu0 }
0x153b   :  { %v6198_v33 = vpop.f32.mrb[116].mxu1  ;;  %v6174_v60 = vpop.f32.mrb[107].mxu0 }
0x153c   :  { %v6199_v9 = vpop.f32.mrb[117].mxu1  ;;  %v6175_v20 = vadd.f32 %v6174_v60, %v6173_v50 }
0x153d   :  { %v6201_v43 = vpop.f32.mrb[118].mxu1 }
0x153e   :  { %v5496_v5 = vadd.f32 %v6175_v20, %v5930_v56  ;;  %v6202_v3 = vpop.f32.mrb[119].mxu1 }
0x153f   :  { %v6203_v13 = vadd.f32 %v6202_v3, %v6201_v43 }
0x1541   :  { %v5543_v17 = vadd.f32 %v6203_v13, %v5496_v5 }
0x1543   :  { %v5547_v61 = vadd.f32 %v5543_v17, %v8671_v15  ;;  %v5669_v15 = vand.u32 127, %v389_v37 }
0x1545   :  { %v5552_v41 = vrot.slane %v5547_v61, 6  ;;  %vm5670_vm4 = vcmp.ge.s32.totalorder %v5669_v15, 1  ;;  %vm5671_vm5 = vcmp.lt.s32.totalorder %v5669_v15, 2 }
0x1546   :  { %vm5672_vm6 = vmand %vm5670_vm4, %vm5671_vm5 }
0x1547   :  { %v5555_v55 = vsel %vm5554_vm3, %v5549_v0, %v5552_v41 }
0x1548   :  { %v5556_v39 = vpack.c.bf16 %v5555_v55, %v5555_v55 }
0x154a   :  { %6534 = vmatmul.mubr.bf16.vlgmr.msra.gmra.mrb[108].mxu0 %v5556_v39 }
0x161d   :  { %v5662_v44 = vpop.f32.mrb[108].mxu0 }
0x161e   :  { %v5663_v11 = vadd.f32 %v5963_v28, %v5662_v44  ;;  %v6535_v38 = vpop.f32.mrb[109].mxu0 }
0x161f   :  { %v5665_v32 = vpop.f32.mrb[110].mxu0 }
0x1620   :  { %v5673_v27 = vmax.f32 %v5663_v11, -20.0  ;;  %v6536_v49 = vpop.f32.mrb[111].mxu0 }
0x1622   :  { %v5674_v62 = vmin.f32 %v5673_v27, 2.0 }
0x1624   :  { %v5675_v46 = vmul.f32 1.442695, %v5674_v62 }
0x1626   :  { %7240 = vpow2.f32 %v5675_v46 }
0x1630   :  { %v7241_v1 = vpop.eup %7240 }
0x1631   :  { %v5677_v4 = vsel %vm5672_vm6, %v7241_v1, %v5663_v11 }
0x1632   :  { %5678 = vst [vmem:[#allocation19] sm:$0x3] %v5677_v4 }
0x1633   :  { %7473 = shalt.err (!%p7470_p0)
}
0x1634   :  { %s8917_s21 = sld [smem:[#allocation31_spill]] }
0x163a   :  { %s7474_s25 = scalar_lea.hbm %s8917_s21, 32 }
0x163b   :  { %p7475_p1 = scmp.ne.s32.totalorder %s8917_s21, %s7474_s25  ;;  %p7478_p2 = scmp.lt.u32.totalorder %s7474_s25, %s8917_s21 }
0x163d   :  { %p7480_p3 = pnand %p7478_p2, %p7475_p1 }
0x163f   :  { %7483 = shalt.err (!%p7480_p3)
}
0x1640   :  { %5688 = dma.vmem_to_hbm [thread:$0]  %s5686_s6, 32, %s8917_s21, [#allocation4]  }
0x1641   :  { %7496 = dma.done.wait [#allocation4], 32  }
0x1642   :  { %7497 = vsyncadd [#allocation4], 4294967264 }
0x1643   :  { %5692 = vsyncpa [#allocation3], 1 }
0x1644   :  { %5693 = vsyncpa [#allocation6], 1 }
0x1645   :  { %5694 = vsyncpa [#allocation9], 1 }
0x1646   :  { %5695 = vsyncpa [#allocation12], 1 }
0x1647   :  { %5696 = vsyncpa [#allocation15], 1 }
0x1648   :  { %5697 = vsyncpa [#allocation18], 1 }
0x1649   :  { %5698 = vsyncpa [#allocation4], 1 }

</bundles_post_ra>
